<compile_context>
chip_gen: v7x
topology: tpu7x:2x2x1
jax: 0.10.0
libtpu: 0.0.40
codegen_flags: <defaults>
</compile_context>

<pallas_src>
import functools

import jax
import jax.numpy as jnp
from jax.experimental import pallas as pl
from jax.experimental.pallas import tpu as pltpu

LANES = 128


# ------------------------------ fused kernel --------------------------------


def _resnet3d_fused_kernel(x_ref, w1_ref, s1_ref, b1_ref,
                           wb1_ref, sb1_ref, bb1_ref,
                           wb2_ref, sb2_ref, bb2_ref,
                           fcw_ref, fcb_ref,
                           o_ref,
                           xpad_ref, apad_ref, h1_ref,
                           *, D, H, W, C, Cin):
    """One grid step == one batch element; the whole encoder runs from VMEM."""
    M = D * H
    WC = W * C

    # Zero the padded scratch buffers (halo stays zero, interiors are
    # overwritten below).  ~150 KB of VMEM stores; keeps every grid step
    # independent so the batch axis shards cleanly across TensorCores.
    xpad_ref[...] = jnp.zeros_like(xpad_ref)
    apad_ref[...] = jnp.zeros_like(apad_ref)

    def banded_conv3d(pad_ref, w_ref):
        """3x3x3 'same' conv as 9 banded MXU matmuls.

        pad_ref : [D+2, H+2, (W+2)*ci]  zero-padded, (w, ci)-packed lanes
        w_ref   : [9, (W+2)*ci, W*C]    banded weights, tap t = kd*3 + kh
        returns   [D*H, W*C] float32
        """
        kdim = pad_ref.shape[-1]
        acc = jnp.zeros((M, WC), jnp.float32)
        for kd in range(3):
            for kh in range(3):
                lhs = pad_ref[kd:kd + D, kh:kh + H, :].reshape(M, kdim)
                acc = acc + jnp.dot(lhs, w_ref[kd * 3 + kh],
                                    preferred_element_type=jnp.float32)
        return acc

    # ---- stem: conv3x3x3 + BN + ReLU ---------------------------------------
    xpad_ref[1:D + 1, 1:H + 1, 0:W * Cin] = x_ref[0]
    y = banded_conv3d(xpad_ref, w1_ref)
    y = jnp.maximum(y * s1_ref[...] + b1_ref[...], 0.0)
    h1_ref[...] = y                                      # residual kept in f32

    # ---- residual block, conv1 + BN + ReLU ---------------------------------
    apad_ref[1:D + 1, 1:H + 1, 0:WC] = y.reshape(D, H, WC).astype(apad_ref.dtype)
    y = banded_conv3d(apad_ref, wb1_ref)
    y = jnp.maximum(y * sb1_ref[...] + bb1_ref[...], 0.0)

    # ---- residual block, conv2 + BN + residual + ReLU ----------------------
    apad_ref[1:D + 1, 1:H + 1, 0:WC] = y.reshape(D, H, WC).astype(apad_ref.dtype)
    y = banded_conv3d(apad_ref, wb2_ref)
    y = jnp.maximum(y * sb2_ref[...] + bb2_ref[...] + h1_ref[...], 0.0)

    # ---- global average pool + FC head -------------------------------------
    pooled = jnp.sum(y, axis=0, keepdims=True)           # [1, W*C]; mean folded
    logits = jnp.dot(pooled, fcw_ref[...],               # into fcw on host
                     preferred_element_type=jnp.float32)  # [1, NP]
    row = logits + fcb_ref[...]
    # 8-sublane-aligned output block; row 0 / first num_classes lanes = logits.
    o_ref[0] = jnp.broadcast_to(row, o_ref.shape[1:])


# --------------------------- parameter plumbing ------------------------------


def _lane_base(wp_idx, W_sp, cin):
    """Lane offset of padded-width index wp_idx in the packed lane layout.

    Interior positions wp_idx = 1..W map to lanes 0..W*cin-1 (so in-kernel
    interior stores are lane-aligned at 0); the two halo positions live in the
    trailing lanes and are never written after the zero-init.
    """
    if 1 <= wp_idx <= W_sp:
        return (wp_idx - 1) * cin
    if wp_idx == 0:
        return W_sp * cin
    return (W_sp + 1) * cin                               # wp_idx == W_sp + 1


def _banded_weights(w_oidhw, W_sp):
    """PyTorch Conv3d weight [Cout, Cin, 3, 3, 3] -> banded MXU operands.

    Returns [9, (W_sp+2)*Cin, W_sp*Cout] bf16, tap index t = kd*3 + kh.
    Row `lane_base(w') + ci`, column `w*Cout + co` holds weight[co, ci, kd, kh,
    w'-w] (zero outside the 3-wide band), so that
        out[(d,h), (w,co)] += LHS_{kd,kh}[(d,h), :] @ RHS[t]
    performs the kw and Cin contraction for every output w at once.
    """
    cout, cin = w_oidhw.shape[0], w_oidhw.shape[1]
    taps = jnp.transpose(w_oidhw, (2, 3, 4, 1, 0)).astype(jnp.float32)
    rhs = jnp.zeros((9, (W_sp + 2) * cin, W_sp * cout), jnp.float32)
    for kw in range(3):
        blk = taps[:, :, kw].reshape(9, cin, cout)        # [9, Cin, Cout]
        for w in range(W_sp):
            r0 = _lane_base(w + kw, W_sp, cin)
            rhs = rhs.at[:, r0:r0 + cin, w * cout:(w + 1) * cout].set(blk)
    return rhs.astype(jnp.bfloat16)


def _fold_bn_packed(bn, W_sp, eps=1e-5):
    """Eval-mode BN -> (scale, shift), tiled over w so they apply per lane."""
    gamma, beta, mean, var = bn
    scale = gamma / jnp.sqrt(var + eps)
    shift = beta - mean * scale
    scale = jnp.tile(scale, W_sp).reshape(1, -1).astype(jnp.float32)
    shift = jnp.tile(shift, W_sp).reshape(1, -1).astype(jnp.float32)
    return scale, shift


def init_params(key, c_in=1, c=16, num_classes=1):
    ks = jax.random.split(key, 8)

    def conv_w(k, cout, cin):
        return 0.1 * jax.random.normal(k, (cout, cin, 3, 3, 3), jnp.float32)

    def bn_params(k, cout):
        k1, k2, k3, k4 = jax.random.split(k, 4)
        gamma = 1.0 + 0.1 * jax.random.normal(k1, (cout,), jnp.float32)
        beta = 0.1 * jax.random.normal(k2, (cout,), jnp.float32)
        mean = 0.1 * jax.random.normal(k3, (cout,), jnp.float32)
        var = 1.0 + 0.1 * jnp.abs(jax.random.normal(k4, (cout,), jnp.float32))
        return (gamma, beta, mean, var)

    return {
        "conv1": conv_w(ks[0], c, c_in),
        "bn1": bn_params(ks[1], c),
        "b_conv1": conv_w(ks[2], c, c),
        "b_bn1": bn_params(ks[3], c),
        "b_conv2": conv_w(ks[4], c, c),
        "b_bn2": bn_params(ks[5], c),
        "fc_w": 0.1 * jax.random.normal(ks[6], (num_classes, c), jnp.float32),
        "fc_b": 0.1 * jax.random.normal(ks[7], (num_classes,), jnp.float32),
    }


# ------------------------------ forward pass ---------------------------------


def resnet3d_forward(x_ncdhw, params):
    """Reproduces ResNet3D.forward: encoder(x).unsqueeze(0).

    Input:  x [B, Cin, D, H, W]  (PyTorch NCDHW)
    Output: [1, B, num_classes]
    """
    B, Cin, D, H, W = x_ncdhw.shape
    C = params["conv1"].shape[0]
    num_classes = params["fc_w"].shape[0]
    WC = W * C
    NP = LANES
    assert num_classes <= NP

    # Layout prep of the (tiny) network input: NCDHW -> [B, D, H, W*Cin] bf16.
    x = jnp.transpose(x_ncdhw, (0, 2, 3, 4, 1)).reshape(B, D, H, W * Cin)
    x = x.astype(jnp.bfloat16)

    # Banded conv weights and folded BN (packed over (w, c) lanes).
    w1 = _banded_weights(params["conv1"], W)               # [9, (W+2)*Cin, WC]
    wb1 = _banded_weights(params["b_conv1"], W)            # [9, (W+2)*C,  WC]
    wb2 = _banded_weights(params["b_conv2"], W)
    s1, b1 = _fold_bn_packed(params["bn1"], W)
    sb1, bb1 = _fold_bn_packed(params["b_bn1"], W)
    sb2, bb2 = _fold_bn_packed(params["b_bn2"], W)

    # FC head: 1/(D*H*W) mean factor folded in; rows packed as (w, c).
    fcw = jnp.tile(params["fc_w"].astype(jnp.float32).T, (W, 1)) / float(D * H * W)
    fcw = jnp.pad(fcw, ((0, 0), (0, NP - num_classes)))    # [WC, NP]
    fcb = jnp.pad(params["fc_b"].reshape(1, -1).astype(jnp.float32),
                  ((0, 0), (0, NP - num_classes)))         # [1, NP]

    kernel = functools.partial(_resnet3d_fused_kernel,
                               D=D, H=H, W=W, C=C, Cin=Cin)

    # Advisory cost estimate with the REAL (unpadded) channel counts.
    flops = (2 * B * D * H * W * 27 * (Cin * C + 2 * C * C)
             + 2 * B * C * num_classes)
    bytes_accessed = int(
        x.size * x.dtype.itemsize
        + (w1.size + wb1.size + wb2.size) * 2
        + (s1.size + b1.size + sb1.size + bb1.size + sb2.size + bb2.size
           + fcw.size + fcb.size) * 4
        + B * 8 * NP * 4)

    out = pl.pallas_call(
        kernel,
        out_shape=jax.ShapeDtypeStruct((B, 8, NP), jnp.float32),
        grid=(B,),
        in_specs=[
            pl.BlockSpec((1, D, H, W * Cin), lambda b: (b, 0, 0, 0)),
            pl.BlockSpec(w1.shape, lambda b: (0, 0, 0)),
            pl.BlockSpec(s1.shape, lambda b: (0, 0)),
            pl.BlockSpec(b1.shape, lambda b: (0, 0)),
            pl.BlockSpec(wb1.shape, lambda b: (0, 0, 0)),
            pl.BlockSpec(sb1.shape, lambda b: (0, 0)),
            pl.BlockSpec(bb1.shape, lambda b: (0, 0)),
            pl.BlockSpec(wb2.shape, lambda b: (0, 0, 0)),
            pl.BlockSpec(sb2.shape, lambda b: (0, 0)),
            pl.BlockSpec(bb2.shape, lambda b: (0, 0)),
            pl.BlockSpec(fcw.shape, lambda b: (0, 0)),
            pl.BlockSpec(fcb.shape, lambda b: (0, 0)),
        ],
        out_specs=pl.BlockSpec((1, 8, NP), lambda b: (b, 0, 0)),
        scratch_shapes=[
            pltpu.VMEM((D + 2, H + 2, (W + 2) * Cin), jnp.bfloat16),  # padded x
            pltpu.VMEM((D + 2, H + 2, (W + 2) * C), jnp.bfloat16),    # padded h1/z1
            pltpu.VMEM((D * H, WC), jnp.float32),                     # residual
        ],
        compiler_params=pltpu.CompilerParams(
            dimension_semantics=("parallel",)),
        cost_estimate=pl.CostEstimate(flops=flops, transcendentals=0,
                                      bytes_accessed=bytes_accessed),
    )(x, w1, s1, b1, wb1, sb1, bb1, wb2, sb2, bb2, fcw, fcb)

    logits = out[:, 0, :num_classes]                       # [B, num_classes]
    return logits[None, ...]                               # unsqueeze(0)


# ------------------------------ pure-JAX reference ---------------------------


def _ref_forward(x_ncdhw, params, eps=1e-5):
    x = jnp.transpose(x_ncdhw, (0, 2, 3, 4, 1)).astype(jnp.float32)

    def conv(v, w):
        k = jnp.transpose(w, (2, 3, 4, 1, 0))  # DHWIO
        return jax.lax.conv_general_dilated(
            v, k, window_strides=(1, 1, 1), padding="SAME",
            dimension_numbers=("NDHWC", "DHWIO", "NDHWC"))

    def bn(v, p):
        g, b, m, var = p
        return (v - m) / jnp.sqrt(var + eps) * g + b

    h1 = jax.nn.relu(bn(conv(x, params["conv1"]), params["bn1"]))
    z1 = jax.nn.relu(bn(conv(h1, params["b_conv1"]), params["b_bn1"]))
    z2 = jax.nn.relu(bn(conv(z1, params["b_conv2"]), params["b_bn2"]) + h1)
    pooled = jnp.mean(z2, axis=(1, 2, 3))
    logits = pooled @ params["fc_w"].T + params["fc_b"]
    return logits[None, ...]


if __name__ == "__main__":
    key = jax.random.PRNGKey(0)
    pkey, xkey = jax.random.split(key)

    params = init_params(pkey, c_in=1, c=16, num_classes=1)
    # Small NCDHW input consistent with the module (n_input_channels=1);
    # W * C = 8 * 16 = 128 keeps the packed activations exactly lane-dense.
    x = jax.random.normal(xkey, (2, 1, 8, 8, 8), jnp.float32)

    fwd = jax.jit(resnet3d_forward)
    out = jax.block_until_ready(fwd(x, params))

    assert out.shape == (1, 2, 1), out.shape
    assert bool(jnp.all(jnp.isfinite(out)))

    # Loose-tolerance check against an f32 XLA reference (kernel uses bf16
    # storage / MXU inputs).
    ref = _ref_forward(x, params)
    err = float(jnp.max(jnp.abs(out - ref)))
    assert err < 5e-2, f"max |out - ref| = {err}"

    print("KERNEL_OK")
</pallas_src>

<mosaic_0001>
module attributes {stable_mosaic.version = 11 : i64} {
  func.func @_resnet3d_fused_kernel(%arg0: i32, %arg1: memref<1x8x8x8xbf16, #tpu.memory_space<vmem>>, %arg2: memref<9x10x128xbf16, #tpu.memory_space<vmem>>, %arg3: memref<1x128xf32, #tpu.memory_space<vmem>>, %arg4: memref<1x128xf32, #tpu.memory_space<vmem>>, %arg5: memref<9x160x128xbf16, #tpu.memory_space<vmem>>, %arg6: memref<1x128xf32, #tpu.memory_space<vmem>>, %arg7: memref<1x128xf32, #tpu.memory_space<vmem>>, %arg8: memref<9x160x128xbf16, #tpu.memory_space<vmem>>, %arg9: memref<1x128xf32, #tpu.memory_space<vmem>>, %arg10: memref<1x128xf32, #tpu.memory_space<vmem>>, %arg11: memref<128x128xf32, #tpu.memory_space<vmem>>, %arg12: memref<1x128xf32, #tpu.memory_space<vmem>>, %arg13: memref<1x8x128xf32, #tpu.memory_space<vmem>>, %arg14: memref<10x10x10xbf16, #tpu.memory_space<vmem>>, %arg15: memref<10x10x160xbf16, #tpu.memory_space<vmem>>, %arg16: memref<64x128xf32, #tpu.memory_space<vmem>>) attributes {dimension_semantics = [#tpu.dimension_semantics<parallel>], iteration_bounds = array<i64: 2>, scalar_prefetch = 0 : i64, scratch_operands = 3 : i64, tpu.core_type = #tpu.core_type<tc>, window_params = [{transform_indices = @transform_0, window_bounds = array<i64: 1, 8, 8, 8>}, {pipeline_mode = #tpu.pipeline_mode<synchronous>, transform_indices = @transform_1, window_bounds = array<i64: 9, 10, 128>}, {pipeline_mode = #tpu.pipeline_mode<synchronous>, transform_indices = @transform_2, window_bounds = array<i64: 1, 128>}, {pipeline_mode = #tpu.pipeline_mode<synchronous>, transform_indices = @transform_3, window_bounds = array<i64: 1, 128>}, {pipeline_mode = #tpu.pipeline_mode<synchronous>, transform_indices = @transform_4, window_bounds = array<i64: 9, 160, 128>}, {pipeline_mode = #tpu.pipeline_mode<synchronous>, transform_indices = @transform_5, window_bounds = array<i64: 1, 128>}, {pipeline_mode = #tpu.pipeline_mode<synchronous>, transform_indices = @transform_6, window_bounds = array<i64: 1, 128>}, {pipeline_mode = #tpu.pipeline_mode<synchronous>, transform_indices = @transform_7, window_bounds = array<i64: 9, 160, 128>}, {pipeline_mode = #tpu.pipeline_mode<synchronous>, transform_indices = @transform_8, window_bounds = array<i64: 1, 128>}, {pipeline_mode = #tpu.pipeline_mode<synchronous>, transform_indices = @transform_9, window_bounds = array<i64: 1, 128>}, {pipeline_mode = #tpu.pipeline_mode<synchronous>, transform_indices = @transform_10, window_bounds = array<i64: 128, 128>}, {pipeline_mode = #tpu.pipeline_mode<synchronous>, transform_indices = @transform_11, window_bounds = array<i64: 1, 128>}, {transform_indices = @transform_12, window_bounds = array<i64: 1, 8, 128>}]} {
    %cst = arith.constant 0.000000e+00 : bf16
    %0 = vector.broadcast %cst : bf16 to vector<10x10x10xbf16>
    %c0 = arith.constant 0 : index
    %c0_0 = arith.constant 0 : index
    %c0_1 = arith.constant 0 : index
    %1 = vector.load %arg14[%c0, %c0_0, %c0_1] : memref<10x10x10xbf16, #tpu.memory_space<vmem>>, vector<10x10x10xbf16>
    tpu.vector_store %arg14[%c0, %c0_0, %c0_1], %0 {strides = array<i32>} : memref<10x10x10xbf16, #tpu.memory_space<vmem>>, vector<10x10x10xbf16>,
    %cst_2 = arith.constant 0.000000e+00 : bf16
    %2 = vector.broadcast %cst_2 : bf16 to vector<10x10x160xbf16>
    %c0_3 = arith.constant 0 : index
    %c0_4 = arith.constant 0 : index
    %c0_5 = arith.constant 0 : index
    %3 = vector.load %arg15[%c0_3, %c0_4, %c0_5] : memref<10x10x160xbf16, #tpu.memory_space<vmem>>, vector<10x10x160xbf16>
    tpu.vector_store %arg15[%c0_3, %c0_4, %c0_5], %2 {strides = array<i32>} : memref<10x10x160xbf16, #tpu.memory_space<vmem>>, vector<10x10x160xbf16>,
    %c0_6 = arith.constant 0 : index
    %c0_7 = arith.constant 0 : index
    %c0_8 = arith.constant 0 : index
    %c0_9 = arith.constant 0 : index
    %4 = vector.load %arg1[%c0_6, %c0_7, %c0_8, %c0_9] : memref<1x8x8x8xbf16, #tpu.memory_space<vmem>>, vector<1x8x8x8xbf16>
    %5 = vector.shape_cast %4 : vector<1x8x8x8xbf16> to vector<8x8x8xbf16>
    %c1 = arith.constant 1 : index
    %c1_10 = arith.constant 1 : index
    %c0_11 = arith.constant 0 : index
    %6 = vector.load %arg14[%c1, %c1_10, %c0_11] : memref<10x10x10xbf16, #tpu.memory_space<vmem>>, vector<8x8x8xbf16>
    tpu.vector_store %arg14[%c1, %c1_10, %c0_11], %5 {strides = array<i32>} : memref<10x10x10xbf16, #tpu.memory_space<vmem>>, vector<8x8x8xbf16>,
    %cst_12 = arith.constant 0.000000e+00 : f32
    %7 = vector.broadcast %cst_12 : f32 to vector<64x128xf32>
    %c0_13 = arith.constant 0 : index
    %c0_14 = arith.constant 0 : index
    %c0_15 = arith.constant 0 : index
    %8 = vector.load %arg14[%c0_13, %c0_14, %c0_15] : memref<10x10x10xbf16, #tpu.memory_space<vmem>>, vector<8x8x10xbf16>
    %9 = vector.shape_cast %8 : vector<8x8x10xbf16> to vector<64x10xbf16>
    %c0_16 = arith.constant 0 : index
    %c0_17 = arith.constant 0 : index
    %c0_18 = arith.constant 0 : index
    %10 = vector.load %arg2[%c0_16, %c0_17, %c0_18] : memref<9x10x128xbf16, #tpu.memory_space<vmem>>, vector<1x10x128xbf16>
    %11 = vector.shape_cast %10 : vector<1x10x128xbf16> to vector<10x128xbf16>
    %cst_19 = arith.constant dense<0.000000e+00> : vector<64x128xf32>
    %12 = tpu.matmul %9, %11, %cst_19 {dimension_numbers = #tpu.dot_dimension_numbers<[1], [0], [0], [1], [0, 0, 1, 1], [], []>} : vector<64x10xbf16>, vector<10x128xbf16>, vector<64x128xf32> -> vector<64x128xf32>
    %13 = arith.addf %7, %12 : vector<64x128xf32>
    %c0_20 = arith.constant 0 : index
    %c1_21 = arith.constant 1 : index
    %c0_22 = arith.constant 0 : index
    %14 = vector.load %arg14[%c0_20, %c1_21, %c0_22] : memref<10x10x10xbf16, #tpu.memory_space<vmem>>, vector<8x8x10xbf16>
    %15 = vector.shape_cast %14 : vector<8x8x10xbf16> to vector<64x10xbf16>
    %c1_23 = arith.constant 1 : index
    %c0_24 = arith.constant 0 : index
    %c0_25 = arith.constant 0 : index
    %16 = vector.load %arg2[%c1_23, %c0_24, %c0_25] : memref<9x10x128xbf16, #tpu.memory_space<vmem>>, vector<1x10x128xbf16>
    %17 = vector.shape_cast %16 : vector<1x10x128xbf16> to vector<10x128xbf16>
    %cst_26 = arith.constant dense<0.000000e+00> : vector<64x128xf32>
    %18 = tpu.matmul %15, %17, %cst_26 {dimension_numbers = #tpu.dot_dimension_numbers<[1], [0], [0], [1], [0, 0, 1, 1], [], []>} : vector<64x10xbf16>, vector<10x128xbf16>, vector<64x128xf32> -> vector<64x128xf32>
    %19 = arith.addf %13, %18 : vector<64x128xf32>
    %c0_27 = arith.constant 0 : index
    %c2 = arith.constant 2 : index
    %c0_28 = arith.constant 0 : index
    %20 = vector.load %arg14[%c0_27, %c2, %c0_28] : memref<10x10x10xbf16, #tpu.memory_space<vmem>>, vector<8x8x10xbf16>
    %21 = vector.shape_cast %20 : vector<8x8x10xbf16> to vector<64x10xbf16>
    %c2_29 = arith.constant 2 : index
    %c0_30 = arith.constant 0 : index
    %c0_31 = arith.constant 0 : index
    %22 = vector.load %arg2[%c2_29, %c0_30, %c0_31] : memref<9x10x128xbf16, #tpu.memory_space<vmem>>, vector<1x10x128xbf16>
    %23 = vector.shape_cast %22 : vector<1x10x128xbf16> to vector<10x128xbf16>
    %cst_32 = arith.constant dense<0.000000e+00> : vector<64x128xf32>
    %24 = tpu.matmul %21, %23, %cst_32 {dimension_numbers = #tpu.dot_dimension_numbers<[1], [0], [0], [1], [0, 0, 1, 1], [], []>} : vector<64x10xbf16>, vector<10x128xbf16>, vector<64x128xf32> -> vector<64x128xf32>
    %25 = arith.addf %19, %24 : vector<64x128xf32>
    %c1_33 = arith.constant 1 : index
    %c0_34 = arith.constant 0 : index
    %c0_35 = arith.constant 0 : index
    %26 = vector.load %arg14[%c1_33, %c0_34, %c0_35] : memref<10x10x10xbf16, #tpu.memory_space<vmem>>, vector<8x8x10xbf16>
    %27 = vector.shape_cast %26 : vector<8x8x10xbf16> to vector<64x10xbf16>
    %c3 = arith.constant 3 : index
    %c0_36 = arith.constant 0 : index
    %c0_37 = arith.constant 0 : index
    %28 = vector.load %arg2[%c3, %c0_36, %c0_37] : memref<9x10x128xbf16, #tpu.memory_space<vmem>>, vector<1x10x128xbf16>
    %29 = vector.shape_cast %28 : vector<1x10x128xbf16> to vector<10x128xbf16>
    %cst_38 = arith.constant dense<0.000000e+00> : vector<64x128xf32>
    %30 = tpu.matmul %27, %29, %cst_38 {dimension_numbers = #tpu.dot_dimension_numbers<[1], [0], [0], [1], [0, 0, 1, 1], [], []>} : vector<64x10xbf16>, vector<10x128xbf16>, vector<64x128xf32> -> vector<64x128xf32>
    %31 = arith.addf %25, %30 : vector<64x128xf32>
    %c1_39 = arith.constant 1 : index
    %c1_40 = arith.constant 1 : index
    %c0_41 = arith.constant 0 : index
    %32 = vector.load %arg14[%c1_39, %c1_40, %c0_41] : memref<10x10x10xbf16, #tpu.memory_space<vmem>>, vector<8x8x10xbf16>
    %33 = vector.shape_cast %32 : vector<8x8x10xbf16> to vector<64x10xbf16>
    %c4 = arith.constant 4 : index
    %c0_42 = arith.constant 0 : index
    %c0_43 = arith.constant 0 : index
    %34 = vector.load %arg2[%c4, %c0_42, %c0_43] : memref<9x10x128xbf16, #tpu.memory_space<vmem>>, vector<1x10x128xbf16>
    %35 = vector.shape_cast %34 : vector<1x10x128xbf16> to vector<10x128xbf16>
    %cst_44 = arith.constant dense<0.000000e+00> : vector<64x128xf32>
    %36 = tpu.matmul %33, %35, %cst_44 {dimension_numbers = #tpu.dot_dimension_numbers<[1], [0], [0], [1], [0, 0, 1, 1], [], []>} : vector<64x10xbf16>, vector<10x128xbf16>, vector<64x128xf32> -> vector<64x128xf32>
    %37 = arith.addf %31, %36 : vector<64x128xf32>
    %c1_45 = arith.constant 1 : index
    %c2_46 = arith.constant 2 : index
    %c0_47 = arith.constant 0 : index
    %38 = vector.load %arg14[%c1_45, %c2_46, %c0_47] : memref<10x10x10xbf16, #tpu.memory_space<vmem>>, vector<8x8x10xbf16>
    %39 = vector.shape_cast %38 : vector<8x8x10xbf16> to vector<64x10xbf16>
    %c5 = arith.constant 5 : index
    %c0_48 = arith.constant 0 : index
    %c0_49 = arith.constant 0 : index
    %40 = vector.load %arg2[%c5, %c0_48, %c0_49] : memref<9x10x128xbf16, #tpu.memory_space<vmem>>, vector<1x10x128xbf16>
    %41 = vector.shape_cast %40 : vector<1x10x128xbf16> to vector<10x128xbf16>
    %cst_50 = arith.constant dense<0.000000e+00> : vector<64x128xf32>
    %42 = tpu.matmul %39, %41, %cst_50 {dimension_numbers = #tpu.dot_dimension_numbers<[1], [0], [0], [1], [0, 0, 1, 1], [], []>} : vector<64x10xbf16>, vector<10x128xbf16>, vector<64x128xf32> -> vector<64x128xf32>
    %43 = arith.addf %37, %42 : vector<64x128xf32>
    %c2_51 = arith.constant 2 : index
    %c0_52 = arith.constant 0 : index
    %c0_53 = arith.constant 0 : index
    %44 = vector.load %arg14[%c2_51, %c0_52, %c0_53] : memref<10x10x10xbf16, #tpu.memory_space<vmem>>, vector<8x8x10xbf16>
    %45 = vector.shape_cast %44 : vector<8x8x10xbf16> to vector<64x10xbf16>
    %c6 = arith.constant 6 : index
    %c0_54 = arith.constant 0 : index
    %c0_55 = arith.constant 0 : index
    %46 = vector.load %arg2[%c6, %c0_54, %c0_55] : memref<9x10x128xbf16, #tpu.memory_space<vmem>>, vector<1x10x128xbf16>
    %47 = vector.shape_cast %46 : vector<1x10x128xbf16> to vector<10x128xbf16>
    %cst_56 = arith.constant dense<0.000000e+00> : vector<64x128xf32>
    %48 = tpu.matmul %45, %47, %cst_56 {dimension_numbers = #tpu.dot_dimension_numbers<[1], [0], [0], [1], [0, 0, 1, 1], [], []>} : vector<64x10xbf16>, vector<10x128xbf16>, vector<64x128xf32> -> vector<64x128xf32>
    %49 = arith.addf %43, %48 : vector<64x128xf32>
    %c2_57 = arith.constant 2 : index
    %c1_58 = arith.constant 1 : index
    %c0_59 = arith.constant 0 : index
    %50 = vector.load %arg14[%c2_57, %c1_58, %c0_59] : memref<10x10x10xbf16, #tpu.memory_space<vmem>>, vector<8x8x10xbf16>
    %51 = vector.shape_cast %50 : vector<8x8x10xbf16> to vector<64x10xbf16>
    %c7 = arith.constant 7 : index
    %c0_60 = arith.constant 0 : index
    %c0_61 = arith.constant 0 : index
    %52 = vector.load %arg2[%c7, %c0_60, %c0_61] : memref<9x10x128xbf16, #tpu.memory_space<vmem>>, vector<1x10x128xbf16>
    %53 = vector.shape_cast %52 : vector<1x10x128xbf16> to vector<10x128xbf16>
    %cst_62 = arith.constant dense<0.000000e+00> : vector<64x128xf32>
    %54 = tpu.matmul %51, %53, %cst_62 {dimension_numbers = #tpu.dot_dimension_numbers<[1], [0], [0], [1], [0, 0, 1, 1], [], []>} : vector<64x10xbf16>, vector<10x128xbf16>, vector<64x128xf32> -> vector<64x128xf32>
    %55 = arith.addf %49, %54 : vector<64x128xf32>
    %c2_63 = arith.constant 2 : index
    %c2_64 = arith.constant 2 : index
    %c0_65 = arith.constant 0 : index
    %56 = vector.load %arg14[%c2_63, %c2_64, %c0_65] : memref<10x10x10xbf16, #tpu.memory_space<vmem>>, vector<8x8x10xbf16>
    %57 = vector.shape_cast %56 : vector<8x8x10xbf16> to vector<64x10xbf16>
    %c8 = arith.constant 8 : index
    %c0_66 = arith.constant 0 : index
    %c0_67 = arith.constant 0 : index
    %58 = vector.load %arg2[%c8, %c0_66, %c0_67] : memref<9x10x128xbf16, #tpu.memory_space<vmem>>, vector<1x10x128xbf16>
    %59 = vector.shape_cast %58 : vector<1x10x128xbf16> to vector<10x128xbf16>
    %cst_68 = arith.constant dense<0.000000e+00> : vector<64x128xf32>
    %60 = tpu.matmul %57, %59, %cst_68 {dimension_numbers = #tpu.dot_dimension_numbers<[1], [0], [0], [1], [0, 0, 1, 1], [], []>} : vector<64x10xbf16>, vector<10x128xbf16>, vector<64x128xf32> -> vector<64x128xf32>
    %61 = arith.addf %55, %60 : vector<64x128xf32>
    %c0_69 = arith.constant 0 : index
    %c0_70 = arith.constant 0 : index
    %62 = vector.load %arg3[%c0_69, %c0_70] : memref<1x128xf32, #tpu.memory_space<vmem>>, vector<1x128xf32>
    %63 = vector.broadcast %62 : vector<1x128xf32> to vector<64x128xf32>
    %64 = arith.mulf %61, %63 : vector<64x128xf32>
    %c0_71 = arith.constant 0 : index
    %c0_72 = arith.constant 0 : index
    %65 = vector.load %arg4[%c0_71, %c0_72] : memref<1x128xf32, #tpu.memory_space<vmem>>, vector<1x128xf32>
    %66 = vector.broadcast %65 : vector<1x128xf32> to vector<64x128xf32>
    %67 = arith.addf %64, %66 : vector<64x128xf32>
    %cst_73 = arith.constant 0.000000e+00 : f32
    %68 = vector.broadcast %cst_73 : f32 to vector<64x128xf32>
    %69 = arith.maximumf %67, %68 : vector<64x128xf32>
    %c0_74 = arith.constant 0 : index
    %c0_75 = arith.constant 0 : index
    %70 = vector.load %arg16[%c0_74, %c0_75] : memref<64x128xf32, #tpu.memory_space<vmem>>, vector<64x128xf32>
    tpu.vector_store %arg16[%c0_74, %c0_75], %69 {strides = array<i32>} : memref<64x128xf32, #tpu.memory_space<vmem>>, vector<64x128xf32>,
    %71 = vector.shape_cast %69 : vector<64x128xf32> to vector<8x8x128xf32>
    %72 = arith.truncf %71 : vector<8x8x128xf32> to vector<8x8x128xbf16>
    %c1_76 = arith.constant 1 : index
    %c1_77 = arith.constant 1 : index
    %c0_78 = arith.constant 0 : index
    %73 = vector.load %arg15[%c1_76, %c1_77, %c0_78] : memref<10x10x160xbf16, #tpu.memory_space<vmem>>, vector<8x8x128xbf16>
    tpu.vector_store %arg15[%c1_76, %c1_77, %c0_78], %72 {strides = array<i32>} : memref<10x10x160xbf16, #tpu.memory_space<vmem>>, vector<8x8x128xbf16>,
    %cst_79 = arith.constant 0.000000e+00 : f32
    %74 = vector.broadcast %cst_79 : f32 to vector<64x128xf32>
    %c0_80 = arith.constant 0 : index
    %c0_81 = arith.constant 0 : index
    %c0_82 = arith.constant 0 : index
    %75 = vector.load %arg15[%c0_80, %c0_81, %c0_82] : memref<10x10x160xbf16, #tpu.memory_space<vmem>>, vector<8x8x160xbf16>
    %76 = vector.shape_cast %75 : vector<8x8x160xbf16> to vector<64x160xbf16>
    %c0_83 = arith.constant 0 : index
    %c0_84 = arith.constant 0 : index
    %c0_85 = arith.constant 0 : index
    %77 = vector.load %arg5[%c0_83, %c0_84, %c0_85] : memref<9x160x128xbf16, #tpu.memory_space<vmem>>, vector<1x160x128xbf16>
    %78 = vector.shape_cast %77 : vector<1x160x128xbf16> to vector<160x128xbf16>
    %cst_86 = arith.constant dense<0.000000e+00> : vector<64x128xf32>
    %79 = tpu.matmul %76, %78, %cst_86 {dimension_numbers = #tpu.dot_dimension_numbers<[1], [0], [0], [1], [0, 0, 1, 1], [], []>} : vector<64x160xbf16>, vector<160x128xbf16>, vector<64x128xf32> -> vector<64x128xf32>
    %80 = arith.addf %74, %79 : vector<64x128xf32>
    %c0_87 = arith.constant 0 : index
    %c1_88 = arith.constant 1 : index
    %c0_89 = arith.constant 0 : index
    %81 = vector.load %arg15[%c0_87, %c1_88, %c0_89] : memref<10x10x160xbf16, #tpu.memory_space<vmem>>, vector<8x8x160xbf16>
    %82 = vector.shape_cast %81 : vector<8x8x160xbf16> to vector<64x160xbf16>
    %c1_90 = arith.constant 1 : index
    %c0_91 = arith.constant 0 : index
    %c0_92 = arith.constant 0 : index
    %83 = vector.load %arg5[%c1_90, %c0_91, %c0_92] : memref<9x160x128xbf16, #tpu.memory_space<vmem>>, vector<1x160x128xbf16>
    %84 = vector.shape_cast %83 : vector<1x160x128xbf16> to vector<160x128xbf16>
    %cst_93 = arith.constant dense<0.000000e+00> : vector<64x128xf32>
    %85 = tpu.matmul %82, %84, %cst_93 {dimension_numbers = #tpu.dot_dimension_numbers<[1], [0], [0], [1], [0, 0, 1, 1], [], []>} : vector<64x160xbf16>, vector<160x128xbf16>, vector<64x128xf32> -> vector<64x128xf32>
    %86 = arith.addf %80, %85 : vector<64x128xf32>
    %c0_94 = arith.constant 0 : index
    %c2_95 = arith.constant 2 : index
    %c0_96 = arith.constant 0 : index
    %87 = vector.load %arg15[%c0_94, %c2_95, %c0_96] : memref<10x10x160xbf16, #tpu.memory_space<vmem>>, vector<8x8x160xbf16>
    %88 = vector.shape_cast %87 : vector<8x8x160xbf16> to vector<64x160xbf16>
    %c2_97 = arith.constant 2 : index
    %c0_98 = arith.constant 0 : index
    %c0_99 = arith.constant 0 : index
    %89 = vector.load %arg5[%c2_97, %c0_98, %c0_99] : memref<9x160x128xbf16, #tpu.memory_space<vmem>>, vector<1x160x128xbf16>
    %90 = vector.shape_cast %89 : vector<1x160x128xbf16> to vector<160x128xbf16>
    %cst_100 = arith.constant dense<0.000000e+00> : vector<64x128xf32>
    %91 = tpu.matmul %88, %90, %cst_100 {dimension_numbers = #tpu.dot_dimension_numbers<[1], [0], [0], [1], [0, 0, 1, 1], [], []>} : vector<64x160xbf16>, vector<160x128xbf16>, vector<64x128xf32> -> vector<64x128xf32>
    %92 = arith.addf %86, %91 : vector<64x128xf32>
    %c1_101 = arith.constant 1 : index
    %c0_102 = arith.constant 0 : index
    %c0_103 = arith.constant 0 : index
    %93 = vector.load %arg15[%c1_101, %c0_102, %c0_103] : memref<10x10x160xbf16, #tpu.memory_space<vmem>>, vector<8x8x160xbf16>
    %94 = vector.shape_cast %93 : vector<8x8x160xbf16> to vector<64x160xbf16>
    %c3_104 = arith.constant 3 : index
    %c0_105 = arith.constant 0 : index
    %c0_106 = arith.constant 0 : index
    %95 = vector.load %arg5[%c3_104, %c0_105, %c0_106] : memref<9x160x128xbf16, #tpu.memory_space<vmem>>, vector<1x160x128xbf16>
    %96 = vector.shape_cast %95 : vector<1x160x128xbf16> to vector<160x128xbf16>
    %cst_107 = arith.constant dense<0.000000e+00> : vector<64x128xf32>
    %97 = tpu.matmul %94, %96, %cst_107 {dimension_numbers = #tpu.dot_dimension_numbers<[1], [0], [0], [1], [0, 0, 1, 1], [], []>} : vector<64x160xbf16>, vector<160x128xbf16>, vector<64x128xf32> -> vector<64x128xf32>
    %98 = arith.addf %92, %97 : vector<64x128xf32>
    %c1_108 = arith.constant 1 : index
    %c1_109 = arith.constant 1 : index
    %c0_110 = arith.constant 0 : index
    %99 = vector.load %arg15[%c1_108, %c1_109, %c0_110] : memref<10x10x160xbf16, #tpu.memory_space<vmem>>, vector<8x8x160xbf16>
    %100 = vector.shape_cast %99 : vector<8x8x160xbf16> to vector<64x160xbf16>
    %c4_111 = arith.constant 4 : index
    %c0_112 = arith.constant 0 : index
    %c0_113 = arith.constant 0 : index
    %101 = vector.load %arg5[%c4_111, %c0_112, %c0_113] : memref<9x160x128xbf16, #tpu.memory_space<vmem>>, vector<1x160x128xbf16>
    %102 = vector.shape_cast %101 : vector<1x160x128xbf16> to vector<160x128xbf16>
    %cst_114 = arith.constant dense<0.000000e+00> : vector<64x128xf32>
    %103 = tpu.matmul %100, %102, %cst_114 {dimension_numbers = #tpu.dot_dimension_numbers<[1], [0], [0], [1], [0, 0, 1, 1], [], []>} : vector<64x160xbf16>, vector<160x128xbf16>, vector<64x128xf32> -> vector<64x128xf32>
    %104 = arith.addf %98, %103 : vector<64x128xf32>
    %c1_115 = arith.constant 1 : index
    %c2_116 = arith.constant 2 : index
    %c0_117 = arith.constant 0 : index
    %105 = vector.load %arg15[%c1_115, %c2_116, %c0_117] : memref<10x10x160xbf16, #tpu.memory_space<vmem>>, vector<8x8x160xbf16>
    %106 = vector.shape_cast %105 : vector<8x8x160xbf16> to vector<64x160xbf16>
    %c5_118 = arith.constant 5 : index
    %c0_119 = arith.constant 0 : index
    %c0_120 = arith.constant 0 : index
    %107 = vector.load %arg5[%c5_118, %c0_119, %c0_120] : memref<9x160x128xbf16, #tpu.memory_space<vmem>>, vector<1x160x128xbf16>
    %108 = vector.shape_cast %107 : vector<1x160x128xbf16> to vector<160x128xbf16>
    %cst_121 = arith.constant dense<0.000000e+00> : vector<64x128xf32>
    %109 = tpu.matmul %106, %108, %cst_121 {dimension_numbers = #tpu.dot_dimension_numbers<[1], [0], [0], [1], [0, 0, 1, 1], [], []>} : vector<64x160xbf16>, vector<160x128xbf16>, vector<64x128xf32> -> vector<64x128xf32>
    %110 = arith.addf %104, %109 : vector<64x128xf32>
    %c2_122 = arith.constant 2 : index
    %c0_123 = arith.constant 0 : index
    %c0_124 = arith.constant 0 : index
    %111 = vector.load %arg15[%c2_122, %c0_123, %c0_124] : memref<10x10x160xbf16, #tpu.memory_space<vmem>>, vector<8x8x160xbf16>
    %112 = vector.shape_cast %111 : vector<8x8x160xbf16> to vector<64x160xbf16>
    %c6_125 = arith.constant 6 : index
    %c0_126 = arith.constant 0 : index
    %c0_127 = arith.constant 0 : index
    %113 = vector.load %arg5[%c6_125, %c0_126, %c0_127] : memref<9x160x128xbf16, #tpu.memory_space<vmem>>, vector<1x160x128xbf16>
    %114 = vector.shape_cast %113 : vector<1x160x128xbf16> to vector<160x128xbf16>
    %cst_128 = arith.constant dense<0.000000e+00> : vector<64x128xf32>
    %115 = tpu.matmul %112, %114, %cst_128 {dimension_numbers = #tpu.dot_dimension_numbers<[1], [0], [0], [1], [0, 0, 1, 1], [], []>} : vector<64x160xbf16>, vector<160x128xbf16>, vector<64x128xf32> -> vector<64x128xf32>
    %116 = arith.addf %110, %115 : vector<64x128xf32>
    %c2_129 = arith.constant 2 : index
    %c1_130 = arith.constant 1 : index
    %c0_131 = arith.constant 0 : index
    %117 = vector.load %arg15[%c2_129, %c1_130, %c0_131] : memref<10x10x160xbf16, #tpu.memory_space<vmem>>, vector<8x8x160xbf16>
    %118 = vector.shape_cast %117 : vector<8x8x160xbf16> to vector<64x160xbf16>
    %c7_132 = arith.constant 7 : index
    %c0_133 = arith.constant 0 : index
    %c0_134 = arith.constant 0 : index
    %119 = vector.load %arg5[%c7_132, %c0_133, %c0_134] : memref<9x160x128xbf16, #tpu.memory_space<vmem>>, vector<1x160x128xbf16>
    %120 = vector.shape_cast %119 : vector<1x160x128xbf16> to vector<160x128xbf16>
    %cst_135 = arith.constant dense<0.000000e+00> : vector<64x128xf32>
    %121 = tpu.matmul %118, %120, %cst_135 {dimension_numbers = #tpu.dot_dimension_numbers<[1], [0], [0], [1], [0, 0, 1, 1], [], []>} : vector<64x160xbf16>, vector<160x128xbf16>, vector<64x128xf32> -> vector<64x128xf32>
    %122 = arith.addf %116, %121 : vector<64x128xf32>
    %c2_136 = arith.constant 2 : index
    %c2_137 = arith.constant 2 : index
    %c0_138 = arith.constant 0 : index
    %123 = vector.load %arg15[%c2_136, %c2_137, %c0_138] : memref<10x10x160xbf16, #tpu.memory_space<vmem>>, vector<8x8x160xbf16>
    %124 = vector.shape_cast %123 : vector<8x8x160xbf16> to vector<64x160xbf16>
    %c8_139 = arith.constant 8 : index
    %c0_140 = arith.constant 0 : index
    %c0_141 = arith.constant 0 : index
    %125 = vector.load %arg5[%c8_139, %c0_140, %c0_141] : memref<9x160x128xbf16, #tpu.memory_space<vmem>>, vector<1x160x128xbf16>
    %126 = vector.shape_cast %125 : vector<1x160x128xbf16> to vector<160x128xbf16>
    %cst_142 = arith.constant dense<0.000000e+00> : vector<64x128xf32>
    %127 = tpu.matmul %124, %126, %cst_142 {dimension_numbers = #tpu.dot_dimension_numbers<[1], [0], [0], [1], [0, 0, 1, 1], [], []>} : vector<64x160xbf16>, vector<160x128xbf16>, vector<64x128xf32> -> vector<64x128xf32>
    %128 = arith.addf %122, %127 : vector<64x128xf32>
    %c0_143 = arith.constant 0 : index
    %c0_144 = arith.constant 0 : index
    %129 = vector.load %arg6[%c0_143, %c0_144] : memref<1x128xf32, #tpu.memory_space<vmem>>, vector<1x128xf32>
    %130 = vector.broadcast %129 : vector<1x128xf32> to vector<64x128xf32>
    %131 = arith.mulf %128, %130 : vector<64x128xf32>
    %c0_145 = arith.constant 0 : index
    %c0_146 = arith.constant 0 : index
    %132 = vector.load %arg7[%c0_145, %c0_146] : memref<1x128xf32, #tpu.memory_space<vmem>>, vector<1x128xf32>
    %133 = vector.broadcast %132 : vector<1x128xf32> to vector<64x128xf32>
    %134 = arith.addf %131, %133 : vector<64x128xf32>
    %cst_147 = arith.constant 0.000000e+00 : f32
    %135 = vector.broadcast %cst_147 : f32 to vector<64x128xf32>
    %136 = arith.maximumf %134, %135 : vector<64x128xf32>
    %137 = vector.shape_cast %136 : vector<64x128xf32> to vector<8x8x128xf32>
    %138 = arith.truncf %137 : vector<8x8x128xf32> to vector<8x8x128xbf16>
    %c1_148 = arith.constant 1 : index
    %c1_149 = arith.constant 1 : index
    %c0_150 = arith.constant 0 : index
    %139 = vector.load %arg15[%c1_148, %c1_149, %c0_150] : memref<10x10x160xbf16, #tpu.memory_space<vmem>>, vector<8x8x128xbf16>
    tpu.vector_store %arg15[%c1_148, %c1_149, %c0_150], %138 {strides = array<i32>} : memref<10x10x160xbf16, #tpu.memory_space<vmem>>, vector<8x8x128xbf16>,
    %cst_151 = arith.constant 0.000000e+00 : f32
    %140 = vector.broadcast %cst_151 : f32 to vector<64x128xf32>
    %c0_152 = arith.constant 0 : index
    %c0_153 = arith.constant 0 : index
    %c0_154 = arith.constant 0 : index
    %141 = vector.load %arg15[%c0_152, %c0_153, %c0_154] : memref<10x10x160xbf16, #tpu.memory_space<vmem>>, vector<8x8x160xbf16>
    %142 = vector.shape_cast %141 : vector<8x8x160xbf16> to vector<64x160xbf16>
    %c0_155 = arith.constant 0 : index
    %c0_156 = arith.constant 0 : index
    %c0_157 = arith.constant 0 : index
    %143 = vector.load %arg8[%c0_155, %c0_156, %c0_157] : memref<9x160x128xbf16, #tpu.memory_space<vmem>>, vector<1x160x128xbf16>
    %144 = vector.shape_cast %143 : vector<1x160x128xbf16> to vector<160x128xbf16>
    %cst_158 = arith.constant dense<0.000000e+00> : vector<64x128xf32>
    %145 = tpu.matmul %142, %144, %cst_158 {dimension_numbers = #tpu.dot_dimension_numbers<[1], [0], [0], [1], [0, 0, 1, 1], [], []>} : vector<64x160xbf16>, vector<160x128xbf16>, vector<64x128xf32> -> vector<64x128xf32>
    %146 = arith.addf %140, %145 : vector<64x128xf32>
    %c0_159 = arith.constant 0 : index
    %c1_160 = arith.constant 1 : index
    %c0_161 = arith.constant 0 : index
    %147 = vector.load %arg15[%c0_159, %c1_160, %c0_161] : memref<10x10x160xbf16, #tpu.memory_space<vmem>>, vector<8x8x160xbf16>
    %148 = vector.shape_cast %147 : vector<8x8x160xbf16> to vector<64x160xbf16>
    %c1_162 = arith.constant 1 : index
    %c0_163 = arith.constant 0 : index
    %c0_164 = arith.constant 0 : index
    %149 = vector.load %arg8[%c1_162, %c0_163, %c0_164] : memref<9x160x128xbf16, #tpu.memory_space<vmem>>, vector<1x160x128xbf16>
    %150 = vector.shape_cast %149 : vector<1x160x128xbf16> to vector<160x128xbf16>
    %cst_165 = arith.constant dense<0.000000e+00> : vector<64x128xf32>
    %151 = tpu.matmul %148, %150, %cst_165 {dimension_numbers = #tpu.dot_dimension_numbers<[1], [0], [0], [1], [0, 0, 1, 1], [], []>} : vector<64x160xbf16>, vector<160x128xbf16>, vector<64x128xf32> -> vector<64x128xf32>
    %152 = arith.addf %146, %151 : vector<64x128xf32>
    %c0_166 = arith.constant 0 : index
    %c2_167 = arith.constant 2 : index
    %c0_168 = arith.constant 0 : index
    %153 = vector.load %arg15[%c0_166, %c2_167, %c0_168] : memref<10x10x160xbf16, #tpu.memory_space<vmem>>, vector<8x8x160xbf16>
    %154 = vector.shape_cast %153 : vector<8x8x160xbf16> to vector<64x160xbf16>
    %c2_169 = arith.constant 2 : index
    %c0_170 = arith.constant 0 : index
    %c0_171 = arith.constant 0 : index
    %155 = vector.load %arg8[%c2_169, %c0_170, %c0_171] : memref<9x160x128xbf16, #tpu.memory_space<vmem>>, vector<1x160x128xbf16>
    %156 = vector.shape_cast %155 : vector<1x160x128xbf16> to vector<160x128xbf16>
    %cst_172 = arith.constant dense<0.000000e+00> : vector<64x128xf32>
    %157 = tpu.matmul %154, %156, %cst_172 {dimension_numbers = #tpu.dot_dimension_numbers<[1], [0], [0], [1], [0, 0, 1, 1], [], []>} : vector<64x160xbf16>, vector<160x128xbf16>, vector<64x128xf32> -> vector<64x128xf32>
    %158 = arith.addf %152, %157 : vector<64x128xf32>
    %c1_173 = arith.constant 1 : index
    %c0_174 = arith.constant 0 : index
    %c0_175 = arith.constant 0 : index
    %159 = vector.load %arg15[%c1_173, %c0_174, %c0_175] : memref<10x10x160xbf16, #tpu.memory_space<vmem>>, vector<8x8x160xbf16>
    %160 = vector.shape_cast %159 : vector<8x8x160xbf16> to vector<64x160xbf16>
    %c3_176 = arith.constant 3 : index
    %c0_177 = arith.constant 0 : index
    %c0_178 = arith.constant 0 : index
    %161 = vector.load %arg8[%c3_176, %c0_177, %c0_178] : memref<9x160x128xbf16, #tpu.memory_space<vmem>>, vector<1x160x128xbf16>
    %162 = vector.shape_cast %161 : vector<1x160x128xbf16> to vector<160x128xbf16>
    %cst_179 = arith.constant dense<0.000000e+00> : vector<64x128xf32>
    %163 = tpu.matmul %160, %162, %cst_179 {dimension_numbers = #tpu.dot_dimension_numbers<[1], [0], [0], [1], [0, 0, 1, 1], [], []>} : vector<64x160xbf16>, vector<160x128xbf16>, vector<64x128xf32> -> vector<64x128xf32>
    %164 = arith.addf %158, %163 : vector<64x128xf32>
    %c1_180 = arith.constant 1 : index
    %c1_181 = arith.constant 1 : index
    %c0_182 = arith.constant 0 : index
    %165 = vector.load %arg15[%c1_180, %c1_181, %c0_182] : memref<10x10x160xbf16, #tpu.memory_space<vmem>>, vector<8x8x160xbf16>
    %166 = vector.shape_cast %165 : vector<8x8x160xbf16> to vector<64x160xbf16>
    %c4_183 = arith.constant 4 : index
    %c0_184 = arith.constant 0 : index
    %c0_185 = arith.constant 0 : index
    %167 = vector.load %arg8[%c4_183, %c0_184, %c0_185] : memref<9x160x128xbf16, #tpu.memory_space<vmem>>, vector<1x160x128xbf16>
    %168 = vector.shape_cast %167 : vector<1x160x128xbf16> to vector<160x128xbf16>
    %cst_186 = arith.constant dense<0.000000e+00> : vector<64x128xf32>
    %169 = tpu.matmul %166, %168, %cst_186 {dimension_numbers = #tpu.dot_dimension_numbers<[1], [0], [0], [1], [0, 0, 1, 1], [], []>} : vector<64x160xbf16>, vector<160x128xbf16>, vector<64x128xf32> -> vector<64x128xf32>
    %170 = arith.addf %164, %169 : vector<64x128xf32>
    %c1_187 = arith.constant 1 : index
    %c2_188 = arith.constant 2 : index
    %c0_189 = arith.constant 0 : index
    %171 = vector.load %arg15[%c1_187, %c2_188, %c0_189] : memref<10x10x160xbf16, #tpu.memory_space<vmem>>, vector<8x8x160xbf16>
    %172 = vector.shape_cast %171 : vector<8x8x160xbf16> to vector<64x160xbf16>
    %c5_190 = arith.constant 5 : index
    %c0_191 = arith.constant 0 : index
    %c0_192 = arith.constant 0 : index
    %173 = vector.load %arg8[%c5_190, %c0_191, %c0_192] : memref<9x160x128xbf16, #tpu.memory_space<vmem>>, vector<1x160x128xbf16>
    %174 = vector.shape_cast %173 : vector<1x160x128xbf16> to vector<160x128xbf16>
    %cst_193 = arith.constant dense<0.000000e+00> : vector<64x128xf32>
    %175 = tpu.matmul %172, %174, %cst_193 {dimension_numbers = #tpu.dot_dimension_numbers<[1], [0], [0], [1], [0, 0, 1, 1], [], []>} : vector<64x160xbf16>, vector<160x128xbf16>, vector<64x128xf32> -> vector<64x128xf32>
    %176 = arith.addf %170, %175 : vector<64x128xf32>
    %c2_194 = arith.constant 2 : index
    %c0_195 = arith.constant 0 : index
    %c0_196 = arith.constant 0 : index
    %177 = vector.load %arg15[%c2_194, %c0_195, %c0_196] : memref<10x10x160xbf16, #tpu.memory_space<vmem>>, vector<8x8x160xbf16>
    %178 = vector.shape_cast %177 : vector<8x8x160xbf16> to vector<64x160xbf16>
    %c6_197 = arith.constant 6 : index
    %c0_198 = arith.constant 0 : index
    %c0_199 = arith.constant 0 : index
    %179 = vector.load %arg8[%c6_197, %c0_198, %c0_199] : memref<9x160x128xbf16, #tpu.memory_space<vmem>>, vector<1x160x128xbf16>
    %180 = vector.shape_cast %179 : vector<1x160x128xbf16> to vector<160x128xbf16>
    %cst_200 = arith.constant dense<0.000000e+00> : vector<64x128xf32>
    %181 = tpu.matmul %178, %180, %cst_200 {dimension_numbers = #tpu.dot_dimension_numbers<[1], [0], [0], [1], [0, 0, 1, 1], [], []>} : vector<64x160xbf16>, vector<160x128xbf16>, vector<64x128xf32> -> vector<64x128xf32>
    %182 = arith.addf %176, %181 : vector<64x128xf32>
    %c2_201 = arith.constant 2 : index
    %c1_202 = arith.constant 1 : index
    %c0_203 = arith.constant 0 : index
    %183 = vector.load %arg15[%c2_201, %c1_202, %c0_203] : memref<10x10x160xbf16, #tpu.memory_space<vmem>>, vector<8x8x160xbf16>
    %184 = vector.shape_cast %183 : vector<8x8x160xbf16> to vector<64x160xbf16>
    %c7_204 = arith.constant 7 : index
    %c0_205 = arith.constant 0 : index
    %c0_206 = arith.constant 0 : index
    %185 = vector.load %arg8[%c7_204, %c0_205, %c0_206] : memref<9x160x128xbf16, #tpu.memory_space<vmem>>, vector<1x160x128xbf16>
    %186 = vector.shape_cast %185 : vector<1x160x128xbf16> to vector<160x128xbf16>
    %cst_207 = arith.constant dense<0.000000e+00> : vector<64x128xf32>
    %187 = tpu.matmul %184, %186, %cst_207 {dimension_numbers = #tpu.dot_dimension_numbers<[1], [0], [0], [1], [0, 0, 1, 1], [], []>} : vector<64x160xbf16>, vector<160x128xbf16>, vector<64x128xf32> -> vector<64x128xf32>
    %188 = arith.addf %182, %187 : vector<64x128xf32>
    %c2_208 = arith.constant 2 : index
    %c2_209 = arith.constant 2 : index
    %c0_210 = arith.constant 0 : index
    %189 = vector.load %arg15[%c2_208, %c2_209, %c0_210] : memref<10x10x160xbf16, #tpu.memory_space<vmem>>, vector<8x8x160xbf16>
    %190 = vector.shape_cast %189 : vector<8x8x160xbf16> to vector<64x160xbf16>
    %c8_211 = arith.constant 8 : index
    %c0_212 = arith.constant 0 : index
    %c0_213 = arith.constant 0 : index
    %191 = vector.load %arg8[%c8_211, %c0_212, %c0_213] : memref<9x160x128xbf16, #tpu.memory_space<vmem>>, vector<1x160x128xbf16>
    %192 = vector.shape_cast %191 : vector<1x160x128xbf16> to vector<160x128xbf16>
    %cst_214 = arith.constant dense<0.000000e+00> : vector<64x128xf32>
    %193 = tpu.matmul %190, %192, %cst_214 {dimension_numbers = #tpu.dot_dimension_numbers<[1], [0], [0], [1], [0, 0, 1, 1], [], []>} : vector<64x160xbf16>, vector<160x128xbf16>, vector<64x128xf32> -> vector<64x128xf32>
    %194 = arith.addf %188, %193 : vector<64x128xf32>
    %c0_215 = arith.constant 0 : index
    %c0_216 = arith.constant 0 : index
    %195 = vector.load %arg9[%c0_215, %c0_216] : memref<1x128xf32, #tpu.memory_space<vmem>>, vector<1x128xf32>
    %196 = vector.broadcast %195 : vector<1x128xf32> to vector<64x128xf32>
    %197 = arith.mulf %194, %196 : vector<64x128xf32>
    %c0_217 = arith.constant 0 : index
    %c0_218 = arith.constant 0 : index
    %198 = vector.load %arg10[%c0_217, %c0_218] : memref<1x128xf32, #tpu.memory_space<vmem>>, vector<1x128xf32>
    %199 = vector.broadcast %198 : vector<1x128xf32> to vector<64x128xf32>
    %200 = arith.addf %197, %199 : vector<64x128xf32>
    %c0_219 = arith.constant 0 : index
    %c0_220 = arith.constant 0 : index
    %201 = vector.load %arg16[%c0_219, %c0_220] : memref<64x128xf32, #tpu.memory_space<vmem>>, vector<64x128xf32>
    %202 = arith.addf %200, %201 : vector<64x128xf32>
    %cst_221 = arith.constant 0.000000e+00 : f32
    %203 = vector.broadcast %cst_221 : f32 to vector<64x128xf32>
    %204 = arith.maximumf %202, %203 : vector<64x128xf32>
    %cst_222 = arith.constant dense<0.000000e+00> : vector<128xf32>
    %205 = vector.multi_reduction <add>, %204, %cst_222 [0] : vector<64x128xf32> to vector<128xf32>
    %206 = vector.shape_cast %205 : vector<128xf32> to vector<1x128xf32>
    %c0_223 = arith.constant 0 : index
    %c0_224 = arith.constant 0 : index
    %207 = vector.load %arg11[%c0_223, %c0_224] : memref<128x128xf32, #tpu.memory_space<vmem>>, vector<128x128xf32>
    %cst_225 = arith.constant dense<0.000000e+00> : vector<1x128xf32>
    %208 = tpu.matmul %206, %207, %cst_225 {dimension_numbers = #tpu.dot_dimension_numbers<[1], [0], [0], [1], [0, 0, 1, 1], [], []>} : vector<1x128xf32>, vector<128x128xf32>, vector<1x128xf32> -> vector<1x128xf32>
    %c0_226 = arith.constant 0 : index
    %c0_227 = arith.constant 0 : index
    %209 = vector.load %arg12[%c0_226, %c0_227] : memref<1x128xf32, #tpu.memory_space<vmem>>, vector<1x128xf32>
    %210 = arith.addf %208, %209 : vector<1x128xf32>
    %211 = vector.shape_cast %210 : vector<1x128xf32> to vector<1x128xf32>
    %212 = vector.broadcast %211 : vector<1x128xf32> to vector<8x128xf32>
    %c0_228 = arith.constant 0 : index
    %c0_229 = arith.constant 0 : index
    %c0_230 = arith.constant 0 : index
    %213 = vector.load %arg13[%c0_228, %c0_229, %c0_230] : memref<1x8x128xf32, #tpu.memory_space<vmem>>, vector<1x8x128xf32>
    %214 = vector.shape_cast %213 : vector<1x8x128xf32> to vector<8x128xf32>
    %215 = vector.shape_cast %212 : vector<8x128xf32> to vector<1x8x128xf32>
    tpu.vector_store %arg13[%c0_228, %c0_229, %c0_230], %215 {strides = array<i32>} : memref<1x8x128xf32, #tpu.memory_space<vmem>>, vector<1x8x128xf32>,
    return
  }
  func.func @transform_0(%arg0: i32) -> (i32, i32, i32, i32) {
    %c0_i32 = arith.constant 0 : i32
    %c0_i32_0 = arith.constant 0 : i32
    %c0_i32_1 = arith.constant 0 : i32
    %c0_i32_2 = arith.constant 0 : i32
    return %arg0, %c0_i32, %c0_i32_0, %c0_i32_1 : i32, i32, i32, i32
  }
  func.func @transform_1(%arg0: i32) -> (i32, i32, i32) {
    %c0_i32 = arith.constant 0 : i32
    %c0_i32_0 = arith.constant 0 : i32
    %c0_i32_1 = arith.constant 0 : i32
    %c0_i32_2 = arith.constant 0 : i32
    return %c0_i32, %c0_i32_0, %c0_i32_1 : i32, i32, i32
  }
  func.func @transform_2(%arg0: i32) -> (i32, i32) {
    %c0_i32 = arith.constant 0 : i32
    %c0_i32_0 = arith.constant 0 : i32
    %c0_i32_1 = arith.constant 0 : i32
    return %c0_i32, %c0_i32_0 : i32, i32
  }
  func.func @transform_3(%arg0: i32) -> (i32, i32) {
    %c0_i32 = arith.constant 0 : i32
    %c0_i32_0 = arith.constant 0 : i32
    %c0_i32_1 = arith.constant 0 : i32
    return %c0_i32, %c0_i32_0 : i32, i32
  }
  func.func @transform_4(%arg0: i32) -> (i32, i32, i32) {
    %c0_i32 = arith.constant 0 : i32
    %c0_i32_0 = arith.constant 0 : i32
    %c0_i32_1 = arith.constant 0 : i32
    %c0_i32_2 = arith.constant 0 : i32
    return %c0_i32, %c0_i32_0, %c0_i32_1 : i32, i32, i32
  }
  func.func @transform_5(%arg0: i32) -> (i32, i32) {
    %c0_i32 = arith.constant 0 : i32
    %c0_i32_0 = arith.constant 0 : i32
    %c0_i32_1 = arith.constant 0 : i32
    return %c0_i32, %c0_i32_0 : i32, i32
  }
  func.func @transform_6(%arg0: i32) -> (i32, i32) {
    %c0_i32 = arith.constant 0 : i32
    %c0_i32_0 = arith.constant 0 : i32
    %c0_i32_1 = arith.constant 0 : i32
    return %c0_i32, %c0_i32_0 : i32, i32
  }
  func.func @transform_7(%arg0: i32) -> (i32, i32, i32) {
    %c0_i32 = arith.constant 0 : i32
    %c0_i32_0 = arith.constant 0 : i32
    %c0_i32_1 = arith.constant 0 : i32
    %c0_i32_2 = arith.constant 0 : i32
    return %c0_i32, %c0_i32_0, %c0_i32_1 : i32, i32, i32
  }
  func.func @transform_8(%arg0: i32) -> (i32, i32) {
    %c0_i32 = arith.constant 0 : i32
    %c0_i32_0 = arith.constant 0 : i32
    %c0_i32_1 = arith.constant 0 : i32
    return %c0_i32, %c0_i32_0 : i32, i32
  }
  func.func @transform_9(%arg0: i32) -> (i32, i32) {
    %c0_i32 = arith.constant 0 : i32
    %c0_i32_0 = arith.constant 0 : i32
    %c0_i32_1 = arith.constant 0 : i32
    return %c0_i32, %c0_i32_0 : i32, i32
  }
  func.func @transform_10(%arg0: i32) -> (i32, i32) {
    %c0_i32 = arith.constant 0 : i32
    %c0_i32_0 = arith.constant 0 : i32
    %c0_i32_1 = arith.constant 0 : i32
    return %c0_i32, %c0_i32_0 : i32, i32
  }
  func.func @transform_11(%arg0: i32) -> (i32, i32) {
    %c0_i32 = arith.constant 0 : i32
    %c0_i32_0 = arith.constant 0 : i32
    %c0_i32_1 = arith.constant 0 : i32
    return %c0_i32, %c0_i32_0 : i32, i32
  }
  func.func @transform_12(%arg0: i32) -> (i32, i32, i32) {
    %c0_i32 = arith.constant 0 : i32
    %c0_i32_0 = arith.constant 0 : i32
    %c0_i32_1 = arith.constant 0 : i32
    return %arg0, %c0_i32, %c0_i32_0 : i32, i32, i32
  }
}

</mosaic_0001>

<bundles_post_ra>
// kernel: tile.37
= control target key start
LH: loop header
LB: loop body
LE: loop exit
PB: predicated region body
PF: predicated region fallthrough
CT: control target
= control target key end

     0   :  { %s22_s0 = inlined_call_operand.vmem [shape: f32[16], index: 0, kind: input, shape index: {}]   ;;  %s23_s1 = inlined_call_operand.vmem [shape: f32[8,16], index: 1, kind: output, shape index: {}]  }
   0x1   :  { %v4_v0 = vld [vmem:[%s22_s0] ss:$0 sm:$0xff] }
   0x2   :  { %5 = vst [vmem:[%s23_s1] sm:$0xff] %v4_v0 }

// kernel: tile.38
= control target key start
LH: loop header
LB: loop body
LE: loop exit
PB: predicated region body
PF: predicated region fallthrough
CT: control target
= control target key end

     0   :  { %s67_s10 = smov 112   ;;  %s68_s11 = smov 80   ;;  %vm3_vm0 = vcmask 130048   ;;  %vm9_vm1 = vcmask 1048448   ;;  %vm15_vm2 = vcmask 917248   ;;  %vm21_vm3 = vcmask 786048   ;;  %s111_s0 = inlined_call_operand.vmem [shape: f32[8,16], index: 0, kind: input, shape index: {}]   ;;  %s112_s1 = inlined_call_operand.vmem [shape: f32[1,128], index: 1, kind: output, shape index: {}]  }
   0x1   :  { %v53_v0 = vld [vmem:[%s111_s0 + $0x7] sm:$0x1]   ;;  %v55_v1 = vld [vmem:[%s111_s0 + $0x5] sm:$0x1]   ;;  %v54_v2 = vld [vmem:[%s111_s0 + $0x6] sm:$0x1]  }
   0x2   :  { %7 = vrot.lane.b32.xlu0 %v53_v0, %s67_s10  ;;  %19 = vrot.lane.b32.xlu1 %v55_v1, %s68_s11  ;;  %v56_v3 = vld [vmem:[%s111_s0 + $0x4] sm:$0x1]   ;;  %v2_v4 = vld [vmem:[%s111_s0] sm:$0x1]   ;;  %s69_s18 = smov 96   ;;  %s70_s19 = smov 64  }
   0x3   :  { %4 = vst.msk [vmem:[#allocation0] sm:$0x1] %vm3_vm0, %v2_v4   ;;  %v57_v5 = vld [vmem:[%s111_s0 + $0x3] sm:$0x1]   ;;  %v58_v6 = vld [vmem:[%s111_s0 + $0x2] sm:$0x1]  }
   0x4   :  { %s71_s24 = smov 48   ;;  %s72_s25 = smov 32   ;;  %v59_v7 = vld [vmem:[%s111_s0 + $0x1] sm:$0x1]   ;;  %vm27_vm4 = vcmask 654848   ;;  %vm33_vm5 = vcmask 523648  }
   0x5   :  { %s73_s0 = smov 16   ;;  %vm39_vm6 = vcmask 392448   ;;  %vm45_vm7 = vcmask 261248  }
   0x6   :  { %13 = vrot.lane.b32.xlu0 %v54_v2, %s69_s18  ;;  %25 = vrot.lane.b32.xlu1 %v56_v3, %s70_s19 }
   0xa   :  { %31 = vrot.lane.b32.xlu0 %v57_v5, %s71_s24  ;;  %37 = vrot.lane.b32.xlu1 %v58_v6, %s72_s25 }
   0xe   :  { %43 = vrot.lane.b32.xlu0 %v59_v7, %s73_s0 }
  0x74   :  { %v8_v8 = vpop.permute.xlu0 %7   ;;  %v20_v9 = vpop.permute.xlu1 %19  }
  0x75   :  { %10 = vst.msk [vmem:[#allocation0] sm:$0x1] %vm9_vm1, %v8_v8  }
  0x78   :  { %v14_v10 = vpop.permute.xlu0 %13   ;;  %v26_v11 = vpop.permute.xlu1 %25  }
  0x79   :  { %16 = vst.msk [vmem:[#allocation0] sm:$0x1] %vm15_vm2, %v14_v10  }
  0x7a   :  { %22 = vst.msk [vmem:[#allocation0] sm:$0x1] %vm21_vm3, %v20_v9  }
  0x7b   :  { %28 = vst.msk [vmem:[#allocation0] sm:$0x1] %vm27_vm4, %v26_v11  }
  0x7c   :  { %v32_v12 = vpop.permute.xlu0 %31   ;;  %v38_v13 = vpop.permute.xlu1 %37  }
  0x7d   :  { %34 = vst.msk [vmem:[#allocation0] sm:$0x1] %vm33_vm5, %v32_v12  }
  0x7e   :  { %40 = vst.msk [vmem:[#allocation0] sm:$0x1] %vm39_vm6, %v38_v13  }
  0x80   :  { %v44_v14 = vpop.permute.xlu0 %43  }
  0x81   :  { %46 = vst.msk [vmem:[#allocation0] sm:$0x1] %vm45_vm7, %v44_v14  }
  0x88   :  { %v50_v15 = vld [vmem:[#allocation0] sm:$0x1] }
  0x89   :  { %52 = vst [vmem:[%s112_s1] sm:$0x1] %v50_v15 }

// kernel: resnet3d_forward.1
= control target key start
LH: loop header
LB: loop body
LE: loop exit
PB: predicated region body
PF: predicated region fallthrough
CT: control target
= control target key end

     0   :  { %s9229_s21 = smov 0   ;;  %s11634_s0 = inlined_call_operand.vmem [shape: bf16[2,8,8,8], index: 0, kind: input, shape index: {}]   ;;  %s11635_s1 = inlined_call_operand.vmem [shape: bf16[9,10,128], index: 1, kind: input, shape index: {}]   ;;  %s11636_s2 = inlined_call_operand.vmem [shape: f32[1,128], index: 2, kind: input, shape index: {}]   ;;  %s11637_s3 = inlined_call_operand.vmem [shape: f32[1,128], index: 3, kind: input, shape index: {}]   ;;  %s11638_s4 = inlined_call_operand.vmem [shape: bf16[9,160,128], index: 4, kind: input, shape index: {}]   ;;  %s11639_s5 = inlined_call_operand.vmem [shape: f32[1,128], index: 5, kind: input, shape index: {}]   ;;  %s11640_s6 = inlined_call_operand.vmem [shape: f32[1,128], index: 6, kind: input, shape index: {}]   ;;  %s11641_s7 = inlined_call_operand.vmem [shape: bf16[9,160,128], index: 7, kind: input, shape index: {}]   ;;  %s11642_s8 = inlined_call_operand.vmem [shape: f32[1,128], index: 8, kind: input, shape index: {}]   ;;  %s11643_s9 = inlined_call_operand.vmem [shape: f32[1,128], index: 9, kind: input, shape index: {}]   ;;  %s11644_s10 = inlined_call_operand.vmem [shape: f32[128,128], index: 10, kind: input, shape index: {}]   ;;  %s11645_s11 = inlined_call_operand.vmem [shape: f32[1,128], index: 11, kind: input, shape index: {}]   ;;  %s11646_s12 = inlined_call_operand.vmem [shape: f32[2,8,128], index: 12, kind: output, shape index: {}]  }
   0x1 LB: > { %s7425_s22 = sadd.s32 4294967295, %s9158_s21   ;;  %p7429_p0 = scmp.ge.s32.totalorder %s9158_s21, 1  ;;  %s9158_s21 = sphi %s9229_s21, %s22_s21  }
   0x2   : > { %p362_p1 = scmp.lt.s32.totalorder %s9158_s21, 3 }
   0x4   : > { %p363_p2 = pnand %p7429_p0, %p362_p1 }
   0x5   : > { %vm770_vm0 = vcmask (!%p363_p2), 1044480   ;;  %p403_p3 = scmp.lt.s32.totalorder (!%p363_p2), %s7425_s22, 1  ;;  %v8903_v0 = vld [vmem:[%s11635_s1 + $0x10] sm:$0x1f] (!%p363_p2)   ;;  %vm413_vm1 = vcmask (!%p363_p2), 76800   ;;  %vm415_vm2 = vcmask (!%p363_p2), 73728  }
   0x6   : > { %366 = sbr.rel (%p363_p2) target bundleno = 1713 (0x6b1), region = 68  ;;  %v9160_v1 = vmov (!%p363_p2), 0   ;;  %8884 = vmatprep.subr.msk.bf16.mxu0 (!%p363_p2), %vm770_vm0, %v8903_v0  ;;  %v1036_v2 = vsel (!%p363_p2), %vm770_vm0, %v8903_v0, 0  ;;  %vm550_vm3 = vcmask (!%p363_p2), 60416   ;;  %vm551_vm4 = vsmask.f32 (!%p363_p2), 7938 }
   0x7   : > { %414 = vst.msk [vmem:[#allocation2] sm:$0xf] (!%p363_p2), %vm413_vm1, %v9160_v1  ;;  %417 = vst.msk [vmem:[#allocation2 + $0x8] sm:$0xf] (!%p363_p2), %vm413_vm1, %v9160_v1  ;;  %8442 = vmatpush3.bf16.msra.mxu0 (!%p363_p2), %v1036_v2  ;;  %v8904_v3 = vld [vmem:[%s11635_s1 + $0x18] sm:$0x1f] (!%p363_p2)  }
   0x8   : > { %416 = vst.msk [vmem:[#allocation2 + $0x4] sm:$0x1] (!%p363_p2), %vm415_vm2, %v9160_v1  ;;  %418 = vst.msk [vmem:[#allocation2 + $0xc] sm:$0x1] (!%p363_p2), %vm415_vm2, %v9160_v1  ;;  %vm557_vm5 = vsmask.f32 (!%p363_p2), 256  ;;  %8885 = vmatprep.subr.msk.bf16.mxu0 (!%p363_p2), %vm770_vm0, %v8904_v3 }
   0x9   : > { %419 = vst.msk [vmem:[#allocation2 + $0x10] sm:$0xf] (!%p363_p2), %vm413_vm1, %v9160_v1  ;;  %421 = vst.msk [vmem:[#allocation2 + $0x18] sm:$0xf] (!%p363_p2), %vm413_vm1, %v9160_v1  ;;  %vm556_vm6 = vcmask (!%p363_p2), 57344   ;;  %vm968_vm8 = vcmask (!%p363_p2), 1042432  }
   0xa   : > { %420 = vst.msk [vmem:[#allocation2 + $0x14] sm:$0x1] (!%p363_p2), %vm415_vm2, %v9160_v1  ;;  %422 = vst.msk [vmem:[#allocation2 + $0x1c] sm:$0x1] (!%p363_p2), %vm415_vm2, %v9160_v1  ;;  %vm969_vm10 = vcmask (!%p363_p2), 1046532   ;;  %v9312_v26 = vsel (!%p363_p2), %vm770_vm0, %v8904_v3, 0 }
   0xb   : > { %423 = vst.msk [vmem:[#allocation2 + $0x20] sm:$0xf] (!%p363_p2), %vm413_vm1, %v9160_v1  ;;  %425 = vst.msk [vmem:[#allocation2 + $0x28] sm:$0xf] (!%p363_p2), %vm413_vm1, %v9160_v1  ;;  %vm757_vm11 = vcmask (!%p363_p2), 80896   ;;  %v7282_v62 = vld [vmem:[%s11644_s10 + $0x10] sm:$0xff] (!%p363_p2) }
   0xc   : > { %424 = vst.msk [vmem:[#allocation2 + $0x24] sm:$0x1] (!%p363_p2), %vm415_vm2, %v9160_v1  ;;  %426 = vst.msk [vmem:[#allocation2 + $0x2c] sm:$0x1] (!%p363_p2), %vm415_vm2, %v9160_v1  ;;  %vm622_vm13 = vsmask.f32 (!%p363_p2), 3328 }
   0xd   : > { %s11662_s22 = smov (!%p403_p3, %s7425_s22), 1  ;;  %427 = vst.msk [vmem:[#allocation2 + $0x30] sm:$0xf] %vm413_vm1, %v9160_v1  ;;  %429 = vst.msk [vmem:[#allocation2 + $0x38] sm:$0xf] %vm413_vm1, %v9160_v1 }
   0xe   : > { %428 = vst.msk [vmem:[#allocation2 + $0x34] sm:$0x1] %vm415_vm2, %v9160_v1  ;;  %430 = vst.msk [vmem:[#allocation2 + $0x3c] sm:$0x1] %vm415_vm2, %v9160_v1  ;;  %s8342_s25 = sshll.u32 %s11662_s22, 5  ;;  %s7432_s17 = sshll.u32 %s11662_s22, 3 }
   0xf   : > { %431 = vst.msk [vmem:[#allocation2 + $0x40] sm:$0xf] %vm413_vm1, %v9160_v1  ;;  %433 = vst.msk [vmem:[#allocation2 + $0x48] sm:$0xf] %vm413_vm1, %v9160_v1  ;;  %s9288_s28 = scalar_lea.vmem %s11634_s0, %s8342_s25  ;;  %v553_v16 = vld [vmem:[#allocation2 + $0x8] sm:$0xf]  ;;  %s411_s20 = scalar_lea.vmem %s11646_s12, %s7432_s17 }
  0x10   : > { %432 = vst.msk [vmem:[#allocation2 + $0x44] sm:$0x1] %vm415_vm2, %v9160_v1  ;;  %434 = vst.msk [vmem:[#allocation2 + $0x4c] sm:$0x1] %vm415_vm2, %v9160_v1  ;;  %v461_v4 = vld [vmem:[%s9288_s28] sm:$0xf] }
  0x11   : > { %v462_v5 = vld [vmem:[%s9288_s28 + $0x4] sm:$0xf]  ;;  %v470_v6 = vshrl.u32 %v461_v4, 16  ;;  %v473_v7 = vshll.u32 %v461_v4, 16  ;;  %v463_v8 = vld [vmem:[%s9288_s28 + $0x8] sm:$0xf]  ;;  %vm9300_vm7 = vmand %vm550_vm3, %vm551_vm4 }
  0x12   : > { %v478_v9 = vshrl.u32 %v462_v5, 16  ;;  %v481_v10 = vshll.u32 %v462_v5, 16  ;;  %v486_v11 = vshrl.u32 %v463_v8, 16  ;;  %v489_v12 = vshll.u32 %v463_v8, 16  ;;  %v464_v13 = vld [vmem:[%s9288_s28 + $0xc] sm:$0xf]  ;;  %vm9305_vm9 = vmand %vm556_vm6, %vm557_vm5 }
  0x13   : > { %v472_v14 = vrot.slane %v470_v6, 7  ;;  %v559_v19 = vld [vmem:[#allocation2 + $0xc] sm:$0x1]  ;;  %v9309_v20 = vld [vmem:[#allocation2] sm:$0xe]  ;;  %v494_v22 = vshrl.u32 %v464_v13, 16  ;;  %vm9337_vm12 = vmor %vm968_vm8, %vm969_vm10 }
  0x14   : > { %v480_v17 = vrot.slane %v478_v9, 7  ;;  %v488_v21 = vrot.slane %v486_v11, 7  ;;  %v562_v25 = vld [vmem:[#allocation2 + $0x10] sm:$0xf]  ;;  %v565_v31 = vld [vmem:[#allocation2 + $0x14] sm:$0x1] }
  0x15   : > { %v475_v23 = vor.u32 %v473_v7, %v472_v14  ;;  %v476_v24 = vrot.slane %v472_v14, 4  ;;  %v568_v32 = vld [vmem:[#allocation2 + $0x18] sm:$0xf]  ;;  %v7453_v35 = vrot.slane %v9309_v20, 9  ;;  %v571_v36 = vld [vmem:[#allocation2 + $0x1c] sm:$0x1] }
  0x16   : > { %v483_v27 = vor.u32 %v481_v10, %v480_v17  ;;  %v484_v28 = vrot.slane %v480_v17, 4  ;;  %v491_v29 = vor.u32 %v489_v12, %v488_v21  ;;  %v492_v30 = vrot.slane %v488_v21, 4  ;;  %v465_v37 = vld [vmem:[%s9288_s28 + $0x10] sm:$0xf]  ;;  %v577_v43 = vld [vmem:[#allocation2 + $0x24] sm:$0x1] }
  0x17   : > { %v554_v33 = vsel %vm9300_vm7, %v475_v23, %v553_v16  ;;  %v560_v34 = vsel %vm9305_vm9, %v476_v24, %v559_v19  ;;  %v496_v38 = vrot.slane %v494_v22, 7  ;;  %v9328_v44 = vld [vmem:[#allocation2 + $0x4] sm:$0x1]  ;;  %v497_v45 = vshll.u32 %v464_v13, 16  ;;  %v574_v49 = vld [vmem:[#allocation2 + $0x20] sm:$0xf] }
  0x18   : > { %555 = vst [vmem:[#allocation2 + $0x8] sm:$0xf] %v554_v33  ;;  %561 = vst [vmem:[#allocation2 + $0xc] sm:$0x1] %v560_v34  ;;  %v563_v39 = vsel %vm9300_vm7, %v483_v27, %v562_v25  ;;  %v566_v40 = vsel %vm9305_vm9, %v484_v28, %v565_v31  ;;  %v569_v41 = vsel %vm9300_vm7, %v491_v29, %v568_v32  ;;  %v502_v47 = vshrl.u32 %v465_v37, 16 }
  0x19   : > { %v572_v42 = vsel %vm9305_vm9, %v492_v30, %v571_v36  ;;  %564 = vst [vmem:[#allocation2 + $0x10] sm:$0xf] %v563_v39  ;;  %567 = vst [vmem:[#allocation2 + $0x14] sm:$0x1] %v566_v40  ;;  %v500_v46 = vrot.slane %v496_v38, 4  ;;  %v505_v48 = vshll.u32 %v465_v37, 16  ;;  %v499_v52 = vor.u32 %v497_v45, %v496_v38 }
  0x1a   : > { %570 = vst [vmem:[#allocation2 + $0x18] sm:$0xf] %v569_v41  ;;  %573 = vst [vmem:[#allocation2 + $0x1c] sm:$0x1] %v572_v42  ;;  %v466_v50 = vld [vmem:[%s9288_s28 + $0x14] sm:$0xf] }
  0x1b   : > { %v467_v51 = vld [vmem:[%s9288_s28 + $0x18] sm:$0xf]  ;;  %v504_v53 = vrot.slane %v502_v47, 7  ;;  %v578_v54 = vsel %vm9305_vm9, %v500_v46, %v577_v43  ;;  %v580_v55 = vld [vmem:[#allocation2 + $0x28] sm:$0xf]  ;;  %v510_v56 = vshrl.u32 %v466_v50, 16  ;;  %v575_v2 = vsel %vm9300_vm7, %v499_v52, %v574_v49 }
  0x1c   : > { %v973_v57 = vrot.slane %v9328_v44, 5  ;;  %579 = vst [vmem:[#allocation2 + $0x24] sm:$0x1] %v578_v54  ;;  %v583_v58 = vld [vmem:[#allocation2 + $0x2c] sm:$0x1]  ;;  %v513_v59 = vshll.u32 %v466_v50, 16 }
  0x1d   : > { %v518_v60 = vshrl.u32 %v467_v51, 16  ;;  %v521_v61 = vshll.u32 %v467_v51, 16  ;;  %v507_v63 = vor.u32 %v505_v48, %v504_v53  ;;  %v508_v0 = vrot.slane %v504_v53, 4  ;;  %v586_v4 = vld [vmem:[#allocation2 + $0x30] sm:$0xf] }
  0x1e   : > { %v512_v3 = vrot.slane %v510_v56, 7  ;;  %576 = vst [vmem:[#allocation2 + $0x20] sm:$0xf] %v575_v2  ;;  %v589_v6 = vld [vmem:[#allocation2 + $0x34] sm:$0x1]  ;;  %v635_v8 = vshll.u32 %v9328_v44, 16  ;;  %v974_v17 = vsel %vm9337_vm12, %v7453_v35, %v973_v57 }
  0x1f   : > { %v520_v5 = vrot.slane %v518_v60, 7  ;;  %v592_v7 = vld [vmem:[#allocation2 + $0x38] sm:$0xf]  ;;  %v9344_v9 = vld [vmem:[#allocation2 + $0xc] sm:$0x1]  ;;  %v581_v11 = vsel %vm9300_vm7, %v507_v63, %v580_v55  ;;  %v584_v12 = vsel %vm9305_vm9, %v508_v0, %v583_v58  ;;  %vm439_vm1 = vcmask 1040384  }
  0x20   : > { %v945_v10 = vld [vmem:[#allocation2 + $0x8] sm:$0xe]  ;;  %v515_v13 = vor.u32 %v513_v59, %v512_v3  ;;  %v516_v14 = vrot.slane %v512_v3, 4  ;;  %v595_v16 = vld [vmem:[#allocation2 + $0x3c] sm:$0x1]  ;;  %v977_v20 = vrot.slane %v9344_v9, 5 }
  0x21   : > { %v7454_v19 = vrot.slane %v945_v10, 9  ;;  %v9353_v21 = vld [vmem:[#allocation2 + $0x14] sm:$0x1]  ;;  %v9355_v22 = vld [vmem:[#allocation2 + $0x1c] sm:$0x1]  ;;  %v523_v23 = vor.u32 %v521_v61, %v520_v5  ;;  %v524_v34 = vrot.slane %v520_v5, 4 }
  0x22   : > { %582 = vst [vmem:[#allocation2 + $0x28] sm:$0xf] %v581_v11  ;;  %585 = vst [vmem:[#allocation2 + $0x2c] sm:$0x1] %v584_v12  ;;  %v946_v24 = vld [vmem:[#allocation2 + $0x10] sm:$0xe]  ;;  %v587_v29 = vsel %vm9300_vm7, %v515_v13, %v586_v4  ;;  %v590_v30 = vsel %vm9305_vm9, %v516_v14, %v589_v6 }
  0x23   : > { %v947_v25 = vld [vmem:[#allocation2 + $0x18] sm:$0xe]  ;;  %v981_v27 = vrot.slane %v9353_v21, 5  ;;  %v985_v28 = vrot.slane %v9355_v22, 5  ;;  %v978_v31 = vsel %vm9337_vm12, %v7454_v19, %v977_v20  ;;  %v7455_v32 = vrot.slane %v946_v24, 9 }
  0x24   : > { %v7456_v33 = vrot.slane %v947_v25, 9  ;;  %588 = vst [vmem:[#allocation2 + $0x30] sm:$0xf] %v587_v29  ;;  %591 = vst [vmem:[#allocation2 + $0x34] sm:$0x1] %v590_v30  ;;  %v7463_v35 = vcombine.low %v974_v17, %v978_v31  ;;  %v593_v37 = vsel %vm9300_vm7, %v523_v23, %v592_v7  ;;  %v596_v42 = vsel %vm9305_vm9, %v524_v34, %v595_v16 }
  0x25   : > { %v9365_v36 = vld [vmem:[#allocation2 + $0x24] sm:$0x1]  ;;  %v468_v38 = vld [vmem:[%s9288_s28 + $0x1c] sm:$0xf]  ;;  %v982_v39 = vsel %vm9337_vm12, %v7455_v32, %v981_v27  ;;  %594 = vst [vmem:[#allocation2 + $0x38] sm:$0xf] %v593_v37 }
  0x26   : > { %v986_v40 = vsel %vm9337_vm12, %v7456_v33, %v985_v28  ;;  %v989_v41 = vrot.slane %v9365_v36, 5  ;;  %8443 = vmatprep.mubr.msk.bf16.mxu0 %vm757_vm11, %v7463_v35  ;;  %v948_v44 = vld [vmem:[#allocation2 + $0x20] sm:$0xe]  ;;  %597 = vst [vmem:[#allocation2 + $0x3c] sm:$0x1] %v596_v42  ;;  %v526_v47 = vshrl.u32 %v468_v38, 16 }
  0x27   : > { %v7464_v43 = vcombine.low %v982_v39, %v986_v40  ;;  %v8906_v45 = vld [vmem:[%s11635_s1 + $0x20] sm:$0x1f]   ;;  %v7457_v46 = vrot.slane %v948_v44, 9  ;;  %v529_v48 = vshll.u32 %v468_v38, 16  ;;  %v1235_v49 = vld [vmem:[#allocation2 + $0x8] sm:$0xf] }
  0x28   : > { %v9381_v50 = vrot.slane %v635_v8, 5  ;;  %v598_v53 = vld [vmem:[#allocation2 + $0x40] sm:$0xf]  ;;  %v9390_v57 = vrot.slane %v526_v47, 7  ;;  %vm623_vm14 = vsmask.f32 7440 }
  0x29   : > { %8444 = vmatmul.mubr.msk.bf16.vlgmr.msra.gmra.mrb[0].mxu0 %vm757_vm11, %v7464_v43  ;;  %v9384_v51 = vld [vmem:[#allocation2 + $0x2c] sm:$0x1]  ;;  %v949_v52 = vld [vmem:[#allocation2 + $0x28] sm:$0xe]  ;;  %v990_v54 = vsel %vm9337_vm12, %v7457_v46, %v989_v41  ;;  %v1237_v2 = vld [vmem:[#allocation2 + $0x10] sm:$0xf] }
  0x2a   : > { %8452 = vmatpush3.bf16.msra.mxu0 %v9312_v26  ;;  %v7458_v55 = vrot.slane %v949_v52, 9  ;;  %v993_v56 = vrot.slane %v9384_v51, 5  ;;  %v9392_v58 = vld [vmem:[#allocation2 + $0xc] sm:$0x1]  ;;  %v531_v0 = vor.u32 %v529_v48, %v9390_v57  ;;  %v9401_v3 = vld [vmem:[#allocation2 + $0x14] sm:$0x1]  ;;  %vm9430_vm15 = vmor %vm622_vm13, %vm623_vm14 }
  0x2b   : > { %v9394_v59 = vld [vmem:[#allocation2 + $0x34] sm:$0x1]  ;;  %v950_v60 = vld [vmem:[#allocation2 + $0x30] sm:$0xe]  ;;  %8886 = vmatprep.subr.msk.bf16.mxu0 %vm770_vm0, %v8906_v45  ;;  %v9404_v6 = vsel %vm770_vm0, %v8906_v45, 0  ;;  %v1252_v7 = vshrl.u32 %v1235_v49, 16 }
  0x2c   : > { %v994_v26 = vsel %vm9337_vm12, %v7458_v55, %v993_v56  ;;  %v7459_v61 = vrot.slane %v950_v60, 9  ;;  %v997_v63 = vrot.slane %v9394_v59, 5  ;;  %v951_v5 = vld [vmem:[#allocation2 + $0x38] sm:$0xe]  ;;  %v599_v12 = vsel %vm9300_vm7, %v531_v0, %v598_v53  ;;  %v8905_v20 = vld [vmem:[#allocation2 + $0x8] ss:$8 sps:$4 sm:$0xff]  }
  0x2d   : > { %v7465_v4 = vcombine.low %v990_v54, %v994_v26  ;;  %v9406_v8 = vld [vmem:[#allocation2 + $0x3c] sm:$0x1]  ;;  %v7460_v11 = vrot.slane %v951_v5, 9  ;;  %v1255_v13 = vshll.u32 %v1235_v49, 16  ;;  %600 = vst [vmem:[#allocation2 + $0x40] sm:$0xf] %v599_v12 }
  0x2e   : > { %v998_v10 = vsel %vm9337_vm12, %v7459_v61, %v997_v63  ;;  %v1001_v14 = vrot.slane %v9406_v8, 5  ;;  %v1254_v16 = vrot.slane %v1252_v7, 4  ;;  %v1261_v17 = vshll.u32 %v9392_v58, 16  ;;  %v1239_v29 = vld [vmem:[#allocation2 + $0x18] sm:$0xf]  ;;  %v9147_v48 = vld [vmem:[%s11641_s7 + $0x2a8] sm:$0xff]  }
  0x2f   : > { %8447 = vmatprep.mubr.msk.bf16.mxu0 %vm757_vm11, %v7465_v4  ;;  %v1266_v19 = vshrl.u32 %v1237_v2, 16  ;;  %v532_v23 = vrot.slane %v9390_v57, 4  ;;  %v1257_v24 = vrot.slane %v1255_v13, 5  ;;  %v1269_v25 = vshll.u32 %v1237_v2, 16  ;;  %v9419_v30 = vld [vmem:[#allocation2 + $0x1c] sm:$0x1] }
  0x30   : > { %v1275_v27 = vshll.u32 %v9401_v3, 16  ;;  %v1002_v15 = vsel %vm9337_vm12, %v7460_v11, %v1001_v14  ;;  %v1497_v31 = vrot.slane %v9392_v58, 5  ;;  %v1263_v34 = vrot.slane %v1261_v17, 5  ;;  %v1241_v37 = vld [vmem:[#allocation2 + $0x20] sm:$0xf] }
  0x31   : > { %v1268_v28 = vrot.slane %v1266_v19, 4  ;;  %v7466_v32 = vcombine.low %v998_v10, %v1002_v15  ;;  %v1258_v33 = vor.u32 %v1257_v24, %v1254_v16  ;;  %v1271_v35 = vrot.slane %v1269_v25, 5  ;;  %v9422_v38 = vld [vmem:[#allocation2 + $0x24] sm:$0x1]  ;;  %v1243_v47 = vld [vmem:[#allocation2 + $0x28] sm:$0xf] }
  0x32   : > { %v1280_v39 = vshrl.u32 %v1239_v29, 16  ;;  %v1283_v40 = vshll.u32 %v1239_v29, 16  ;;  %v1289_v41 = vshll.u32 %v9419_v30, 16  ;;  %v1294_v42 = vshrl.u32 %v1241_v37, 16  ;;  %v9434_v55 = vld [vmem:[#allocation2 + $0x2c] sm:$0x1] }
  0x33   : > { %8448 = vmatmul.mubr.msk.bf16.gmra.mrb[4].mxu0 %vm757_vm11, %v7466_v32  ;;  %v1259_v43 = vrot.slane %v1258_v33, 4  ;;  %v1272_v44 = vor.u32 %v1271_v35, %v1268_v28  ;;  %v1297_v45 = vshll.u32 %v1241_v37, 16  ;;  %v1303_v46 = vshll.u32 %v9422_v38, 16  ;;  %v8907_v56 = vld [vmem:[#allocation2 + $0x18] ss:$8 sps:$4 sm:$0xff]  }
  0x34   : > { %8453 = vmatprep.mubr.msk.bf16.mxu0 %vm757_vm11, %v8905_v20  ;;  %v1277_v49 = vrot.slane %v1275_v27, 5  ;;  %v1282_v52 = vrot.slane %v1280_v39, 4  ;;  %v1285_v53 = vrot.slane %v1283_v40, 5  ;;  %v1296_v54 = vrot.slane %v1294_v42, 4  ;;  %v1245_v26 = vld [vmem:[#allocation2 + $0x30] sm:$0xf] }
  0x35   : > { %v1273_v57 = vrot.slane %v1272_v44, 4  ;;  %v1299_v60 = vrot.slane %v1297_v45, 5  ;;  %v8908_v61 = vld [vmem:[#allocation2 + $0x28] ss:$8 sps:$4 sm:$0xff]   ;;  %v9436_v0 = vrot.slane %v1289_v41, 5  ;;  %v9438_v2 = vrot.slane %v1303_v46, 5 }
  0x36   : > { %v1286_v63 = vor.u32 %v1285_v53, %v1282_v52  ;;  %v1308_v4 = vshrl.u32 %v1243_v47, 16  ;;  %v1264_v5 = vsel %vm9430_vm15, %v1259_v43, %v1263_v34  ;;  %v9445_v7 = vld [vmem:[%s11635_s1 + $0x28] sm:$0x1f]   ;;  %v9447_v11 = vld [vmem:[#allocation2 + $0x34] sm:$0x1]  ;;  %v1311_v12 = vshll.u32 %v1243_v47, 16 }
  0x37   : > { %v1300_v10 = vor.u32 %v1299_v60, %v1296_v54  ;;  %v1317_v13 = vshll.u32 %v9434_v55, 16  ;;  %v601_v14 = vld [vmem:[#allocation2 + $0x44] sm:$0x1]  ;;  %v1278_v16 = vsel %vm9430_vm15, %v1273_v57, %v1277_v49  ;;  %v1322_v20 = vshrl.u32 %v1245_v26, 16  ;;  %v1247_v24 = vld [vmem:[#allocation2 + $0x38] sm:$0xf] }
  0x38   : > { %v9452_v17 = vrot.slane %v1286_v63, 4  ;;  %v1310_v19 = vrot.slane %v1308_v4, 4  ;;  %v1313_v27 = vrot.slane %v1311_v12, 5  ;;  %v1325_v28 = vshll.u32 %v1245_v26, 16  ;;  %v9454_v29 = vld [vmem:[#allocation2 + $0x3c] sm:$0x1] }
  0x39   : > { %v1301_v25 = vrot.slane %v1300_v10, 4  ;;  %v1319_v15 = vrot.slane %v1317_v13, 5  ;;  %v1324_v32 = vrot.slane %v1322_v20, 4  ;;  %v1331_v33 = vshll.u32 %v9447_v11, 16  ;;  %v1249_v35 = vld [vmem:[#allocation2 + $0x40] sm:$0xf] }
  0x3a   : > { %v602_v34 = vsel %vm9305_vm9, %v532_v23, %v601_v14  ;;  %v1471_v37 = vld [vmem:[#allocation2 + $0x8] sm:$0xe]  ;;  %v7485_v39 = vcombine.low %v1264_v5, %v1278_v16  ;;  %v1314_v40 = vor.u32 %v1313_v27, %v1310_v19  ;;  %v1327_v41 = vrot.slane %v1325_v28, 5  ;;  %v1472_v45 = vld [vmem:[#allocation2 + $0x10] sm:$0xe]  ;;  %vm9903_vm9 = vmand %vm439_vm1, %vm557_vm5 }
  0x3b   : > { %8454 = vmatmul.mubr.msk.bf16.vlgmr.msra.gmra.mrb[0].mxu0 %vm757_vm11, %v8907_v56  ;;  %603 = vst [vmem:[#allocation2 + $0x44] sm:$0x1] %v602_v34  ;;  %v1336_v42 = vshrl.u32 %v1247_v24, 16  ;;  %v1292_v43 = vsel %vm9430_vm15, %v9452_v17, %v9436_v0  ;;  %v1333_v18 = vrot.slane %v1331_v33, 5  ;;  %v1339_v23 = vshll.u32 %v1247_v24, 16 }
  0x3c   : > { %8462 = vmatpush3.bf16.msra.mxu0 %v9404_v6  ;;  %8457 = vmatprep.mubr.msk.bf16.mxu0 %vm757_vm11, %v8908_v61  ;;  %v1345_v44 = vshll.u32 %v9454_v29, 16  ;;  %v8909_v46 = vld [vmem:[#allocation2 + $0x38] ss:$8 sps:$4 sm:$0xff]   ;;  %v1315_v47 = vrot.slane %v1314_v40, 4  ;;  %v1328_v49 = vor.u32 %v1327_v41, %v1324_v32  ;;  %v1350_v6 = vshrl.u32 %v1249_v35, 16 }
  0x3d   : > { %8887 = vmatprep.subr.msk.bf16.mxu0 %vm770_vm0, %v9445_v7  ;;  %v1338_v52 = vrot.slane %v1336_v42, 4  ;;  %v1306_v53 = vsel %vm9430_vm15, %v1301_v25, %v9438_v2  ;;  %v1341_v54 = vrot.slane %v1339_v23, 5  ;;  %v1353_v56 = vshll.u32 %v1249_v35, 16  ;;  %v1473_v60 = vld [vmem:[#allocation2 + $0x18] sm:$0xe] }
  0x3e   : > { %v7494_v57 = vrot.slane %v1471_v37, 9  ;;  %v1329_v26 = vrot.slane %v1328_v49, 4  ;;  %v1347_v61 = vrot.slane %v1345_v44, 5  ;;  %v1352_v63 = vrot.slane %v1350_v6, 4  ;;  %v1474_v4 = vld [vmem:[#allocation2 + $0x20] sm:$0xe] }
  0x3f   : > { %v7495_v0 = vrot.slane %v1472_v45, 9  ;;  %v1320_v5 = vsel %vm9430_vm15, %v1315_v47, %v1319_v15  ;;  %v1342_v10 = vor.u32 %v1341_v54, %v1338_v52  ;;  %v1355_v12 = vrot.slane %v1353_v56, 5  ;;  %v9478_v2 = vld [vmem:[%s11635_s1 + $0x30] sm:$0x1f]   ;;  %v1475_v20 = vld [vmem:[#allocation2 + $0x28] sm:$0xe] }
  0x40   : > { %v1501_v13 = vrot.slane %v9401_v3, 5  ;;  %v1334_v14 = vsel %vm9430_vm15, %v1329_v26, %v1333_v18  ;;  %v9486_v16 = vsel %vm9337_vm12, %v7494_v57, %v1497_v31  ;;  %v7496_v17 = vrot.slane %v1473_v60, 9  ;;  %v1476_v24 = vld [vmem:[#allocation2 + $0x30] sm:$0xe]  ;;  %v9504_v37 = vld [vmem:[#allocation2 + $0x38] sm:$0xe] }
  0x41   : > { %v1505_v19 = vrot.slane %v9419_v30, 5  ;;  %v1343_v25 = vrot.slane %v1342_v10, 4  ;;  %v1356_v27 = vor.u32 %v1355_v12, %v1352_v63  ;;  %v7497_v28 = vrot.slane %v1474_v4, 9  ;;  %v8912_v30 = vld [vmem:[%s11635_s1 + $0x8] sm:$0x1f]  }
  0x42   : > { %v9489_v3 = vld [vmem:[#allocation2 + $0x44] sm:$0x1]  ;;  %v9493_v15 = vsel %vm9337_vm12, %v7495_v0, %v1501_v13  ;;  %v1509_v31 = vrot.slane %v9422_v38, 5  ;;  %v7486_v32 = vcombine.low %v1292_v43, %v1306_v53  ;;  %v1560_v33 = vsel %vm770_vm0, %v9445_v7, 0  ;;  %v9509_v18 = vld [vmem:[#allocation2 + $0x40] sm:$0xe]  ;;  %8882 = vmatprep.subr.msk.bf16.mxu1 %vm770_vm0, %v8912_v30 }
  0x43   : > { %8458 = vmatmul.mubr.msk.bf16.gmra.mrb[4].mxu0 %vm757_vm11, %v8909_v46  ;;  %v1359_v58 = vshll.u32 %v9489_v3, 16  ;;  %v7487_v34 = vcombine.low %v1320_v5, %v1334_v14  ;;  %v1357_v35 = vrot.slane %v1356_v27, 4  ;;  %v7504_v41 = vcombine.low %v9486_v16, %v9493_v15  ;;  %v9524_v44 = vld [vmem:[#allocation2] sm:$0xf]  ;;  %v9534_v52 = vld [vmem:[#allocation2 + $0x10] sm:$0xf] }
  0x44   : > { %8463 = vmatprep.mubr.msk.bf16.mxu0 %vm757_vm11, %v7485_v39  ;;  %v7498_v42 = vrot.slane %v1475_v20, 9  ;;  %v1513_v38 = vrot.slane %v9434_v55, 5  ;;  %v9514_v39 = vsel %vm9337_vm12, %v7496_v17, %v1505_v19  ;;  %v9518_v7 = vsel %vm9337_vm12, %v7497_v28, %v1509_v31  ;;  %v9526_v55 = vld [vmem:[#allocation2 + $0x8] sm:$0xf]  ;;  %v9551_v5 = vld [vmem:[#allocation2 + $0x18] sm:$0xf] }
  0x45   : > { %v1361_v40 = vrot.slane %v1359_v58, 5  ;;  %v9522_v43 = vsel %vm770_vm0, %v9478_v2, 0  ;;  %v7499_v23 = vrot.slane %v1476_v24, 9  ;;  %v1348_v45 = vsel %vm9430_vm15, %v1343_v25, %v1347_v61 }
  0x46   : > { %v1517_v47 = vrot.slane %v9447_v11, 5  ;;  %v7500_v49 = vrot.slane %v9504_v37, 9  ;;  %v1521_v6 = vrot.slane %v9454_v29, 5  ;;  %v7501_v53 = vrot.slane %v9509_v18, 9  ;;  %v1762_v37 = vld [vmem:[#allocation2 + $0x18] sm:$0xf] }
  0x47   : > { %v1362_v46 = vsel %vm9430_vm15, %v1357_v35, %v1361_v40  ;;  %v1525_v54 = vrot.slane %v9489_v3, 5  ;;  %v772_v56 = vsel %vm770_vm0, %v8912_v30, 0  ;;  %v7505_v57 = vcombine.low %v9514_v39, %v9518_v7 }
  0x48   : > { %v9544_v60 = vsel %vm9337_vm12, %v7498_v42, %v1513_v38  ;;  %8422 = vmatpush3.bf16.msra.mxu1 %v772_v56  ;;  %v626_v11 = vshrl.u32 %v9524_v44, 16  ;;  %v629_v26 = vshll.u32 %v9524_v44, 16  ;;  %v7488_v61 = vcombine.low %v1348_v45, %v1362_v46  ;;  %v9569_v42 = vld [vmem:[#allocation2 + $0x28] sm:$0xf] }
  0x49   : > { %v640_v63 = vshrl.u32 %v9526_v55, 16  ;;  %v643_v0 = vshll.u32 %v9526_v55, 16  ;;  %v649_v4 = vshll.u32 %v9344_v9, 16  ;;  %v654_v13 = vshrl.u32 %v9534_v52, 16 }
  0x4a   : > { %v628_v10 = vrot.slane %v626_v11, 4  ;;  %v631_v12 = vrot.slane %v629_v26, 5  ;;  %v657_v14 = vshll.u32 %v9534_v52, 16  ;;  %v9559_v17 = vsel %vm9337_vm12, %v7499_v23, %v1517_v47  ;;  %v9577_v11 = vld [vmem:[#allocation2 + $0x30] sm:$0xf] }
  0x4b   : > { %8464 = vmatmul.mubr.msk.bf16.vlgmr.msra.gmra.mrb[0].mxu0 %vm757_vm11, %v7486_v32  ;;  %v642_v19 = vrot.slane %v640_v63, 4  ;;  %v645_v20 = vrot.slane %v643_v0, 5  ;;  %v663_v9 = vshll.u32 %v9353_v21, 16  ;;  %v656_v25 = vrot.slane %v654_v13, 4 }
  0x4c   : > { %8472 = vmatpush3.bf16.msra.mxu0 %v1560_v33  ;;  %8467 = vmatprep.mubr.msk.bf16.mxu0 %vm757_vm11, %v7487_v34  ;;  %v632_v24 = vor.u32 %v631_v12, %v628_v10  ;;  %v659_v27 = vrot.slane %v657_v14, 5  ;;  %v668_v28 = vshrl.u32 %v9551_v5, 16  ;;  %v651_v31 = vrot.slane %v649_v4, 5  ;;  %v9567_v33 = vld [vmem:[#allocation2 + $0x20] sm:$0xf] }
  0x4d   : > { %8888 = vmatprep.subr.msk.bf16.mxu0 %vm770_vm0, %v9478_v2  ;;  %v646_v58 = vor.u32 %v645_v20, %v642_v19  ;;  %v671_v30 = vshll.u32 %v9551_v5, 16  ;;  %v677_v32 = vshll.u32 %v9355_v22, 16  ;;  %v665_v40 = vrot.slane %v663_v9, 5 }
  0x4e   : > { %v633_v34 = vrot.slane %v632_v24, 4  ;;  %v660_v35 = vor.u32 %v659_v27, %v656_v25  ;;  %v670_v21 = vrot.slane %v668_v28, 4  ;;  %v682_v45 = vshrl.u32 %v9567_v33, 16 }
  0x4f   : > { %v647_v2 = vrot.slane %v646_v58, 4  ;;  %v673_v38 = vrot.slane %v671_v30, 5  ;;  %v679_v23 = vrot.slane %v677_v32, 5  ;;  %v685_v22 = vshll.u32 %v9567_v33, 16 }
  0x50   : > { %v638_v46 = vsel %vm9430_vm15, %v633_v34, %v9381_v50  ;;  %v661_v47 = vrot.slane %v660_v35, 4  ;;  %v691_v56 = vshll.u32 %v9365_v36, 16  ;;  %v684_v0 = vrot.slane %v682_v45, 4  ;;  %v9587_v36 = vld [vmem:[#allocation2 + $0x38] sm:$0xf] }
  0x51   : > { %v652_v26 = vsel %vm9430_vm15, %v647_v2, %v651_v31  ;;  %v674_v63 = vor.u32 %v673_v38, %v670_v21  ;;  %v696_v4 = vshrl.u32 %v9569_v42, 16  ;;  %v7506_v10 = vcombine.low %v9544_v60, %v9559_v17  ;;  %v8918_v35 = vld [vmem:[%s11635_s1] sm:$0x1f]   ;;  %v9619_v45 = vld [vmem:[#allocation2 + $0x14] sm:$0x1] }
  0x52   : > { %v7435_v50 = vcombine.low %v638_v46, %v652_v26  ;;  %v666_v12 = vsel %vm9430_vm15, %v661_v47, %v665_v40  ;;  %v687_v13 = vrot.slane %v685_v22, 5  ;;  %v699_v20 = vshll.u32 %v9569_v42, 16  ;;  %8883 = vmatprep.subr.msk.bf16.mxu1 %vm770_vm0, %v8918_v35 }
  0x53   : > { %8468 = vmatmul.mubr.msk.bf16.gmra.mrb[4].mxu0 %vm757_vm11, %v7488_v61  ;;  %v675_v14 = vrot.slane %v674_v63, 4  ;;  %v698_v19 = vrot.slane %v696_v4, 4  ;;  %v705_v61 = vshll.u32 %v9384_v51, 16  ;;  %v710_v17 = vshrl.u32 %v9577_v11, 16  ;;  %v9605_v51 = vld [vmem:[%s11635_s1 + $0x38] sm:$0x1f]  }
  0x54   : > { %8473 = vmatprep.mubr.msk.bf16.mxu0 %vm757_vm11, %v7504_v41  ;;  %8423 = vmatprep.mubr.msk.bf16.mxu1 %vm757_vm11, %v7435_v50  ;;  %v688_v60 = vor.u32 %v687_v13, %v684_v0  ;;  %v713_v9 = vshll.u32 %v9577_v11, 16  ;;  %v719_v24 = vshll.u32 %v9394_v59, 16  ;;  %v693_v15 = vrot.slane %v691_v56, 5  ;;  %v1764_v63 = vld [vmem:[#allocation2 + $0x20] sm:$0xf] }
  0x55   : > { %v680_v16 = vsel %vm9430_vm15, %v675_v14, %v679_v23  ;;  %v701_v41 = vrot.slane %v699_v20, 5  ;;  %v724_v25 = vshrl.u32 %v9587_v36, 16  ;;  %v712_v58 = vrot.slane %v710_v17, 4  ;;  %v1760_v23 = vld [vmem:[#allocation2 + $0x10] sm:$0xf] }
  0x56   : > { %v7436_v27 = vcombine.low %v666_v12, %v680_v16  ;;  %v689_v28 = vrot.slane %v688_v60, 4  ;;  %v715_v31 = vrot.slane %v713_v9, 5  ;;  %v707_v32 = vrot.slane %v705_v61, 5  ;;  %v9645_v4 = vld [vmem:[#allocation2 + $0x1c] sm:$0x1] }
  0x57   : > { %v702_v30 = vor.u32 %v701_v41, %v698_v19  ;;  %v726_v34 = vrot.slane %v724_v25, 4  ;;  %v727_v59 = vshll.u32 %v9587_v36, 16  ;;  %v1522_v40 = vsel %vm9337_vm12, %v7500_v49, %v1521_v6  ;;  %v9650_v14 = vld [vmem:[#allocation2 + $0x24] sm:$0x1]  ;;  %v1766_v19 = vld [vmem:[#allocation2 + $0x28] sm:$0xf] }
  0x58   : > { %8424 = vmatmul.mubr.msk.bf16.vlgmr.msra.gmra.mrb[0].mxu1 %vm757_vm11, %v7436_v27  ;;  %v716_v21 = vor.u32 %v715_v31, %v712_v58  ;;  %v721_v2 = vrot.slane %v719_v24, 5  ;;  %v733_v38 = vshll.u32 %v9406_v8, 16  ;;  %v694_v46 = vsel %vm9430_vm15, %v689_v28, %v693_v15  ;;  %v8913_v61 = vld [vmem:[#allocation2 + $0x10] ss:$8 sps:$4 sm:$0xff]   ;;  %v9657_v25 = vld [vmem:[#allocation2 + $0x2c] sm:$0x1] }
  0x59   : > { %v703_v47 = vrot.slane %v702_v30, 4  ;;  %v729_v22 = vrot.slane %v727_v59, 5  ;;  %v877_v29 = vsel %vm770_vm0, %v8918_v35, 0  ;;  %v1526_v8 = vsel %vm9337_vm12, %v7501_v53, %v1525_v54  ;;  %v1768_v27 = vld [vmem:[#allocation2 + $0x30] sm:$0xf] }
  0x5a   : > { %v717_v49 = vrot.slane %v716_v21, 4  ;;  %8432 = vmatpush3.bf16.msra.mxu1 %v877_v29  ;;  %v1777_v6 = vshrl.u32 %v1760_v23, 16  ;;  %v1780_v56 = vshll.u32 %v1760_v23, 16  ;;  %v1791_v26 = vshrl.u32 %v1762_v37, 16 }
  0x5b   : > { %8474 = vmatmul.mubr.msk.bf16.vlgmr.msra.gmra.mrb[0].mxu0 %vm757_vm11, %v7505_v57  ;;  %v708_v39 = vsel %vm9430_vm15, %v703_v47, %v707_v32  ;;  %v730_v7 = vor.u32 %v729_v22, %v726_v34  ;;  %v735_v57 = vrot.slane %v733_v38, 5  ;;  %v1786_v54 = vshll.u32 %v9619_v45, 16  ;;  %2641 = vmatprep.subr.bf16.mxu1 %v9160_v1  ;;  %v1770_v32 = vld [vmem:[#allocation2 + $0x38] sm:$0xf] }
  0x5c   : > { %8482 = vmatpush3.bf16.msra.mxu0 %v9522_v43  ;;  %8477 = vmatprep.mubr.msk.bf16.mxu0 %vm757_vm11, %v7506_v10  ;;  %v7437_v3 = vcombine.low %v694_v46, %v708_v39  ;;  %v1779_v18 = vrot.slane %v1777_v6, 4  ;;  %v1782_v53 = vrot.slane %v1780_v56, 5  ;;  %v722_v43 = vsel %vm9430_vm15, %v717_v49, %v721_v2  ;;  %v8915_v2 = vld [vmem:[#allocation2 + $0x20] ss:$8 sps:$4 sm:$0xff]   ;;  %v9675_v46 = vld [vmem:[#allocation2 + $0x34] sm:$0x1] }
  0x5d   : > { %8889 = vmatprep.subr.msk.bf16.mxu0 %vm770_vm0, %v9605_v51  ;;  %v731_v0 = vrot.slane %v730_v7, 4  ;;  %v1794_v10 = vshll.u32 %v1762_v37, 16  ;;  %v7507_v50 = vcombine.low %v1522_v40, %v1526_v8  ;;  %v7444_v12 = vcombine.low %v9524_v44, %v9526_v55  ;;  %v8921_v40 = vld [vmem:[%s11635_s1 + $0x40] sm:$0x1f]   ;;  %v8916_v22 = vld [vmem:[#allocation2 + $0x30] ss:$8 sps:$4 sm:$0xff]  }
  0x5e   : > { %8427 = vmatprep.mubr.msk.bf16.mxu1 %vm757_vm11, %v7437_v3  ;;  %v1783_v13 = vor.u32 %v1782_v53, %v1779_v18  ;;  %v1805_v20 = vshrl.u32 %v1764_v63, 16  ;;  %v1793_v17 = vrot.slane %v1791_v26, 4  ;;  %v1808_v24 = vshll.u32 %v1764_v63, 16  ;;  %v1772_v8 = vld [vmem:[#allocation2 + $0x40] sm:$0xf] }
  0x5f   : > { %v736_v60 = vsel %vm9430_vm15, %v731_v0, %v735_v57  ;;  %v1796_v9 = vrot.slane %v1794_v10, 5  ;;  %v9654_v15 = vrot.slane %v1786_v54, 5  ;;  %v1800_v41 = vshll.u32 %v9645_v4, 16  ;;  %v9684_v49 = vld [vmem:[#allocation2 + $0x3c] sm:$0x1] }
  0x60   : > { %v7438_v16 = vcombine.low %v722_v43, %v736_v60  ;;  %v1814_v44 = vshll.u32 %v9650_v14, 16  ;;  %v1819_v55 = vshrl.u32 %v1766_v19, 16  ;;  %v9662_v28 = vrot.slane %v1783_v13, 4  ;;  %v1774_v39 = vld [vmem:[#allocation2 + $0x48] sm:$0xf] }
  0x61   : > { %v1807_v58 = vrot.slane %v1805_v20, 4  ;;  %v1810_v31 = vrot.slane %v1808_v24, 5  ;;  %v1822_v30 = vshll.u32 %v1766_v19, 16  ;;  %v1921_v34 = vsel %vm770_vm0, %v9605_v51, 0  ;;  %v9687_v18 = vld [vmem:[#allocation2 + $0x44] sm:$0x1] }
  0x62   : > { %8428 = vmatmul.mubr.msk.bf16.gmra.mrb[4].mxu1 %vm757_vm11, %v7438_v16  ;;  %v7445_v59 = vcombine.low %v9534_v52, %v9551_v5  ;;  %v1797_v35 = vor.u32 %v1796_v9, %v1793_v17  ;;  %v7446_v21 = vcombine.low %v9567_v33, %v9569_v42  ;;  %v1821_v38 = vrot.slane %v1819_v55, 4 }
  0x63   : > { %8478 = vmatmul.mubr.msk.bf16.gmra.mrb[4].mxu0 %vm757_vm11, %v7507_v50  ;;  %8433 = vmatprep.mubr.msk.bf16.mxu1 %vm757_vm11, %v7444_v12  ;;  %v1824_v23 = vrot.slane %v1822_v30, 5  ;;  %v1833_v47 = vshrl.u32 %v1768_v27, 16  ;;  %v1836_v51 = vshll.u32 %v1768_v27, 16  ;;  %v1802_v29 = vrot.slane %v1800_v41, 5  ;;  %v9693_v50 = vld [vmem:[#allocation2 + $0x4c] sm:$0x1] }
  0x64   : > { %8483 = vmatprep.mubr.msk.bf16.mxu0 %vm757_vm11, %v8913_v61  ;;  %v9677_v37 = vrot.slane %v1814_v44, 5  ;;  %v1828_v52 = vshll.u32 %v9657_v25, 16  ;;  %v1847_v5 = vshrl.u32 %v1770_v32, 16  ;;  %v1789_v33 = vsel %vm9430_vm15, %v9662_v28, %v9654_v15  ;;  %v1996_v15 = vld [vmem:[#allocation2 + $0x10] sm:$0xe] }
  0x65   : > { %v1811_v42 = vor.u32 %v1810_v31, %v1807_v58  ;;  %v1835_v6 = vrot.slane %v1833_v47, 4  ;;  %v1838_v56 = vrot.slane %v1836_v51, 5  ;;  %v1798_v7 = vrot.slane %v1797_v35, 4  ;;  %v1997_v41 = vld [vmem:[#allocation2 + $0x18] sm:$0xe] }
  0x66   : > { %v1842_v57 = vshll.u32 %v9675_v46, 16  ;;  %v1849_v26 = vrot.slane %v1847_v5, 4  ;;  %v1850_v3 = vshll.u32 %v1770_v32, 16  ;;  %v1825_v53 = vor.u32 %v1824_v23, %v1821_v38  ;;  %v8917_v44 = vld [vmem:[#allocation2 + $0x40] ss:$8 sps:$4 sm:$0xff]  }
  0x67   : > { %v9690_v54 = vsel %vm770_vm0, %v8921_v40, 0  ;;  %v1839_v63 = vor.u32 %v1838_v56, %v1835_v6  ;;  %v1861_v43 = vshrl.u32 %v1772_v8, 16  ;;  %v1856_v10 = vshll.u32 %v9684_v49, 16  ;;  %v1998_v31 = vld [vmem:[#allocation2 + $0x20] sm:$0xe] }
  0x68   : > { %v1852_v0 = vrot.slane %v1850_v3, 5  ;;  %v1864_v12 = vshll.u32 %v1772_v8, 16  ;;  %v1875_v13 = vshrl.u32 %v1774_v39, 16  ;;  %v1812_v19 = vrot.slane %v1811_v42, 4  ;;  %v1999_v35 = vld [vmem:[#allocation2 + $0x28] sm:$0xe] }
  0x69   : > { %v1830_v20 = vrot.slane %v1828_v52, 5  ;;  %v1863_v61 = vrot.slane %v1861_v43, 4  ;;  %v1870_v60 = vshll.u32 %v9687_v18, 16  ;;  %v1803_v17 = vsel %vm9430_vm15, %v1798_v7, %v1802_v29  ;;  %v2001_v51 = vld [vmem:[#allocation2 + $0x38] sm:$0xe] }
  0x6a   : > { %8434 = vmatmul.mubr.msk.bf16.vlgmr.msra.gmra.mrb[0].mxu1 %vm757_vm11, %v7445_v59  ;;  %v1844_v9 = vrot.slane %v1842_v57, 5  ;;  %v1853_v24 = vor.u32 %v1852_v0, %v1849_v26  ;;  %v1866_v16 = vrot.slane %v1864_v12, 5  ;;  %v1826_v55 = vrot.slane %v1825_v53, 4  ;;  %v2002_v52 = vld [vmem:[#allocation2 + $0x40] sm:$0xe] }
  0x6b   : > { %8484 = vmatmul.mubr.msk.bf16.vlgmr.msra.gmra.mrb[0].mxu0 %vm757_vm11, %v8915_v2  ;;  %8437 = vmatprep.mubr.msk.bf16.mxu1 %vm757_vm11, %v7446_v21  ;;  %v1877_v27 = vrot.slane %v1875_v13, 4  ;;  %v1878_v28 = vshll.u32 %v1774_v39, 16  ;;  %v1884_v58 = vshll.u32 %v9693_v50, 16  ;;  %v7447_v30 = vcombine.low %v9577_v11, %v9587_v36  ;;  %v2003_v11 = vld [vmem:[#allocation2 + $0x48] sm:$0xe] }
  0x6c   : > { %8492 = vmatpush3.bf16.msra.mxu0 %v1921_v34  ;;  %8487 = vmatprep.mubr.msk.bf16.mxu0 %vm757_vm11, %v8916_v22  ;;  %v1840_v32 = vrot.slane %v1839_v63, 4  ;;  %v1858_v34 = vrot.slane %v1856_v10, 5  ;;  %v1867_v59 = vor.u32 %v1866_v16, %v1863_v61  ;;  %v1854_v2 = vrot.slane %v1853_v24, 4 }
  0x6d   : > { %8890 = vmatprep.subr.msk.bf16.mxu0 %vm770_vm0, %v8921_v40  ;;  %v1872_v38 = vrot.slane %v1870_v60, 5  ;;  %v1880_v23 = vrot.slane %v1878_v28, 5  ;;  %v7535_v47 = vrot.slane %v1996_v15, 9  ;;  %v2000_v40 = vld [vmem:[#allocation2 + $0x30] sm:$0xe]  ;;  %v7526_v22 = vcombine.low %v1789_v33, %v1803_v17  ;;  %v8927_v28 = vld [vmem:[%s11638_s4 + $0x68] sm:$0xff]  }
  0x6e   : > { %v1886_v21 = vrot.slane %v1884_v58, 5  ;;  %v2022_v29 = vrot.slane %v9619_v45, 5  ;;  %v7536_v8 = vrot.slane %v1997_v41, 9  ;;  %v2026_v42 = vrot.slane %v9645_v4, 5  ;;  %v8924_v41 = vld [vmem:[%s11638_s4 + $0x50] sm:$0xff]  }
  0x6f   : > { %v1881_v5 = vor.u32 %v1880_v23, %v1877_v27  ;;  %v1817_v36 = vsel %vm9430_vm15, %v1812_v19, %v9677_v37  ;;  %v1831_v6 = vsel %vm9430_vm15, %v1826_v55, %v1830_v20  ;;  %v1868_v56 = vrot.slane %v1867_v59, 4  ;;  %2642 = vmatpush1.bf16.msra.mxu1 %v8924_v41  ;;  %v8925_v55 = vld [vmem:[%s11638_s4 + $0x58] sm:$0xff]   ;;  %v8926_v27 = vld [vmem:[%s11638_s4 + $0x60] sm:$0xff]   ;;  %v8928_v58 = vld [vmem:[%s11638_s4 + $0x70] sm:$0xff]  }
  0x70   : > { %v7537_v39 = vrot.slane %v1998_v31, 9  ;;  %v2030_v33 = vrot.slane %v9650_v14, 5  ;;  %v7538_v7 = vrot.slane %v1999_v35, 9  ;;  %v2034_v4 = vrot.slane %v9657_v25, 5  ;;  %2643 = vmatprep.subr.bf16.mxu1 %v9160_v1  ;;  %v8929_v31 = vld [vmem:[%s11638_s4 + $0x78] sm:$0xff]  }
  0x71   : > { %v1882_v45 = vrot.slane %v1881_v5, 4  ;;  %v7539_v57 = vrot.slane %v2000_v40, 9  ;;  %v2038_v37 = vrot.slane %v9675_v46, 5  ;;  %v7540_v26 = vrot.slane %v2001_v51, 9  ;;  %v8933_v59 = vld [vmem:[%s11638_s4 + $0x98] sm:$0xff]  }
  0x72   : > { %8438 = vmatmul.mubr.msk.bf16.gmra.mrb[4].mxu1 %vm757_vm11, %v7447_v30  ;;  %v2042_v3 = vrot.slane %v9684_v49, 5  ;;  %v1845_v53 = vsel %vm9430_vm15, %v1840_v32, %v1844_v9  ;;  %v1859_v63 = vsel %vm9430_vm15, %v1854_v2, %v1858_v34  ;;  %v7541_v43 = vrot.slane %v2002_v52, 9  ;;  %v8930_v30 = vld [vmem:[%s11638_s4 + $0x80] sm:$0xff]   ;;  %v8931_v32 = vld [vmem:[%s11638_s4 + $0x88] sm:$0xff]   ;;  %v8932_v34 = vld [vmem:[%s11638_s4 + $0x90] sm:$0xff]  }
  0x73   : > { %8488 = vmatmul.mubr.msk.bf16.gmra.mrb[4].mxu0 %vm757_vm11, %v8917_v44  ;;  %v2046_v14 = vrot.slane %v9687_v18, 5  ;;  %v7542_v0 = vrot.slane %v2003_v11, 9  ;;  %v2050_v25 = vrot.slane %v9693_v50, 5  ;;  %v7527_v10 = vcombine.low %v1817_v36, %v1831_v6  ;;  %2644 = vmatpush1.bf16.msra.mxu1 %v8925_v55  ;;  %v9850_v52 = vld [vmem:[%s11636_s2] ss:$0 sm:$0xff] }
  0x74   : > { %8493 = vmatprep.mubr.msk.bf16.mxu0 %vm757_vm11, %v7526_v22  ;;  %v7528_v12 = vcombine.low %v1845_v53, %v1859_v63  ;;  %v1873_v46 = vsel %vm9430_vm15, %v1868_v56, %v1872_v38  ;;  %v1887_v49 = vsel %vm9430_vm15, %v1882_v45, %v1886_v21  ;;  %v2023_v18 = vsel %vm9337_vm12, %v7535_v47, %v2022_v29 }
  0x75   : > { %v2027_v50 = vsel %vm9337_vm12, %v7536_v8, %v2026_v42  ;;  %v7529_v13 = vcombine.low %v1873_v46, %v1887_v49  ;;  %v2035_v20 = vsel %vm9337_vm12, %v7538_v7, %v2034_v4  ;;  %v2039_v61 = vsel %vm9337_vm12, %v7539_v57, %v2038_v37  ;;  %2645 = vmatprep.subr.bf16.mxu1 %v9160_v1  ;;  %v9855_v42 = vld [vmem:[%s11637_s3] ss:$0 sm:$0xff] }
  0x76   : > { %v7545_v19 = vcombine.low %v2023_v18, %v2027_v50  ;;  %v2043_v60 = vsel %vm9337_vm12, %v7540_v26, %v2042_v3  ;;  %v2047_v24 = vsel %vm9337_vm12, %v7541_v43, %v2046_v14  ;;  %v2051_v16 = vsel %vm9337_vm12, %v7542_v0, %v2050_v25 }
  0x77   : > { %v7547_v9 = vcombine.low %v2039_v61, %v2043_v60  ;;  %v7548_v15 = vcombine.low %v2047_v24, %v2051_v16  ;;  %vm435_vm0 = vcmask 1043456   ;;  %vm436_vm2 = vcmask 261124   ;;  %2646 = vmatpush1.bf16.msra.mxu1 %v8926_v27 }
  0x78   : > { %vm440_vm3 = vcmask 258052   ;;  %vm437_vm6 = vmor %vm436_vm2, %vm435_vm0  ;;  %2647 = vmatprep.subr.bf16.mxu1 %v9160_v1  ;;  %vm9162_vm5 = vmmov 0  }
  0x79   : > { %vm9760_vm7 = vmor %vm440_vm3, %vm439_vm1  ;;  %447 = vst.msk [vmem:[#allocation3 + $0x30] sm:$0xff] %vm437_vm6, %v9160_v1 }
  0x7a   : > { %438 = vst.msk [vmem:[#allocation3] sm:$0xff] %vm437_vm6, %v9160_v1  ;;  %443 = vst.msk [vmem:[#allocation3 + $0x10] sm:$0xff] %vm437_vm6, %v9160_v1 }
  0x7b   : > { %8494 = vmatmul.mubr.msk.bf16.vlgmr.msra.gmra.mrb[0].mxu0 %vm757_vm11, %v7527_v10  ;;  %445 = vst.msk [vmem:[#allocation3 + $0x20] sm:$0xff] %vm437_vm6, %v9160_v1  ;;  %449 = vst.msk [vmem:[#allocation3 + $0x40] sm:$0xff] %vm437_vm6, %v9160_v1  ;;  %2648 = vmatpush1.bf16.msra.mxu1 %v8927_v28 }
  0x7c   : > { %8502 = vmatpush3.bf16.msra.mxu0 %v9690_v54  ;;  %8497 = vmatprep.mubr.msk.bf16.mxu0 %vm757_vm11, %v7528_v12  ;;  %v2031_v54 = vsel %vm9337_vm12, %v7537_v39, %v2030_v33  ;;  %451 = vst.msk [vmem:[#allocation3 + $0x50] sm:$0xff] %vm437_vm6, %v9160_v1  ;;  %453 = vst.msk [vmem:[#allocation3 + $0x60] sm:$0xff] %vm437_vm6, %v9160_v1 }
  0x7d   : > { %5334 = vmatprep.subr.bf16.mxu0 %v9160_v1  ;;  %v7546_v17 = vcombine.low %v2031_v54, %v2035_v20  ;;  %455 = vst.msk [vmem:[#allocation3 + $0x70] sm:$0xff] %vm437_vm6, %v9160_v1  ;;  %457 = vst.msk [vmem:[#allocation3 + $0x80] sm:$0xff] %vm437_vm6, %v9160_v1  ;;  %2649 = vmatprep.subr.bf16.mxu1 %v9160_v1 }
  0x7e   : > { %459 = vst.msk [vmem:[#allocation3 + $0x90] sm:$0xff] %vm437_vm6, %v9160_v1  ;;  %vm9896_vm8 = vmand %vm435_vm0, %vm551_vm4  ;;  %vm2628_vm4 = vcmask 261120  }
  0x7f   : > { %448 = vst.msk [vmem:[#allocation3 + $0x38] sm:$0x11] %vm9760_vm7, %v9160_v1  ;;  %442 = vst.msk [vmem:[#allocation3 + $0x8] sm:$0x11] %vm9760_vm7, %v9160_v1  ;;  %2650 = vmatpush1.bf16.msra.mxu1 %v8928_v58 }
  0x80   : > { %444 = vst.msk [vmem:[#allocation3 + $0x18] sm:$0x11] %vm9760_vm7, %v9160_v1  ;;  %446 = vst.msk [vmem:[#allocation3 + $0x28] sm:$0x11] %vm9760_vm7, %v9160_v1  ;;  %2651 = vmatprep.subr.bf16.mxu1 %v9160_v1  ;;  %v2335_v41 = vld [vmem:[#allocation3 + $0x30] sm:$0xf] }
  0x81   : > { %450 = vst.msk [vmem:[#allocation3 + $0x48] sm:$0x11] %vm9760_vm7, %v9160_v1  ;;  %452 = vst.msk [vmem:[#allocation3 + $0x58] sm:$0x11] %vm9760_vm7, %v9160_v1  ;;  %v9845_v21 = vld [vmem:[#allocation3] sm:$0xff] }
  0x82   : > { %454 = vst.msk [vmem:[#allocation3 + $0x68] sm:$0x11] %vm9760_vm7, %v9160_v1  ;;  %456 = vst.msk [vmem:[#allocation3 + $0x78] sm:$0x11] %vm9760_vm7, %v9160_v1  ;;  %v2408_v6 = vshrl.u32 %v9845_v21, 16  ;;  %v2411_v56 = vshll.u32 %v9845_v21, 16 }
  0x83   : > { %8498 = vmatmul.mubr.msk.bf16.gmra.mrb[4].mxu0 %vm757_vm11, %v7529_v13  ;;  %458 = vst.msk [vmem:[#allocation3 + $0x88] sm:$0x11] %vm9760_vm7, %v9160_v1  ;;  %460 = vst.msk [vmem:[#allocation3 + $0x98] sm:$0x11] %vm9760_vm7, %v9160_v1  ;;  %2652 = vmatpush1.bf16.msra.mxu1 %v8929_v31 }
  0x84   : > { %8503 = vmatprep.mubr.msk.bf16.mxu0 %vm757_vm11, %v7545_v19  ;;  %2653 = vmatprep.subr.bf16.mxu1 %v9160_v1  ;;  %v9865_v53 = vrot.slane %v2408_v6, 4  ;;  %v9867_v63 = vrot.slane %v2411_v56, 5 }
  0x86   : > { %v9875_v12 = vld [vmem:[#allocation3 + $0x8] sm:$0x11]  ;;  %v2414_v60 = vor.u32 %v9867_v63, %v9865_v53  ;;  %v2338_v44 = vld [vmem:[#allocation3 + $0x38] sm:$0x1] }
  0x87   : > { %2654 = vmatpush1.bf16.msra.mxu1 %v8930_v30  ;;  %v2417_v13 = vshll.u32 %v9875_v12, 16 }
  0x88   : > { %2655 = vmatprep.subr.bf16.mxu1 %v9160_v1 }
  0x8b   : > { %8504 = vmatmul.mubr.msk.bf16.vlgmr.msra.gmra.mrb[0].mxu0 %vm757_vm11, %v7546_v17  ;;  %2656 = vmatpush1.bf16.msra.mxu1 %v8931_v32  ;;  %v2321_v32 = vld [vmem:[#allocation3 + $0x10] sm:$0xf] }
  0x8c   : > { %8507 = vmatprep.mubr.msk.bf16.mxu0 %vm757_vm11, %v7547_v9  ;;  %2657 = vmatprep.subr.bf16.mxu1 %v9160_v1 }
  0x8f   : > { %2658 = vmatpush1.bf16.msra.mxu1 %v8932_v34 }
  0x90   : > { %2659 = vmatprep.subr.bf16.mxu1 %v9160_v1 }
  0x93   : > { %8508 = vmatmul.mubr.msk.bf16.gmra.mrb[4].mxu0 %vm757_vm11, %v7548_v15  ;;  %2660 = vmatpush1.bf16.msra.mxu1 %v8933_v59 }
  0x94   : > { %2814 = vmatprep.subr.bf16.mxu1 %v9160_v1 }
 0x13d   : > { %v8435_v35 = vpop.f32.mrb[0].mxu1 }
 0x13e   : > { %v913_v2 = vpop.f32.mrb[1].mxu1 }
 0x13f   : > { %v8436_v38 = vpop.f32.mrb[2].mxu1 }
 0x140   : > { %v916_v23 = vpop.f32.mrb[3].mxu1 }
 0x145   : > { %v8439_v47 = vpop.f32.mrb[4].mxu1 }
 0x146   : > { %v929_v40 = vpop.f32.mrb[5].mxu1 }
 0x147   : > { %v9841_v51 = vpop.f32.mrb[6].mxu1 }
 0x148   : > { %v9843_v22 = vpop.f32.mrb[7].mxu1 }
 0x15e   : > { %v8505_v29 = vpop.f32.mrb[0].mxu0 }
 0x15f   : > { %v8570_v5 = vadd.f32 %v8505_v29, %v8435_v35  ;;  %v2121_v8 = vpop.f32.mrb[1].mxu0 }
 0x160   : > { %v8571_v11 = vadd.f32 %v2121_v8, %v913_v2  ;;  %v8506_v36 = vpop.f32.mrb[2].mxu0 }
 0x161   : > { %v2169_v39 = vmul.f32 %v8570_v5, %v9850_v52  ;;  %v8572_v45 = vadd.f32 %v8506_v36, %v8436_v38  ;;  %v2124_v33 = vpop.f32.mrb[3].mxu0  ;;  %v2341_v36 = vld [vmem:[#allocation3 + $0x40] sm:$0xf] }
 0x162   : > { %v2167_v7 = vmul.f32 %v8571_v11, %v9850_v52  ;;  %v8573_v4 = vadd.f32 %v2124_v33, %v916_v23  ;;  %v2326_v23 = vld [vmem:[#allocation3 + $0x18] sm:$0x1] }
 0x163   : > { %v2184_v57 = vadd.f32 %v9855_v42, %v2169_v39  ;;  %v2170_v37 = vmul.f32 %v8572_v45, %v9850_v52  ;;  %v2344_v45 = vld [vmem:[#allocation3 + $0x48] sm:$0x1] }
 0x164   : > { %v2182_v26 = vadd.f32 %v9855_v42, %v2167_v7  ;;  %v2168_v3 = vmul.f32 %v8573_v4, %v9850_v52 }
 0x165   : > { %v9869_v43 = vmax.f32 %v2184_v57, 0.0  ;;  %v2185_v14 = vadd.f32 %v9855_v42, %v2170_v37 }
 0x166   : > { %v9872_v0 = vmax.f32 %v2182_v26, 0.0  ;;  %v2183_v25 = vadd.f32 %v9855_v42, %v2168_v3  ;;  %v8509_v10 = vpop.f32.mrb[4].mxu0  ;;  %v2329_v3 = vld [vmem:[#allocation3 + $0x20] sm:$0xf] }
 0x167   : > { %v8345_v46 = vpack.c.bf16 %v9869_v43, %v9869_v43  ;;  %v9879_v49 = vmax.f32 %v2185_v14, 0.0  ;;  %v8574_v18 = vadd.f32 %v8509_v10, %v8439_v47  ;;  %v2137_v50 = vpop.f32.mrb[5].mxu0  ;;  %v2332_v14 = vld [vmem:[#allocation3 + $0x28] sm:$0x1] }
 0x168   : > { %v8343_v19 = vpack.c.bf16 %v9872_v0, %v9872_v0  ;;  %v9884_v54 = vmax.f32 %v2183_v25, 0.0  ;;  %v8575_v20 = vadd.f32 %v2137_v50, %v929_v40  ;;  %v8510_v61 = vpop.f32.mrb[6].mxu0 }
 0x169   : > { %v2255_v17 = vshrl.u32 %v8345_v46, 16  ;;  %v2258_v9 = vshll.u32 %v8345_v46, 16  ;;  %v8346_v24 = vpack.c.bf16 %v9879_v49, %v9879_v49  ;;  %v2173_v16 = vmul.f32 %v8574_v18, %v9850_v52  ;;  %v2140_v15 = vpop.f32.mrb[7].mxu0 }
 0x16a   : > { %v2239_v55 = vshrl.u32 %v8343_v19, 16  ;;  %v2242_v27 = vshll.u32 %v8343_v19, 16  ;;  %v8344_v28 = vpack.c.bf16 %v9884_v54, %v9884_v54  ;;  %v2171_v58 = vmul.f32 %v8575_v20, %v9850_v52 }
 0x16b   : > { %v2257_v30 = vrot.slane %v2255_v17, 7  ;;  %v2263_v34 = vshrl.u32 %v8346_v24, 16  ;;  %v2266_v59 = vshll.u32 %v8346_v24, 16  ;;  %v2188_v35 = vadd.f32 %v9855_v42, %v2173_v16 }
 0x16c   : > { %v2241_v38 = vrot.slane %v2239_v55, 7  ;;  %v2247_v47 = vshrl.u32 %v8344_v28, 16  ;;  %v2250_v40 = vshll.u32 %v8344_v28, 16  ;;  %v2186_v29 = vadd.f32 %v9855_v42, %v2171_v58 }
 0x16d   : > { %v2260_v5 = vor.u32 %v2258_v9, %v2257_v30  ;;  %v2261_v8 = vrot.slane %v2257_v30, 4  ;;  %v2265_v11 = vrot.slane %v2263_v34, 7  ;;  %v9908_v6 = vmax.f32 %v2188_v35, 0.0  ;;  %v2350_v35 = vld [vmem:[#allocation3 + $0x58] sm:$0x1] }
 0x16e   : > { %v2244_v56 = vor.u32 %v2242_v27, %v2241_v38  ;;  %v2245_v39 = vrot.slane %v2241_v38, 4  ;;  %v2249_v33 = vrot.slane %v2247_v47, 7  ;;  %v9910_v7 = vmax.f32 %v2186_v29, 0.0 }
 0x16f   : > { %v2336_v4 = vsel %vm9896_vm8, %v2260_v5, %v2335_v41  ;;  %v2339_v57 = vsel %vm9903_vm9, %v2261_v8, %v2338_v44  ;;  %v2268_v37 = vor.u32 %v2266_v59, %v2265_v11  ;;  %v2269_v26 = vrot.slane %v2265_v11, 4  ;;  %v2347_v59 = vld [vmem:[#allocation3 + $0x50] sm:$0xf] }
 0x170   : > { %2337 = vst [vmem:[#allocation3 + $0x30] sm:$0xf] %v2336_v4  ;;  %2340 = vst [vmem:[#allocation3 + $0x38] sm:$0x1] %v2339_v57  ;;  %v2322_v25 = vsel %vm9896_vm8, %v2244_v56, %v2321_v32  ;;  %v2327_v10 = vsel %vm9903_vm9, %v2245_v39, %v2326_v23  ;;  %v2252_v46 = vor.u32 %v2250_v40, %v2249_v33  ;;  %v2253_v18 = vrot.slane %v2249_v33, 4 }
 0x171   : > { %2323 = vst [vmem:[#allocation3 + $0x10] sm:$0xf] %v2322_v25  ;;  %2328 = vst [vmem:[#allocation3 + $0x18] sm:$0x1] %v2327_v10  ;;  %v2342_v50 = vsel %vm9896_vm8, %v2268_v37, %v2341_v36  ;;  %v2345_v19 = vsel %vm9903_vm9, %v2269_v26, %v2344_v45  ;;  %v8349_v20 = vpack.c.bf16 %v9908_v6, %v9908_v6  ;;  %v2415_v58 = vrot.slane %v2414_v60, 4 }
 0x172   : > { %v8347_v17 = vpack.c.bf16 %v9910_v7, %v9910_v7  ;;  %2343 = vst [vmem:[#allocation3 + $0x40] sm:$0xf] %v2342_v50  ;;  %2346 = vst [vmem:[#allocation3 + $0x48] sm:$0x1] %v2345_v19  ;;  %v2330_v9 = vsel %vm9896_vm8, %v2252_v46, %v2329_v3  ;;  %v2333_v24 = vsel %vm9903_vm9, %v2253_v18, %v2332_v14  ;;  %v2419_v30 = vrot.slane %v2417_v13, 5 }
 0x173   : > { %v8576_v16 = vadd.f32 %v8510_v61, %v9841_v51  ;;  %v8577_v41 = vadd.f32 %v2140_v15, %v9843_v22  ;;  %2331 = vst [vmem:[#allocation3 + $0x20] sm:$0xf] %v2330_v9  ;;  %2334 = vst [vmem:[#allocation3 + $0x28] sm:$0x1] %v2333_v24  ;;  %v2287_v44 = vshrl.u32 %v8349_v20, 16  ;;  %v2290_v34 = vshll.u32 %v8349_v20, 16 }
 0x174   : > { %v2271_v55 = vshrl.u32 %v8347_v17, 16  ;;  %v2359_v51 = vld [vmem:[#allocation3 + $0x70] sm:$0xf]  ;;  %v2274_v22 = vshll.u32 %v8347_v17, 16  ;;  %v2362_v15 = vld [vmem:[#allocation3 + $0x78] sm:$0x1]  ;;  %v9953_v5 = vsel %vm9430_vm15, %v2415_v58, %v2419_v30 }
 0x175   : > { %v2174_v27 = vmul.f32 %v8576_v16, %v9850_v52  ;;  %v2172_v28 = vmul.f32 %v8577_v41, %v9850_v52  ;;  %v2289_v32 = vrot.slane %v2287_v44, 7  ;;  %v2365_v20 = vld [vmem:[#allocation3 + $0x80] sm:$0xf]  ;;  %v2368_v17 = vld [vmem:[#allocation3 + $0x88] sm:$0x1] }
 0x176   : > { %v2273_v61 = vrot.slane %v2271_v55, 7  ;;  %v2356_v30 = vld [vmem:[#allocation3 + $0x68] sm:$0x1] }
 0x177   : > { %v2189_v38 = vadd.f32 %v9855_v42, %v2174_v27  ;;  %v2187_v23 = vadd.f32 %v9855_v42, %v2172_v28  ;;  %v2292_v52 = vor.u32 %v2290_v34, %v2289_v32  ;;  %v2293_v47 = vrot.slane %v2289_v32, 4  ;;  %v9955_v8 = vld [vmem:[#allocation3 + $0x30] sm:$0xff]  ;;  %v9979_v50 = vld [vmem:[#allocation3 + $0x38] sm:$0x11]  ;;  %v2353_v27 = vld [vmem:[#allocation3 + $0x60] sm:$0xf] }
 0x178   : > { %v2276_v40 = vor.u32 %v2274_v22, %v2273_v61  ;;  %v2277_v53 = vrot.slane %v2273_v61, 4  ;;  %v9947_v13 = vld [vmem:[#allocation3 + $0x10] sm:$0xff]  ;;  %v9949_v29 = vld [vmem:[#allocation3 + $0x18] sm:$0x11]  ;;  %v2450_v25 = vshrl.u32 %v9955_v8, 16  ;;  %v2459_v61 = vshll.u32 %v9979_v50, 16 }
 0x179   : > { %v9943_v63 = vmax.f32 %v2189_v38, 0.0  ;;  %v9945_v60 = vmax.f32 %v2187_v23, 0.0  ;;  %v2360_v42 = vsel %vm9896_vm8, %v2292_v52, %v2359_v51  ;;  %v2363_v11 = vsel %vm9903_vm9, %v2293_v47, %v2362_v15  ;;  %v9984_v38 = vld [vmem:[#allocation3 + $0x40] sm:$0xff] }
 0x17a   : > { %v2348_v36 = vsel %vm9896_vm8, %v2276_v40, %v2347_v59  ;;  %v2351_v56 = vsel %vm9903_vm9, %v2277_v53, %v2350_v35  ;;  %2361 = vst [vmem:[#allocation3 + $0x70] sm:$0xf] %v2360_v42  ;;  %2364 = vst [vmem:[#allocation3 + $0x78] sm:$0x1] %v2363_v11  ;;  %v2422_v33 = vshrl.u32 %v9947_v13, 16  ;;  %v2425_v4 = vshll.u32 %v9947_v13, 16 }
 0x17b   : > { %2349 = vst [vmem:[#allocation3 + $0x50] sm:$0xf] %v2348_v36  ;;  %2352 = vst [vmem:[#allocation3 + $0x58] sm:$0x1] %v2351_v56  ;;  %v8350_v39 = vpack.c.bf16 %v9943_v63, %v9943_v63  ;;  %v8348_v45 = vpack.c.bf16 %v9945_v60, %v9945_v60  ;;  %v9971_v57 = vld [vmem:[#allocation3 + $0x20] sm:$0xff]  ;;  %v2431_v26 = vshll.u32 %v9949_v29, 16 }
 0x17c   : > { %v9973_v37 = vld [vmem:[#allocation3 + $0x28] sm:$0x11]  ;;  %v2436_v3 = vshrl.u32 %v9971_v57, 16  ;;  %v2439_v14 = vshll.u32 %v9971_v57, 16  ;;  %v2424_v24 = vrot.slane %v2422_v33, 4  ;;  %v2427_v16 = vrot.slane %v2425_v4, 5 }
 0x17d   : > { %v2295_v10 = vshrl.u32 %v8350_v39, 16  ;;  %v2298_v46 = vshll.u32 %v8350_v39, 16  ;;  %v2279_v18 = vshrl.u32 %v8348_v45, 16  ;;  %v2445_v19 = vshll.u32 %v9973_v37, 16  ;;  %v10003_v4 = vld [vmem:[#allocation3 + $0x48] sm:$0x11] }
 0x17e   : > { %v2282_v9 = vshll.u32 %v8348_v45, 16  ;;  %v2438_v41 = vrot.slane %v2436_v3, 4  ;;  %v2433_v28 = vrot.slane %v2431_v26, 5  ;;  %v2441_v58 = vrot.slane %v2439_v14, 5 }
 0x17f   : > { %v2297_v44 = vrot.slane %v2295_v10, 7  ;;  %v2281_v55 = vrot.slane %v2279_v18, 7  ;;  %v2428_v32 = vor.u32 %v2427_v16, %v2424_v24  ;;  %v2452_v34 = vrot.slane %v2450_v25, 4  ;;  %v8934_v25 = vld [vmem:[%s11638_s4] sm:$0xff]  }
 0x180   : > { %v2453_v51 = vshll.u32 %v9955_v8, 16  ;;  %v2442_v52 = vor.u32 %v2441_v58, %v2438_v41  ;;  %v2447_v47 = vrot.slane %v2445_v19, 5  ;;  %v2464_v26 = vshrl.u32 %v9984_v38, 16 }
 0x181   : > { %v2300_v22 = vor.u32 %v2298_v46, %v2297_v44  ;;  %v2301_v15 = vrot.slane %v2297_v44, 4  ;;  %v2284_v59 = vor.u32 %v2282_v9, %v2281_v55  ;;  %v2285_v35 = vrot.slane %v2281_v55, 4  ;;  %v10012_v18 = vld [vmem:[#allocation3 + $0x70] sm:$0xff] }
 0x182   : > { %v9986_v23 = vrot.slane %v2428_v32, 4  ;;  %v2455_v40 = vrot.slane %v2453_v51, 5  ;;  %v9996_v56 = vld [vmem:[#allocation3 + $0x50] sm:$0xff]  ;;  %v10001_v45 = vrot.slane %v2442_v52, 4  ;;  %v2461_v10 = vrot.slane %v2459_v61, 5 }
 0x183   : > { %v2366_v53 = vsel %vm9896_vm8, %v2300_v22, %v2365_v20  ;;  %v2369_v42 = vsel %vm9903_vm9, %v2301_v15, %v2368_v17  ;;  %v2354_v11 = vsel %vm9896_vm8, %v2284_v59, %v2353_v27  ;;  %v2357_v36 = vsel %vm9903_vm9, %v2285_v35, %v2356_v30  ;;  %v10019_v17 = vld [vmem:[#allocation3 + $0x58] sm:$0x11] }
 0x184   : > { %2367 = vst [vmem:[#allocation3 + $0x80] sm:$0xf] %v2366_v53  ;;  %2370 = vst [vmem:[#allocation3 + $0x88] sm:$0x1] %v2369_v42  ;;  %v2434_v39 = vsel %vm9430_vm15, %v9986_v23, %v2433_v28  ;;  %v2456_v33 = vor.u32 %v2455_v40, %v2452_v34  ;;  %v2467_v46 = vshll.u32 %v9984_v38, 16  ;;  %v2448_v19 = vsel %vm9430_vm15, %v10001_v45, %v2447_v47  ;;  %v8935_v30 = vld [vmem:[%s11638_s4 + $0x8] sm:$0xff]  }
 0x185   : > { %2355 = vst [vmem:[#allocation3 + $0x60] sm:$0xf] %v2354_v11  ;;  %2358 = vst [vmem:[#allocation3 + $0x68] sm:$0x1] %v2357_v36  ;;  %v7584_v3 = vcombine.low %v9953_v5, %v2434_v39  ;;  %v7585_v14 = vcombine.high %v9953_v5, %v2434_v39  ;;  %v2466_v9 = vrot.slane %v2464_v26, 4  ;;  %v2478_v5 = vshrl.u32 %v9996_v56, 16 }
 0x186   : > { %v10017_v20 = vrot.slane %v2456_v33, 4  ;;  %v2469_v24 = vrot.slane %v2467_v46, 5  ;;  %v2473_v16 = vshll.u32 %v10003_v4, 16  ;;  %v2481_v41 = vshll.u32 %v9996_v56, 16  ;;  %v8936_v42 = vld [vmem:[%s11638_s4 + $0x10] sm:$0xff]  }
 0x187   : > { %7602 = vmatprep.mubr.msk.bf16.mxu1 %vm2628_vm4, %v7585_v14  ;;  %v2480_v55 = vrot.slane %v2478_v5, 4  ;;  %v2506_v27 = vshrl.u32 %v10012_v18, 16  ;;  %v2509_v28 = vshll.u32 %v10012_v18, 16  ;;  %v2487_v51 = vshll.u32 %v10019_v17, 16  ;;  %v10049_v33 = vld [vmem:[#allocation3 + $0x78] sm:$0x11] }
 0x188   : > { %2674 = vmatmul.mubr.bf16.vlgmr.msra.gmra.mrb[8].mxu1 %v7584_v3  ;;  %v2462_v44 = vsel %vm9430_vm15, %v10017_v20, %v2461_v10  ;;  %v2470_v32 = vor.u32 %v2469_v24, %v2466_v9  ;;  %v2483_v34 = vrot.slane %v2481_v41, 5  ;;  %v2475_v11 = vrot.slane %v2473_v16, 5  ;;  %v8937_v24 = vld [vmem:[%s11638_s4 + $0x18] sm:$0xff]  }
 0x189   : > { %2815 = vmatpush1.bf16.msra.mxu1 %v8934_v25  ;;  %v7587_v58 = vcombine.high %v2448_v19, %v2462_v44  ;;  %v2508_v61 = vrot.slane %v2506_v27, 4  ;;  %v2511_v22 = vrot.slane %v2509_v28, 5  ;;  %v7586_v53 = vcombine.low %v2448_v19, %v2462_v44  ;;  %v8938_v28 = vld [vmem:[%s11638_s4 + $0x20] sm:$0xff]  }
 0x18a   : > { %2816 = vmatprep.subr.bf16.mxu1 %v9160_v1  ;;  %v10036_v15 = vrot.slane %v2470_v32, 4  ;;  %v2484_v59 = vor.u32 %v2483_v34, %v2480_v55  ;;  %v2489_v39 = vrot.slane %v2487_v51, 5  ;;  %v2515_v5 = vshll.u32 %v10049_v33, 16  ;;  %v10076_v32 = vld [vmem:[#allocation3 + $0x18] sm:$0x11] }
 0x18b   : > { %7603 = vmatprep.mubr.msk.bf16.mxu1 %vm2628_vm4, %v7587_v58  ;;  %v2512_v25 = vor.u32 %v2511_v22, %v2508_v61  ;;  %v10078_v51 = vld [vmem:[#allocation3 + $0x28] sm:$0x11]  ;;  %v8939_v61 = vld [vmem:[%s11638_s4 + $0x28] sm:$0xff]   ;;  %v3365_v22 = vshll.u32 %v10076_v32, 16 }
 0x18c   : > { %v10038_v35 = vld [vmem:[#allocation3 + $0x60] sm:$0xff]  ;;  %v10040_v52 = vld [vmem:[#allocation3 + $0x68] sm:$0x11]  ;;  %v10047_v36 = vrot.slane %v2484_v59, 4  ;;  %v2476_v10 = vsel %vm9430_vm15, %v10036_v15, %v2475_v11  ;;  %v2517_v27 = vrot.slane %v2515_v5, 5  ;;  %v7607_v5 = vcombine.high %v9845_v21, %v9947_v13 }
 0x18d   : > { %v2492_v47 = vshrl.u32 %v10038_v35, 16  ;;  %v2495_v40 = vshll.u32 %v10038_v35, 16  ;;  %2817 = vmatpush1.bf16.msra.mxu1 %v8935_v30  ;;  %v2501_v14 = vshll.u32 %v10040_v52, 16  ;;  %v10065_v44 = vrot.slane %v2512_v25, 4  ;;  %v10085_v59 = vld [vmem:[#allocation3 + $0x38] sm:$0x11] }
 0x18e   : > { %2818 = vmatprep.subr.bf16.mxu1 %v9160_v1  ;;  %v2490_v46 = vsel %vm9430_vm15, %v10047_v36, %v2489_v39  ;;  %v3393_v11 = vshll.u32 %v10085_v59, 16 }
 0x18f   : > { %v2494_v26 = vrot.slane %v2492_v47, 4  ;;  %v2497_v3 = vrot.slane %v2495_v40, 5  ;;  %v7589_v19 = vcombine.high %v2476_v10, %v2490_v46  ;;  %v2503_v41 = vrot.slane %v2501_v14, 5  ;;  %v10087_v47 = vld [vmem:[#allocation3 + $0x48] sm:$0x11] }
 0x190   : > { %2682 = vmatmul.mubr.bf16.gmra.mrb[12].mxu1 %v7586_v53  ;;  %v7588_v58 = vcombine.low %v2476_v10, %v2490_v46  ;;  %v2518_v30 = vsel %vm9430_vm15, %v10065_v44, %v2517_v27  ;;  %v10090_v40 = vld [vmem:[#allocation3 + $0x58] sm:$0x11]  ;;  %v10092_v53 = vld [vmem:[#allocation3 + $0x68] sm:$0x11]  ;;  %v3407_v39 = vshll.u32 %v10087_v47, 16 }
 0x191   : > { %v2498_v9 = vor.u32 %v2497_v3, %v2494_v26  ;;  %2819 = vmatpush1.bf16.msra.mxu1 %v8936_v42  ;;  %7604 = vmatprep.mubr.msk.bf16.mxu1 %vm2628_vm4, %v7589_v19  ;;  %v3379_v42 = vshll.u32 %v10078_v51, 16  ;;  %v8940_v26 = vld [vmem:[%s11638_s4 + $0x30] sm:$0xff]   ;;  %v3367_v3 = vrot.slane %v3365_v22, 5  ;;  %v3421_v14 = vshll.u32 %v10090_v40, 16 }
 0x192   : > { %2820 = vmatprep.subr.bf16.mxu1 %v9160_v1  ;;  %v3435_v25 = vshll.u32 %v10092_v53, 16  ;;  %v3395_v19 = vrot.slane %v3393_v11, 5  ;;  %v8943_v11 = vld [vmem:[%s11638_s4 + $0x40] sm:$0xff]  }
 0x193   : > { %v2499_v16 = vrot.slane %v2498_v9, 4  ;;  %v3381_v46 = vrot.slane %v3379_v42, 5  ;;  %v3409_v9 = vrot.slane %v3407_v39, 5  ;;  %v7606_v39 = vcombine.low %v9845_v21, %v9947_v13  ;;  %v8951_v21 = vld [vmem:[%s11638_s4 + $0xb0] sm:$0xff]  }
 0x195   : > { %v2504_v55 = vsel %vm9430_vm15, %v2499_v16, %v2503_v41  ;;  %2821 = vmatpush1.bf16.msra.mxu1 %v8937_v24  ;;  %v10108_v24 = vsel %vm9430_vm15, %v9986_v23, %v3367_v3  ;;  %v3423_v41 = vrot.slane %v3421_v14, 5  ;;  %v10113_v27 = vsel %vm9430_vm15, %v10001_v45, %v3381_v46  ;;  %v8942_v23 = vld [vmem:[%s11638_s4 + $0x38] sm:$0xff]   ;;  %v8948_v3 = vld [vmem:[%s11638_s4 + $0xa8] sm:$0xff]   ;;  %v8955_v46 = vld [vmem:[%s11638_s4 + $0xc0] sm:$0xff]  }
 0x196   : > { %2822 = vmatprep.subr.bf16.mxu1 %v9160_v1  ;;  %v7591_v34 = vcombine.high %v2504_v55, %v2518_v30  ;;  %v7590_v10 = vcombine.low %v2504_v55, %v2518_v30  ;;  %v10118_v55 = vsel %vm9430_vm15, %v10017_v20, %v3395_v19  ;;  %v7740_v45 = vcombine.low %v10108_v24, %v10113_v27  ;;  %v2879_v19 = vld [vmem:[#allocation3] sm:$0xee] }
 0x197   : > { %v7741_v20 = vcombine.high %v10108_v24, %v10113_v27  ;;  %v7608_v14 = vcombine.low %v9971_v57, %v9955_v8  ;;  %v8992_v24 = vld [vmem:[%s11638_s4 + $0x1a0] sm:$0xff]   ;;  %v10372_v27 = vld [vmem:[#allocation3 + $0x78] sm:$0x11] }
 0x198   : > { %2690 = vmatmul.mubr.bf16.gmra.mrb[16].mxu1 %v7588_v58  ;;  %v3437_v58 = vrot.slane %v3435_v25, 5  ;;  %v7611_v25 = vcombine.high %v9984_v38, %v9996_v56 }
 0x199   : > { %2823 = vmatpush1.bf16.msra.mxu1 %v8938_v28  ;;  %7605 = vmatprep.mubr.msk.bf16.mxu1 %vm2628_vm4, %v7591_v34  ;;  %v10123_v28 = vsel %vm9430_vm15, %v10036_v15, %v3409_v9  ;;  %v10141_v34 = vsel %vm9430_vm15, %v10047_v36, %v3423_v41  ;;  %v8944_v36 = vld [vmem:[%s11638_s4 + $0x48] sm:$0xff]   ;;  %v2880_v9 = vld [vmem:[#allocation3 + $0x10] sm:$0xee]  ;;  %v7613_v41 = vcombine.high %v10038_v35, %v10012_v18 }
 0x19a   : > { %2824 = vmatprep.subr.bf16.mxu1 %v9160_v1  ;;  %v7743_v30 = vcombine.high %v10118_v55, %v10123_v28  ;;  %v7742_v15 = vcombine.low %v10118_v55, %v10123_v28  ;;  %v8994_v28 = vld [vmem:[%s11638_s4 + $0x1b0] sm:$0xff]  }
 0x19d   : > { %2825 = vmatpush1.bf16.msra.mxu1 %v8939_v61  ;;  %v10145_v61 = vsel %vm9430_vm15, %v2499_v16, %v3437_v58  ;;  %v8947_v16 = vld [vmem:[%s11638_s4 + $0xa0] sm:$0xff]   ;;  %v7628_v58 = vrot.slane %v2879_v19, 9  ;;  %v2913_v19 = vrot.slane %v9973_v37, 5 }
 0x19e   : > { %2826 = vmatprep.subr.bf16.mxu1 %v9160_v1  ;;  %v7745_v22 = vcombine.high %v10141_v34, %v10145_v61  ;;  %v7744_v42 = vcombine.low %v10141_v34, %v10145_v61 }
 0x1a0   : > { %2698 = vmatmul.mubr.bf16.gmra.mrb[20].mxu1 %v7590_v10  ;;  %v8952_v10 = vld [vmem:[%s11638_s4 + $0xb8] sm:$0xff]  }
 0x1a1   : > { %2827 = vmatpush1.bf16.msra.mxu1 %v8940_v26  ;;  %7624 = vmatprep.mubr.msk.bf16.mxu1 %vm2628_vm4, %v7607_v5  ;;  %v7609_v26 = vcombine.high %v9971_v57, %v9955_v8  ;;  %v7610_v5 = vcombine.low %v9984_v38, %v9996_v56 }
 0x1a2   : > { %2828 = vmatprep.subr.bf16.mxu1 %v9160_v1 }
 0x1a5   : > { %2829 = vmatpush1.bf16.msra.mxu1 %v8942_v23  ;;  %v2905_v23 = vrot.slane %v9875_v12, 5  ;;  %v8958_v12 = vld [vmem:[%s11638_s4 + $0xd0] sm:$0xff]  }
 0x1a6   : > { %2830 = vmatprep.subr.bf16.mxu1 %v9160_v1 }
 0x1a9   : > { %2831 = vmatpush1.bf16.msra.mxu1 %v8943_v11  ;;  %v7629_v11 = vrot.slane %v2880_v9, 9  ;;  %v8961_v9 = vld [vmem:[%s11638_s4 + $0xe8] sm:$0xff]  }
 0x1aa   : > { %2832 = vmatprep.subr.bf16.mxu1 %v9160_v1 }
 0x1ad   : > { %2833 = vmatpush1.bf16.msra.mxu1 %v8944_v36  ;;  %v2909_v36 = vrot.slane %v9949_v29, 5  ;;  %v7612_v29 = vcombine.low %v10038_v35, %v10012_v18 }
 0x1ae   : > { %3056 = vmatprep.subr.bf16.mxu1 %v9160_v1 }
 0x1b0   : > { %2847 = vmatmul.mubr.bf16.vlgmr.msra.gmra.mrb[8].mxu1 %v7606_v39  ;;  %v2906_v39 = vsel %vm9337_vm12, %v7628_v58, %v2905_v23  ;;  %v8962_v23 = vld [vmem:[%s11638_s4 + $0xf0] sm:$0xff]  }
 0x1b1   : > { %7625 = vmatprep.mubr.msk.bf16.mxu1 %vm2628_vm4, %v7609_v26  ;;  %3057 = vmatpush1.bf16.msra.mxu1 %v8947_v16  ;;  %v8956_v16 = vld [vmem:[%s11638_s4 + $0xc8] sm:$0xff]   ;;  %v2910_v26 = vsel %vm9337_vm12, %v7629_v11, %v2909_v36  ;;  %v2884_v11 = vld [vmem:[#allocation3 + $0x50] sm:$0xee] }
 0x1b2   : > { %3058 = vmatprep.subr.bf16.mxu1 %v9160_v1  ;;  %v7656_v37 = vcombine.low %v2906_v39, %v2910_v26 }
 0x1b5   : > { %3059 = vmatpush1.bf16.msra.mxu1 %v8948_v3  ;;  %v7657_v3 = vcombine.high %v2906_v39, %v2910_v26  ;;  %v2921_v26 = vrot.slane %v10003_v4, 5  ;;  %v2929_v4 = vrot.slane %v10040_v52, 5  ;;  %v8966_v52 = vld [vmem:[%s11638_s4 + $0x110] sm:$0xff]  }
 0x1b6   : > { %3060 = vmatprep.subr.bf16.mxu1 %v9160_v1 }
 0x1b8   : > { %2855 = vmatmul.mubr.bf16.gmra.mrb[12].mxu1 %v7608_v14  ;;  %v8960_v14 = vld [vmem:[%s11638_s4 + $0xe0] sm:$0xff]  }
 0x1b9   : > { %7626 = vmatprep.mubr.msk.bf16.mxu1 %vm2628_vm4, %v7611_v25  ;;  %3061 = vmatpush1.bf16.msra.mxu1 %v8951_v21  ;;  %v8959_v21 = vld [vmem:[%s11638_s4 + $0xd8] sm:$0xff]   ;;  %v2881_v25 = vld [vmem:[#allocation3 + $0x20] sm:$0xee] }
 0x1ba   : > { %3062 = vmatprep.subr.bf16.mxu1 %v9160_v1 }
 0x1bd   : > { %3063 = vmatpush1.bf16.msra.mxu1 %v8952_v10  ;;  %v2882_v10 = vld [vmem:[#allocation3 + $0x30] sm:$0xee] }
 0x1be   : > { %3064 = vmatprep.subr.bf16.mxu1 %v9160_v1 }
 0x1c0   : > { %2863 = vmatmul.mubr.bf16.gmra.mrb[16].mxu1 %v7610_v5  ;;  %v7631_v5 = vrot.slane %v2882_v10, 9 }
 0x1c1   : > { %7627 = vmatprep.mubr.msk.bf16.mxu1 %vm2628_vm4, %v7613_v41  ;;  %3065 = vmatpush1.bf16.msra.mxu1 %v8955_v46  ;;  %v7630_v46 = vrot.slane %v2881_v25, 9  ;;  %v2917_v41 = vrot.slane %v9979_v50, 5  ;;  %v2925_v50 = vrot.slane %v10019_v17, 5  ;;  %v8964_v17 = vld [vmem:[%s11638_s4 + $0x100] sm:$0xff]  }
 0x1c2   : > { %3066 = vmatprep.subr.bf16.mxu1 %v9160_v1 }
 0x1c3   : > { %v2914_v58 = vsel %vm9337_vm12, %v7630_v46, %v2913_v19  ;;  %v2918_v36 = vsel %vm9337_vm12, %v7631_v5, %v2917_v41  ;;  %v2886_v19 = vld [vmem:[#allocation3 + $0x70] sm:$0xee]  ;;  %v8965_v5 = vld [vmem:[%s11638_s4 + $0x108] sm:$0xff]  }
 0x1c4   : > { %v7658_v25 = vcombine.low %v2914_v58, %v2918_v36  ;;  %v7635_v41 = vrot.slane %v2886_v19, 9 }
 0x1c5   : > { %3067 = vmatpush1.bf16.msra.mxu1 %v8956_v16  ;;  %v7659_v16 = vcombine.high %v2914_v58, %v2918_v36  ;;  %v2933_v58 = vrot.slane %v10049_v33, 5  ;;  %v8967_v33 = vld [vmem:[%s11638_s4 + $0x118] sm:$0xff]  }
 0x1c6   : > { %3068 = vmatprep.subr.bf16.mxu1 %v9160_v1 }
 0x1c8   : > { %2871 = vmatmul.mubr.bf16.gmra.mrb[20].mxu1 %v7612_v29  ;;  %v7633_v29 = vrot.slane %v2884_v11, 9 }
 0x1c9   : > { %3069 = vmatpush1.bf16.msra.mxu1 %v8958_v12  ;;  %7674 = vmatprep.mubr.msk.bf16.mxu1 %vm2628_vm4, %v7657_v3  ;;  %v2883_v12 = vld [vmem:[#allocation3 + $0x40] sm:$0xee]  ;;  %v8963_v3 = vld [vmem:[%s11638_s4 + $0xf8] sm:$0xff]  }
 0x1ca   : > { %3070 = vmatprep.subr.bf16.mxu1 %v9160_v1  ;;  %v7632_v39 = vrot.slane %v2883_v12, 9 }
 0x1cc   : > { %v2922_v10 = vsel %vm9337_vm12, %v7632_v39, %v2921_v26  ;;  %v8972_v39 = vld [vmem:[%s11638_s4 + $0x138] sm:$0xff]   ;;  %v8975_v26 = vld [vmem:[%s11638_s4 + $0x140] sm:$0xff]  }
 0x1cd   : > { %3071 = vmatpush1.bf16.msra.mxu1 %v8959_v21  ;;  %v2926_v21 = vsel %vm9337_vm12, %v7633_v29, %v2925_v50  ;;  %v7699_v29 = vcombine.high %v9947_v13, %v9971_v57  ;;  %v8970_v50 = vld [vmem:[%s11638_s4 + $0x128] sm:$0xff]  }
 0x1ce   : > { %3072 = vmatprep.subr.bf16.mxu1 %v9160_v1  ;;  %v7661_v46 = vcombine.high %v2922_v10, %v2926_v21  ;;  %v7660_v11 = vcombine.low %v2922_v10, %v2926_v21  ;;  %v7698_v21 = vcombine.low %v9947_v13, %v9971_v57  ;;  %v8979_v13 = vld [vmem:[%s11638_s4 + $0x150] sm:$0xff]   ;;  %v7700_v57 = vcombine.low %v9955_v8, %v9984_v38  ;;  %v8980_v10 = vld [vmem:[%s11638_s4 + $0x158] sm:$0xff]  }
 0x1d1   : > { %3073 = vmatpush1.bf16.msra.mxu1 %v8960_v14  ;;  %v2885_v14 = vld [vmem:[#allocation3 + $0x60] sm:$0xee] }
 0x1d2   : > { %3074 = vmatprep.subr.bf16.mxu1 %v9160_v1 }
 0x1d5   : > { %3075 = vmatpush1.bf16.msra.mxu1 %v8961_v9  ;;  %v7634_v9 = vrot.slane %v2885_v14, 9  ;;  %v8976_v14 = vld [vmem:[%s11638_s4 + $0x148] sm:$0xff]  }
 0x1d6   : > { %3266 = vmatprep.subr.bf16.mxu1 %v9160_v1 }
 0x1d8   : > { %3089 = vmatmul.mubr.bf16.vlgmr.msra.gmra.mrb[8].mxu1 %v7656_v37  ;;  %v2934_v37 = vsel %vm9337_vm12, %v7635_v41, %v2933_v58  ;;  %v8990_v58 = vld [vmem:[%s11638_s4 + $0x190] sm:$0xff]  }
 0x1d9   : > { %7675 = vmatprep.mubr.msk.bf16.mxu1 %vm2628_vm4, %v7659_v16  ;;  %3267 = vmatpush1.bf16.msra.mxu1 %v8962_v23  ;;  %v2930_v23 = vsel %vm9337_vm12, %v7634_v9, %v2929_v4  ;;  %v8968_v16 = vld [vmem:[%s11638_s4 + $0x120] sm:$0xff]   ;;  %v8984_v9 = vld [vmem:[%s11638_s4 + $0x168] sm:$0xff]   ;;  %v8987_v4 = vld [vmem:[%s11638_s4 + $0x178] sm:$0xff]  }
 0x1da   : > { %3268 = vmatprep.subr.bf16.mxu1 %v9160_v1  ;;  %v7663_v36 = vcombine.high %v2930_v23, %v2934_v37  ;;  %v7662_v12 = vcombine.low %v2930_v23, %v2934_v37  ;;  %v10367_v37 = vld [vmem:[#allocation3 + $0x88] sm:$0x11] }
 0x1dd   : > { %3269 = vmatpush1.bf16.msra.mxu1 %v8963_v3  ;;  %v8971_v3 = vld [vmem:[%s11638_s4 + $0x130] sm:$0xff]  }
 0x1de   : > { %3270 = vmatprep.subr.bf16.mxu1 %v9160_v1 }
 0x1e0   : > { %3097 = vmatmul.mubr.bf16.gmra.mrb[12].mxu1 %v7658_v25  ;;  %v7703_v25 = vcombine.high %v9996_v56, %v10038_v35 }
 0x1e1   : > { %7676 = vmatprep.mubr.msk.bf16.mxu1 %vm2628_vm4, %v7661_v46  ;;  %3271 = vmatpush1.bf16.msra.mxu1 %v8964_v17  ;;  %v7701_v17 = vcombine.high %v9955_v8, %v9984_v38  ;;  %v10313_v46 = vld [vmem:[#allocation3 + $0x80] sm:$0xff]  ;;  %v8983_v8 = vld [vmem:[%s11638_s4 + $0x160] sm:$0xff]   ;;  %v7702_v38 = vcombine.low %v9996_v56, %v10038_v35 }
 0x1e2   : > { %3272 = vmatprep.subr.bf16.mxu1 %v9160_v1  ;;  %v7705_v19 = vcombine.high %v10012_v18, %v10313_v46  ;;  %v8986_v56 = vld [vmem:[%s11638_s4 + $0x170] sm:$0xff]   ;;  %v7704_v35 = vcombine.low %v10012_v18, %v10313_v46  ;;  %v8988_v18 = vld [vmem:[%s11638_s4 + $0x180] sm:$0xff]   ;;  %v3457_v41 = vshll.u32 %v10313_v46, 16 }
 0x1e5   : > { %3273 = vmatpush1.bf16.msra.mxu1 %v8965_v5  ;;  %v8989_v5 = vld [vmem:[%s11638_s4 + $0x188] sm:$0xff]  }
 0x1e6   : > { %3274 = vmatprep.subr.bf16.mxu1 %v9160_v1 }
 0x1e8   : > { %3105 = vmatmul.mubr.bf16.gmra.mrb[16].mxu1 %v7660_v11  ;;  %v8991_v11 = vld [vmem:[%s11638_s4 + $0x198] sm:$0xff]  }
 0x1e9   : > { %7677 = vmatprep.mubr.msk.bf16.mxu1 %vm2628_vm4, %v7663_v36  ;;  %3275 = vmatpush1.bf16.msra.mxu1 %v8966_v52  ;;  %v3459_v52 = vrot.slane %v3457_v41, 5 }
 0x1ea   : > { %3276 = vmatprep.subr.bf16.mxu1 %v9160_v1 }
 0x1ed   : > { %3277 = vmatpush1.bf16.msra.mxu1 %v8967_v33 }
 0x1ee   : > { %3278 = vmatprep.subr.bf16.mxu1 %v9160_v1 }
 0x1f0   : > { %3113 = vmatmul.mubr.bf16.gmra.mrb[20].mxu1 %v7662_v12 }
 0x1f1   : > { %3279 = vmatpush1.bf16.msra.mxu1 %v8968_v16  ;;  %7716 = vmatprep.mubr.msk.bf16.mxu1 %vm2628_vm4, %v7699_v29  ;;  %v8993_v16 = vld [vmem:[%s11638_s4 + $0x1a8] sm:$0xff]  }
 0x1f2   : > { %3280 = vmatprep.subr.bf16.mxu1 %v9160_v1 }
 0x1f5   : > { %3281 = vmatpush1.bf16.msra.mxu1 %v8970_v50 }
 0x1f6   : > { %3282 = vmatprep.subr.bf16.mxu1 %v9160_v1 }
 0x1f9   : > { %3283 = vmatpush1.bf16.msra.mxu1 %v8971_v3  ;;  %v3661_v3 = vld [vmem:[#allocation3 + $0x10] sm:$0xee] }
 0x1fa   : > { %3284 = vmatprep.subr.bf16.mxu1 %v9160_v1 }
 0x1fd   : > { %3285 = vmatpush1.bf16.msra.mxu1 %v8972_v39 }
 0x1fe   : > { %3588 = vmatprep.subr.bf16.mxu1 %v9160_v1 }
 0x200   : > { %3299 = vmatmul.mubr.bf16.vlgmr.msra.gmra.mrb[8].mxu1 %v7698_v21  ;;  %v8995_v21 = vld [vmem:[%s11638_s4 + $0x1b8] sm:$0xff]  }
 0x201   : > { %7717 = vmatprep.mubr.msk.bf16.mxu1 %vm2628_vm4, %v7701_v17  ;;  %3589 = vmatpush1.bf16.msra.mxu1 %v8975_v26  ;;  %v3691_v26 = vrot.slane %v10078_v51, 5  ;;  %v7762_v17 = vrot.slane %v3661_v3, 9  ;;  %v8996_v51 = vld [vmem:[%s11638_s4 + $0x1c0] sm:$0xff]  }
 0x202   : > { %3590 = vmatprep.subr.bf16.mxu1 %v9160_v1 }
 0x205   : > { %3591 = vmatpush1.bf16.msra.mxu1 %v8976_v14 }
 0x206   : > { %3592 = vmatprep.subr.bf16.mxu1 %v9160_v1 }
 0x208   : > { %3307 = vmatmul.mubr.bf16.gmra.mrb[12].mxu1 %v7700_v57  ;;  %v3664_v57 = vld [vmem:[#allocation3 + $0x40] sm:$0xee] }
 0x209   : > { %7718 = vmatprep.mubr.msk.bf16.mxu1 %vm2628_vm4, %v7703_v25  ;;  %3593 = vmatpush1.bf16.msra.mxu1 %v8979_v13  ;;  %v8998_v13 = vld [vmem:[%s11638_s4 + $0x1d0] sm:$0xff]   ;;  %v3663_v25 = vld [vmem:[#allocation3 + $0x30] sm:$0xee] }
 0x20a   : > { %3594 = vmatprep.subr.bf16.mxu1 %v9160_v1 }
 0x20d   : > { %3595 = vmatpush1.bf16.msra.mxu1 %v8980_v10  ;;  %v7765_v10 = vrot.slane %v3664_v57, 9  ;;  %v10509_v57 = vld [vmem:[#allocation3 + $0x50] sm:$0xff] }
 0x20e   : > { %3596 = vmatprep.subr.bf16.mxu1 %v9160_v1 }
 0x210   : > { %3315 = vmatmul.mubr.bf16.gmra.mrb[16].mxu1 %v7702_v38  ;;  %v8999_v38 = vld [vmem:[%s11638_s4 + $0x1d8] sm:$0xff]  }
 0x211   : > { %7719 = vmatprep.mubr.msk.bf16.mxu1 %vm2628_vm4, %v7705_v19  ;;  %3597 = vmatpush1.bf16.msra.mxu1 %v8983_v8  ;;  %v3699_v8 = vrot.slane %v10087_v47, 5  ;;  %v7764_v19 = vrot.slane %v3663_v25, 9  ;;  %v9013_v25 = vld [vmem:[%s11638_s4 + $0x230] sm:$0xff]  }
 0x212   : > { %3598 = vmatprep.subr.bf16.mxu1 %v9160_v1 }
 0x215   : > { %3599 = vmatpush1.bf16.msra.mxu1 %v8984_v9  ;;  %v3695_v9 = vrot.slane %v10085_v59, 5  ;;  %v3707_v59 = vrot.slane %v10092_v53, 5  ;;  %v9002_v53 = vld [vmem:[%s11638_s4 + $0x1f0] sm:$0xff]  }
 0x216   : > { %3600 = vmatprep.subr.bf16.mxu1 %v9160_v1 }
 0x218   : > { %3323 = vmatmul.mubr.bf16.gmra.mrb[20].mxu1 %v7704_v35  ;;  %v9000_v35 = vld [vmem:[%s11638_s4 + $0x1e0] sm:$0xff]  }
 0x219   : > { %3601 = vmatpush1.bf16.msra.mxu1 %v8986_v56  ;;  %7758 = vmatprep.mubr.msk.bf16.mxu1 %vm2628_vm4, %v7741_v20  ;;  %v3454_v20 = vshrl.u32 %v10313_v46, 16  ;;  %v3700_v56 = vsel %vm9337_vm12, %v7765_v10, %v3699_v8  ;;  %v10515_v8 = vld [vmem:[#allocation3 + $0x40] sm:$0xff] }
 0x21a   : > { %3602 = vmatprep.subr.bf16.mxu1 %v9160_v1 }
 0x21b   : > { %v3456_v23 = vrot.slane %v3454_v20, 4  ;;  %v3665_v20 = vld [vmem:[#allocation3 + $0x50] sm:$0xee] }
 0x21d   : > { %3603 = vmatpush1.bf16.msra.mxu1 %v8987_v4  ;;  %v3460_v36 = vor.u32 %v3459_v52, %v3456_v23  ;;  %v3666_v4 = vld [vmem:[#allocation3 + $0x60] sm:$0xee]  ;;  %v7766_v23 = vrot.slane %v3665_v20, 9  ;;  %v3703_v52 = vrot.slane %v10090_v40, 5  ;;  %v3715_v40 = vrot.slane %v10367_v37, 5 }
 0x21e   : > { %3604 = vmatprep.subr.bf16.mxu1 %v9160_v1  ;;  %v7767_v41 = vrot.slane %v3666_v4, 9  ;;  %v9017_v4 = vld [vmem:[%s11638_s4 + $0x240] sm:$0xff]  }
 0x21f   : > { %v10380_v33 = vrot.slane %v3460_v36, 4  ;;  %v3668_v36 = vld [vmem:[#allocation3 + $0x80] sm:$0xee] }
 0x221   : > { %3605 = vmatpush1.bf16.msra.mxu1 %v8988_v18  ;;  %v3696_v18 = vsel %vm9337_vm12, %v7764_v19, %v3695_v9  ;;  %v9014_v19 = vld [vmem:[%s11638_s4 + $0x238] sm:$0xff]   ;;  %v10524_v9 = vld [vmem:[#allocation3 + $0x60] sm:$0xff] }
 0x222   : > { %3606 = vmatprep.subr.bf16.mxu1 %v9160_v1 }
 0x225   : > { %3607 = vmatpush1.bf16.msra.mxu1 %v8989_v5  ;;  %v7793_v5 = vcombine.high %v3696_v18, %v3700_v56 }
 0x226   : > { %3838 = vmatprep.subr.bf16.mxu1 %v9160_v1 }
 0x228   : > { %3621 = vmatmul.mubr.bf16.vlgmr.msra.gmra.mrb[8].mxu1 %v7740_v45  ;;  %v3463_v45 = vshll.u32 %v10367_v37, 16  ;;  %v9004_v37 = vld [vmem:[%s11638_s4 + $0x200] sm:$0xff]  }
 0x229   : > { %7759 = vmatprep.mubr.msk.bf16.mxu1 %vm2628_vm4, %v7743_v30  ;;  %3839 = vmatpush1.bf16.msra.mxu1 %v8990_v58  ;;  %v3449_v30 = vshll.u32 %v10372_v27, 16  ;;  %v9001_v58 = vld [vmem:[%s11638_s4 + $0x1e8] sm:$0xff]  }
 0x22a   : > { %3840 = vmatprep.subr.bf16.mxu1 %v9160_v1  ;;  %v3465_v12 = vrot.slane %v3463_v45, 5  ;;  %v3704_v45 = vsel %vm9337_vm12, %v7766_v23, %v3703_v52  ;;  %v9018_v23 = vld [vmem:[%s11638_s4 + $0x248] sm:$0xff]  }
 0x22b   : > { %v3451_v29 = vrot.slane %v3449_v30, 5 }
 0x22c   : > { %v3466_v55 = vsel %vm9430_vm15, %v10380_v33, %v3465_v12  ;;  %v7769_v12 = vrot.slane %v3668_v36, 9  ;;  %v10543_v36 = vld [vmem:[#allocation3 + $0x90] sm:$0xff] }
 0x22d   : > { %3841 = vmatpush1.bf16.msra.mxu1 %v8991_v11  ;;  %v3708_v11 = vsel %vm9337_vm12, %v7767_v41, %v3707_v59 }
 0x22e   : > { %3842 = vmatprep.subr.bf16.mxu1 %v9160_v1  ;;  %v7795_v30 = vcombine.high %v3704_v45, %v3708_v11 }
 0x230   : > { %3629 = vmatmul.mubr.bf16.gmra.mrb[12].mxu1 %v7742_v15  ;;  %v3662_v15 = vld [vmem:[#allocation3 + $0x20] sm:$0xee] }
 0x231   : > { %7760 = vmatprep.mubr.msk.bf16.mxu1 %vm2628_vm4, %v7745_v22  ;;  %3843 = vmatpush1.bf16.msra.mxu1 %v8992_v24  ;;  %v3452_v22 = vsel %vm9430_vm15, %v10065_v44, %v3451_v29  ;;  %v7763_v39 = vrot.slane %v3662_v15, 9  ;;  %v3687_v44 = vrot.slane %v10076_v32, 5  ;;  %v8997_v32 = vld [vmem:[%s11638_s4 + $0x1c8] sm:$0xff]   ;;  %v7792_v24 = vcombine.low %v3696_v18, %v3700_v56  ;;  %v9003_v29 = vld [vmem:[%s11638_s4 + $0x1f8] sm:$0xff]   ;;  %v10532_v18 = vld [vmem:[#allocation3 + $0x70] sm:$0xff] }
 0x232   : > { %3844 = vmatprep.subr.bf16.mxu1 %v9160_v1  ;;  %v7747_v50 = vcombine.high %v3452_v22, %v3466_v55  ;;  %v7746_v34 = vcombine.low %v3452_v22, %v3466_v55  ;;  %v3716_v15 = vsel %vm9337_vm12, %v7769_v12, %v3715_v40  ;;  %v7794_v22 = vcombine.low %v3704_v45, %v3708_v11  ;;  %v9021_v45 = vld [vmem:[%s11638_s4 + $0x250] sm:$0xff]  }
 0x233   : > { %v3692_v14 = vsel %vm9337_vm12, %v7763_v39, %v3691_v26  ;;  %v3688_v61 = vsel %vm9337_vm12, %v7762_v17, %v3687_v44  ;;  %v9005_v39 = vld [vmem:[%s11638_s4 + $0x208] sm:$0xff]   ;;  %v9006_v17 = vld [vmem:[%s11638_s4 + $0x210] sm:$0xff]   ;;  %v7837_v41 = vcombine.high %v10524_v9, %v10532_v18 }
 0x234   : > { %v7790_v47 = vcombine.low %v3688_v61, %v3692_v14  ;;  %v9039_v26 = vld [vmem:[%s11641_s7 + $0x8] sm:$0xff]  }
 0x235   : > { %3845 = vmatpush1.bf16.msra.mxu1 %v8993_v16  ;;  %v3667_v16 = vld [vmem:[#allocation3 + $0x70] sm:$0xee] }
 0x236   : > { %3846 = vmatprep.subr.bf16.mxu1 %v9160_v1  ;;  %v7768_v55 = vrot.slane %v3667_v16, 9  ;;  %v7836_v16 = vcombine.low %v10524_v9, %v10532_v18 }
 0x238   : > { %3637 = vmatmul.mubr.bf16.gmra.mrb[16].mxu1 %v7744_v42  ;;  %v7791_v42 = vcombine.high %v3688_v61, %v3692_v14  ;;  %v3913_v14 = vld [vmem:[#allocation3 + $0x30] sm:$0xff]  ;;  %v9008_v61 = vld [vmem:[%s11638_s4 + $0x218] sm:$0xff]  }
 0x239   : > { %7761 = vmatprep.mubr.msk.bf16.mxu1 %vm2628_vm4, %v7747_v50  ;;  %3847 = vmatpush1.bf16.msra.mxu1 %v8994_v28  ;;  %v3711_v28 = vrot.slane %v10372_v27, 5  ;;  %v9038_v27 = vld [vmem:[%s11641_s7] sm:$0xff]   ;;  %v4156_v20 = vshll.u32 %v3913_v14, 16 }
 0x23a   : > { %3848 = vmatprep.subr.bf16.mxu1 %v9160_v1  ;;  %5335 = vmatpush1.bf16.msra.mxu0 %v9038_v27  ;;  %v4181_v27 = vshrl.u32 %v10509_v57, 16 }
 0x23b   : > { %v3712_v50 = vsel %vm9337_vm12, %v7768_v55, %v3711_v28  ;;  %5336 = vmatprep.subr.bf16.mxu0 %v9160_v1  ;;  %v4158_v11 = vrot.slane %v4156_v20, 5 }
 0x23c   : > { %v7797_v3 = vcombine.high %v3712_v50, %v3716_v15  ;;  %v7796_v44 = vcombine.low %v3712_v50, %v3716_v15  ;;  %v9022_v15 = vld [vmem:[%s11638_s4 + $0x258] sm:$0xff]  }
 0x23d   : > { %3849 = vmatpush1.bf16.msra.mxu1 %v8995_v21  ;;  %v3912_v21 = vld [vmem:[#allocation3 + $0x20] sm:$0xff] }
 0x23e   : > { %3850 = vmatprep.subr.bf16.mxu1 %v9160_v1  ;;  %5337 = vmatpush1.bf16.msra.mxu0 %v9039_v26  ;;  %v7832_v10 = vcombine.low %v3912_v21, %v3913_v14  ;;  %v4139_v56 = vshrl.u32 %v3912_v21, 16  ;;  %v9024_v26 = vld [vmem:[%s11638_s4 + $0x260] sm:$0xff]  }
 0x23f   : > { %5338 = vmatprep.subr.bf16.mxu0 %v9160_v1 }
 0x240   : > { %3645 = vmatmul.mubr.bf16.gmra.mrb[20].mxu1 %v7746_v34  ;;  %v7833_v34 = vcombine.high %v3912_v21, %v3913_v14  ;;  %v4141_v59 = vrot.slane %v4139_v56, 4 }
 0x241   : > { %3851 = vmatpush1.bf16.msra.mxu1 %v8996_v51  ;;  %7808 = vmatprep.mubr.msk.bf16.mxu1 %vm2628_vm4, %v7791_v42  ;;  %v9040_v51 = vld [vmem:[%s11641_s7 + $0x10] sm:$0xff]   ;;  %v9042_v42 = vld [vmem:[%s11641_s7 + $0x18] sm:$0xff]  }
 0x242   : > { %3852 = vmatprep.subr.bf16.mxu1 %v9160_v1  ;;  %5339 = vmatpush1.bf16.msra.mxu0 %v9040_v51 }
 0x243   : > { %5340 = vmatprep.subr.bf16.mxu0 %v9160_v1 }
 0x245   : > { %3853 = vmatpush1.bf16.msra.mxu1 %v8997_v32  ;;  %v9009_v32 = vld [vmem:[%s11638_s4 + $0x220] sm:$0xff]  }
 0x246   : > { %3854 = vmatprep.subr.bf16.mxu1 %v9160_v1  ;;  %5341 = vmatpush1.bf16.msra.mxu0 %v9042_v42 }
 0x247   : > { %5342 = vmatprep.subr.bf16.mxu0 %v9160_v1 }
 0x249   : > { %3855 = vmatpush1.bf16.msra.mxu1 %v8998_v13  ;;  %v9010_v13 = vld [vmem:[%s11638_s4 + $0x228] sm:$0xff]  }
 0x24a   : > { %3856 = vmatprep.subr.bf16.mxu1 %v9160_v1 }
 0x24d   : > { %3857 = vmatpush1.bf16.msra.mxu1 %v8999_v38  ;;  %v7835_v38 = vcombine.high %v10515_v8, %v10509_v57 }
 0x24e   : > { %4049 = vmatprep.subr.bf16.mxu1 %v9160_v1 }
 0x250   : > { %3871 = vmatmul.mubr.bf16.vlgmr.msra.gmra.mrb[8].mxu1 %v7790_v47  ;;  %v7834_v47 = vcombine.low %v10515_v8, %v10509_v57 }
 0x251   : > { %7809 = vmatprep.mubr.msk.bf16.mxu1 %vm2628_vm4, %v7793_v5  ;;  %4050 = vmatpush1.bf16.msra.mxu1 %v9000_v35  ;;  %v4142_v35 = vshll.u32 %v3912_v21, 16  ;;  %v4153_v5 = vshrl.u32 %v3913_v14, 16  ;;  %v7838_v21 = vcombine.low %v10313_v46, %v10543_v36  ;;  %v4170_v14 = vshll.u32 %v10515_v8, 16 }
 0x252   : > { %4051 = vmatprep.subr.bf16.mxu1 %v9160_v1 }
 0x253   : > { %v4155_v52 = vrot.slane %v4153_v5, 4 }
 0x255   : > { %4052 = vmatpush1.bf16.msra.mxu1 %v9001_v58  ;;  %v4144_v58 = vrot.slane %v4142_v35, 5  ;;  %v4159_v40 = vor.u32 %v4158_v11, %v4155_v52  ;;  %v4209_v35 = vshrl.u32 %v10532_v18, 16  ;;  %v10599_v11 = vld [vmem:[#allocation3 + $0x68] sm:$0x11] }
 0x256   : > { %4053 = vmatprep.subr.bf16.mxu1 %v9160_v1 }
 0x258   : > { %3879 = vmatmul.mubr.bf16.gmra.mrb[12].mxu1 %v7792_v24  ;;  %v4145_v24 = vor.u32 %v4144_v58, %v4141_v59 }
 0x259   : > { %7810 = vmatprep.mubr.msk.bf16.mxu1 %vm2628_vm4, %v7795_v30  ;;  %4054 = vmatpush1.bf16.msra.mxu1 %v9002_v53  ;;  %v10541_v53 = vld [vmem:[#allocation3 + $0x28] sm:$0x11]  ;;  %v10548_v30 = vld [vmem:[#allocation3 + $0x38] sm:$0x11] }
 0x25a   : > { %4055 = vmatprep.subr.bf16.mxu1 %v9160_v1  ;;  %v4148_v12 = vshll.u32 %v10541_v53, 16  ;;  %v4146_v55 = vrot.slane %v4145_v24, 4  ;;  %v4162_v28 = vshll.u32 %v10548_v30, 16 }
 0x25d   : > { %4056 = vmatpush1.bf16.msra.mxu1 %v9003_v29  ;;  %v7839_v29 = vcombine.high %v10313_v46, %v10543_v36  ;;  %v9025_v46 = vld [vmem:[%s11638_s4 + $0x268] sm:$0xff]  }
 0x25e   : > { %4057 = vmatprep.subr.bf16.mxu1 %v9160_v1 }
 0x260   : > { %3887 = vmatmul.mubr.bf16.gmra.mrb[16].mxu1 %v7794_v22  ;;  %v4160_v22 = vrot.slane %v4159_v40, 4  ;;  %v9028_v40 = vld [vmem:[%s11638_s4 + $0x280] sm:$0xff]  }
 0x261   : > { %7811 = vmatprep.mubr.msk.bf16.mxu1 %vm2628_vm4, %v7797_v3  ;;  %4058 = vmatpush1.bf16.msra.mxu1 %v9004_v37  ;;  %v4150_v37 = vrot.slane %v4148_v12, 5  ;;  %v4164_v3 = vrot.slane %v4162_v28, 5  ;;  %v4240_v12 = vshll.u32 %v10543_v36, 16 }
 0x262   : > { %4059 = vmatprep.subr.bf16.mxu1 %v9160_v1 }
 0x263   : > { %v4151_v50 = vsel %vm9430_vm15, %v4146_v55, %v4150_v37 }
 0x265   : > { %4060 = vmatpush1.bf16.msra.mxu1 %v9005_v39  ;;  %v4184_v39 = vshll.u32 %v10509_v57, 16 }
 0x266   : > { %4061 = vmatprep.subr.bf16.mxu1 %v9160_v1 }
 0x268   : > { %3895 = vmatmul.mubr.bf16.gmra.mrb[20].mxu1 %v7796_v44  ;;  %v4167_v44 = vshrl.u32 %v10515_v8, 16  ;;  %v9026_v8 = vld [vmem:[%s11638_s4 + $0x270] sm:$0xff]  }
 0x269   : > { %4062 = vmatpush1.bf16.msra.mxu1 %v9006_v17  ;;  %7850 = vmatprep.mubr.msk.bf16.mxu1 %vm2628_vm4, %v7833_v34  ;;  %v4165_v17 = vsel %vm9430_vm15, %v4160_v22, %v4164_v3  ;;  %v4183_v34 = vrot.slane %v4181_v27, 4 }
 0x26a   : > { %4063 = vmatprep.subr.bf16.mxu1 %v9160_v1  ;;  %v7875_v51 = vcombine.high %v4151_v50, %v4165_v17  ;;  %v4169_v42 = vrot.slane %v4167_v44, 4  ;;  %v7874_v55 = vcombine.low %v4151_v50, %v4165_v17  ;;  %v9029_v50 = vld [vmem:[%s11638_s4 + $0x288] sm:$0xff]   ;;  %v10620_v17 = vld [vmem:[#allocation3 + $0x88] sm:$0x11] }
 0x26b   : > { %v10622_v44 = vld [vmem:[#allocation3 + $0x98] sm:$0x11] }
 0x26d   : > { %4064 = vmatpush1.bf16.msra.mxu1 %v9008_v61  ;;  %v4186_v61 = vrot.slane %v4184_v39, 5  ;;  %v4242_v39 = vrot.slane %v4240_v12, 5  ;;  %v9036_v12 = vld [vmem:[%s11638_s4 + $0x2c0] sm:$0xff]  }
 0x26e   : > { %4065 = vmatprep.subr.bf16.mxu1 %v9160_v1 }
 0x26f   : > { %v4187_v57 = vor.u32 %v4186_v61, %v4183_v34  ;;  %v4246_v61 = vshll.u32 %v10622_v44, 16 }
 0x271   : > { %4066 = vmatpush1.bf16.msra.mxu1 %v9009_v32  ;;  %v4172_v32 = vrot.slane %v4170_v14, 5  ;;  %v4188_v5 = vrot.slane %v4187_v57, 4  ;;  %v4232_v57 = vshll.u32 %v10620_v17, 16 }
 0x272   : > { %4067 = vmatprep.subr.bf16.mxu1 %v9160_v1 }
 0x275   : > { %4068 = vmatpush1.bf16.msra.mxu1 %v9010_v13  ;;  %v10581_v13 = vld [vmem:[#allocation3 + $0x58] sm:$0x11] }
 0x276   : > { %4371 = vmatprep.subr.bf16.mxu1 %v9160_v1  ;;  %v4190_v56 = vshll.u32 %v10581_v13, 16 }
 0x278   : > { %4082 = vmatmul.mubr.bf16.vlgmr.msra.gmra.mrb[8].mxu1 %v7832_v10  ;;  %v4198_v10 = vshll.u32 %v10524_v9, 16  ;;  %v4192_v58 = vrot.slane %v4190_v56, 5  ;;  %v4234_v56 = vrot.slane %v4232_v57, 5 }
 0x279   : > { %7851 = vmatprep.mubr.msk.bf16.mxu1 %vm2628_vm4, %v7835_v38  ;;  %4372 = vmatpush1.bf16.msra.mxu1 %v9013_v25  ;;  %v4195_v25 = vshrl.u32 %v10524_v9, 16  ;;  %v10588_v38 = vld [vmem:[#allocation3 + $0x48] sm:$0x11] }
 0x27a   : > { %4373 = vmatprep.subr.bf16.mxu1 %v9160_v1  ;;  %v4200_v20 = vrot.slane %v4198_v10, 5 }
 0x27b   : > { %v4197_v9 = vrot.slane %v4195_v25, 4 }
 0x27d   : > { %4374 = vmatpush1.bf16.msra.mxu1 %v9014_v19  ;;  %v4173_v19 = vor.u32 %v4172_v32, %v4169_v42 }
 0x27e   : > { %4375 = vmatprep.subr.bf16.mxu1 %v9160_v1 }
 0x27f   : > { %v4174_v59 = vrot.slane %v4173_v19, 4  ;;  %v9031_v19 = vld [vmem:[%s11638_s4 + $0x298] sm:$0xff]  }
 0x280   : > { %4090 = vmatmul.mubr.bf16.gmra.mrb[12].mxu1 %v7834_v47  ;;  %v4176_v47 = vshll.u32 %v10588_v38, 16 }
 0x281   : > { %7852 = vmatprep.mubr.msk.bf16.mxu1 %vm2628_vm4, %v7837_v41  ;;  %4376 = vmatpush1.bf16.msra.mxu1 %v9017_v4  ;;  %v4212_v4 = vshll.u32 %v10532_v18, 16  ;;  %v9027_v41 = vld [vmem:[%s11638_s4 + $0x278] sm:$0xff]   ;;  %v4237_v18 = vshrl.u32 %v10543_v36, 16 }
 0x282   : > { %4377 = vmatprep.subr.bf16.mxu1 %v9160_v1  ;;  %v4178_v24 = vrot.slane %v4176_v47, 5  ;;  %v9032_v47 = vld [vmem:[%s11638_s4 + $0x2a0] sm:$0xff]  }
 0x283   : > { %v4214_v52 = vrot.slane %v4212_v4, 5  ;;  %v4239_v27 = vrot.slane %v4237_v18, 4 }
 0x284   : > { %v4179_v28 = vsel %vm9430_vm15, %v4174_v59, %v4178_v24 }
 0x285   : > { %4378 = vmatpush1.bf16.msra.mxu1 %v9018_v23  ;;  %v4211_v23 = vrot.slane %v4209_v35, 4  ;;  %v4243_v34 = vor.u32 %v4242_v39, %v4239_v27  ;;  %v4235_v35 = vsel %vm9430_vm15, %v10380_v33, %v4234_v56  ;;  %v9033_v33 = vld [vmem:[%s11638_s4 + $0x2a8] sm:$0xff]   ;;  %v4448_v27 = vld [vmem:[#allocation3 + $0x60] sm:$0xee] }
 0x286   : > { %4379 = vmatprep.subr.bf16.mxu1 %v9160_v1  ;;  %v9041_v39 = vld [vmem:[%s11641_s7 + $0x50] sm:$0xff]  }
 0x287   : > { %v4215_v37 = vor.u32 %v4214_v52, %v4211_v23  ;;  %v4244_v10 = vrot.slane %v4243_v34, 4  ;;  %v4474_v52 = vrot.slane %v10548_v30, 5  ;;  %v9035_v30 = vld [vmem:[%s11638_s4 + $0x2b8] sm:$0xff]  }
 0x288   : > { %4098 = vmatmul.mubr.bf16.gmra.mrb[16].mxu1 %v7836_v16  ;;  %v4201_v16 = vor.u32 %v4200_v20, %v4197_v9 }
 0x289   : > { %7853 = vmatprep.mubr.msk.bf16.mxu1 %vm2628_vm4, %v7839_v29  ;;  %4380 = vmatpush1.bf16.msra.mxu1 %v9021_v45  ;;  %v4193_v45 = vsel %vm9430_vm15, %v4188_v5, %v4192_v58  ;;  %v10608_v29 = vld [vmem:[#allocation3 + $0x78] sm:$0x11]  ;;  %v4444_v5 = vld [vmem:[#allocation3 + $0x20] sm:$0xee]  ;;  %v4470_v58 = vrot.slane %v10541_v53, 5 }
 0x28a   : > { %4381 = vmatprep.subr.bf16.mxu1 %v9160_v1  ;;  %v7877_v22 = vcombine.high %v4179_v28, %v4193_v45  ;;  %v4202_v3 = vrot.slane %v4201_v16, 4  ;;  %v4218_v36 = vshll.u32 %v10608_v29, 16  ;;  %v7876_v42 = vcombine.low %v4179_v28, %v4193_v45  ;;  %v9034_v53 = vld [vmem:[%s11638_s4 + $0x2b0] sm:$0xff]  }
 0x28b   : > { %v7896_v59 = vrot.slane %v4444_v5, 9  ;;  %v4490_v34 = vrot.slane %v10608_v29, 5  ;;  %v9045_v5 = vld [vmem:[%s11641_s7 + $0x60] sm:$0xff]  }
 0x28d   : > { %4382 = vmatpush1.bf16.msra.mxu1 %v9022_v15  ;;  %v4204_v15 = vshll.u32 %v10599_v11, 16  ;;  %v4471_v18 = vsel %vm9337_vm12, %v7896_v59, %v4470_v58  ;;  %v9049_v59 = vld [vmem:[%s11641_s7 + $0x70] sm:$0xff]   ;;  %v9050_v58 = vld [vmem:[%s11641_s7 + $0x38] sm:$0xff]  }
 0x28e   : > { %4383 = vmatprep.subr.bf16.mxu1 %v9160_v1 }
 0x290   : > { %4106 = vmatmul.mubr.bf16.gmra.mrb[20].mxu1 %v7838_v21  ;;  %v4216_v21 = vrot.slane %v4215_v37, 4  ;;  %v9037_v37 = vld [vmem:[%s11638_s4 + $0x2c8] sm:$0xff]  }
 0x291   : > { %4384 = vmatpush1.bf16.msra.mxu1 %v9024_v26  ;;  %7892 = vmatprep.mubr.msk.bf16.mxu1 %vm2628_vm4, %v7875_v51  ;;  %v4206_v26 = vrot.slane %v4204_v15, 5  ;;  %v4220_v51 = vrot.slane %v4218_v36, 5  ;;  %v4482_v15 = vrot.slane %v10581_v13, 5 }
 0x292   : > { %4385 = vmatprep.subr.bf16.mxu1 %v9160_v1 }
 0x293   : > { %v4207_v14 = vsel %vm9430_vm15, %v4202_v3, %v4206_v26  ;;  %v4221_v32 = vsel %vm9430_vm15, %v4216_v21, %v4220_v51  ;;  %v4478_v3 = vrot.slane %v10588_v38, 5  ;;  %v4449_v21 = vld [vmem:[#allocation3 + $0x70] sm:$0xee]  ;;  %v4486_v38 = vrot.slane %v10599_v11, 5 }
 0x294   : > { %v7879_v25 = vcombine.high %v4207_v14, %v4221_v32  ;;  %v7878_v9 = vcombine.low %v4207_v14, %v4221_v32  ;;  %v7900_v14 = vrot.slane %v4448_v27, 9  ;;  %v7901_v51 = vrot.slane %v4449_v21, 9 }
 0x295   : > { %4386 = vmatpush1.bf16.msra.mxu1 %v9025_v46  ;;  %v9030_v46 = vld [vmem:[%s11638_s4 + $0x290] sm:$0xff]  }
 0x296   : > { %4387 = vmatprep.subr.bf16.mxu1 %v9160_v1  ;;  %v4491_v57 = vsel %vm9337_vm12, %v7901_v51, %v4490_v34 }
 0x299   : > { %4388 = vmatpush1.bf16.msra.mxu1 %v9026_v8  ;;  %v4248_v8 = vrot.slane %v4246_v61, 5  ;;  %v4487_v61 = vsel %vm9337_vm12, %v7900_v14, %v4486_v38 }
 0x29a   : > { %4389 = vmatprep.subr.bf16.mxu1 %v9160_v1 }
 0x29b   : > { %v4249_v4 = vsel %vm9430_vm15, %v4244_v10, %v4248_v8  ;;  %v4494_v10 = vrot.slane %v10620_v17, 5  ;;  %v9043_v17 = vld [vmem:[%s11641_s7 + $0x58] sm:$0xff]  }
 0x29c   : > { %v7881_v20 = vcombine.high %v4235_v35, %v4249_v4  ;;  %v7880_v24 = vcombine.low %v4235_v35, %v4249_v4  ;;  %v7928_v35 = vcombine.low %v4487_v61, %v4491_v57 }
 0x29d   : > { %4390 = vmatpush1.bf16.msra.mxu1 %v9027_v41  ;;  %v4445_v41 = vld [vmem:[#allocation3 + $0x30] sm:$0xee] }
 0x29e   : > { %4621 = vmatprep.subr.bf16.mxu1 %v9160_v1  ;;  %v7897_v23 = vrot.slane %v4445_v41, 9  ;;  %v9048_v41 = vld [vmem:[%s11641_s7 + $0x30] sm:$0xff]  }
 0x2a0   : > { %4404 = vmatmul.mubr.bf16.vlgmr.msra.gmra.mrb[8].mxu1 %v7874_v55  ;;  %v4475_v45 = vsel %vm9337_vm12, %v7897_v23, %v4474_v52  ;;  %v4446_v55 = vld [vmem:[#allocation3 + $0x40] sm:$0xee]  ;;  %v9052_v23 = vld [vmem:[%s11641_s7 + $0x40] sm:$0xff]  }
 0x2a1   : > { %7893 = vmatprep.mubr.msk.bf16.mxu1 %vm2628_vm4, %v7877_v22  ;;  %4622 = vmatpush1.bf16.msra.mxu1 %v9028_v40  ;;  %v7925_v16 = vcombine.high %v4471_v18, %v4475_v45  ;;  %v4447_v40 = vld [vmem:[#allocation3 + $0x50] sm:$0xee]  ;;  %v7898_v22 = vrot.slane %v4446_v55, 9  ;;  %v7924_v13 = vcombine.low %v4471_v18, %v4475_v45  ;;  %v9054_v18 = vld [vmem:[%s11641_s7 + $0x48] sm:$0xff]   ;;  %v9061_v45 = vld [vmem:[%s11641_s7 + $0x98] sm:$0xff]  }
 0x2a2   : > { %4623 = vmatprep.subr.bf16.mxu1 %v9160_v1  ;;  %v7899_v28 = vrot.slane %v4447_v40, 9  ;;  %v9053_v52 = vld [vmem:[%s11641_s7 + $0x80] sm:$0xff]  }
 0x2a4   : > { %v4483_v36 = vsel %vm9337_vm12, %v7899_v28, %v4482_v15 }
 0x2a5   : > { %4624 = vmatpush1.bf16.msra.mxu1 %v9029_v50  ;;  %v4479_v50 = vsel %vm9337_vm12, %v7898_v22, %v4478_v3  ;;  %v10774_v3 = vld [vmem:[#allocation3] sm:$0xff] }
 0x2a6   : > { %4625 = vmatprep.subr.bf16.mxu1 %v9160_v1  ;;  %v7927_v26 = vcombine.high %v4479_v50, %v4483_v36  ;;  %v7926_v32 = vcombine.low %v4479_v50, %v4483_v36 }
 0x2a8   : > { %4412 = vmatmul.mubr.bf16.gmra.mrb[12].mxu1 %v7876_v42  ;;  %v4451_v42 = vld [vmem:[#allocation3 + $0x90] sm:$0xee] }
 0x2a9   : > { %7894 = vmatprep.mubr.msk.bf16.mxu1 %vm2628_vm4, %v7879_v25  ;;  %4626 = vmatpush1.bf16.msra.mxu1 %v9030_v46  ;;  %v4450_v46 = vld [vmem:[#allocation3 + $0x80] sm:$0xee]  ;;  %v7929_v25 = vcombine.high %v4487_v61, %v4491_v57  ;;  %v7903_v8 = vrot.slane %v4451_v42, 9 }
 0x2aa   : > { %4627 = vmatprep.subr.bf16.mxu1 %v9160_v1  ;;  %v7902_v11 = vrot.slane %v4450_v46, 9 }
 0x2ac   : > { %v4495_v29 = vsel %vm9337_vm12, %v7902_v11, %v4494_v10 }
 0x2ad   : > { %4628 = vmatpush1.bf16.msra.mxu1 %v9031_v19  ;;  %v4498_v19 = vrot.slane %v10622_v44, 5  ;;  %v9044_v44 = vld [vmem:[%s11641_s7 + $0x20] sm:$0xff]  }
 0x2ae   : > { %4629 = vmatprep.subr.bf16.mxu1 %v9160_v1  ;;  %5343 = vmatpush1.bf16.msra.mxu0 %v9044_v44  ;;  %v4847_v44 = vld [vmem:[#allocation3 + $0x18] sm:$0x1] }
 0x2af   : > { %v4499_v56 = vsel %vm9337_vm12, %v7903_v8, %v4498_v19  ;;  %5344 = vmatprep.subr.bf16.mxu0 %v9160_v1 }
 0x2b0   : > { %4420 = vmatmul.mubr.bf16.gmra.mrb[16].mxu1 %v7878_v9  ;;  %v7931_v4 = vcombine.high %v4495_v29, %v4499_v56  ;;  %v9046_v9 = vld [vmem:[%s11641_s7 + $0x28] sm:$0xff]  }
 0x2b1   : > { %7895 = vmatprep.mubr.msk.bf16.mxu1 %vm2628_vm4, %v7881_v20  ;;  %4630 = vmatpush1.bf16.msra.mxu1 %v9032_v47  ;;  %v7930_v47 = vcombine.low %v4495_v29, %v4499_v56  ;;  %v9047_v20 = vld [vmem:[%s11641_s7 + $0x68] sm:$0xff]  }
 0x2b2   : > { %4631 = vmatprep.subr.bf16.mxu1 %v9160_v1  ;;  %5345 = vmatpush1.bf16.msra.mxu0 %v9046_v9 }
 0x2b3   : > { %5346 = vmatprep.subr.bf16.mxu0 %v9160_v1 }
 0x2b5   : > { %4632 = vmatpush1.bf16.msra.mxu1 %v9033_v33  ;;  %v9051_v33 = vld [vmem:[%s11641_s7 + $0x78] sm:$0xff]  }
 0x2b6   : > { %4633 = vmatprep.subr.bf16.mxu1 %v9160_v1  ;;  %5347 = vmatpush1.bf16.msra.mxu0 %v9048_v41 }
 0x2b7   : > { %5348 = vmatprep.subr.bf16.mxu0 %v9160_v1 }
 0x2b8   : > { %4428 = vmatmul.mubr.bf16.gmra.mrb[20].mxu1 %v7880_v24  ;;  %v9059_v24 = vld [vmem:[%s11641_s7 + $0x90] sm:$0xff]  }
 0x2b9   : > { %4634 = vmatpush1.bf16.msra.mxu1 %v9034_v53  ;;  %7942 = vmatprep.mubr.msk.bf16.mxu1 %vm2628_vm4, %v7925_v16  ;;  %v9055_v53 = vld [vmem:[%s11641_s7 + $0x88] sm:$0xff]   ;;  %v10764_v16 = vld [vmem:[%s11639_s5] ss:$0 sm:$0xff] }
 0x2ba   : > { %4635 = vmatprep.subr.bf16.mxu1 %v9160_v1  ;;  %5349 = vmatpush1.bf16.msra.mxu0 %v9050_v58 }
 0x2bb   : > { %5350 = vmatprep.subr.bf16.mxu0 %v9160_v1 }
 0x2bd   : > { %4636 = vmatpush1.bf16.msra.mxu1 %v9035_v30 }
 0x2be   : > { %4637 = vmatprep.subr.bf16.mxu1 %v9160_v1  ;;  %5351 = vmatpush1.bf16.msra.mxu0 %v9052_v23  ;;  %v4850_v23 = vld [vmem:[#allocation3 + $0x20] sm:$0xf] }
 0x2bf   : > { %5352 = vmatprep.subr.bf16.mxu0 %v9160_v1 }
 0x2c1   : > { %4638 = vmatpush1.bf16.msra.mxu1 %v9036_v12  ;;  %v10769_v12 = vld [vmem:[%s11640_s6] ss:$0 sm:$0xff] }
 0x2c2   : > { %4639 = vmatprep.subr.bf16.mxu1 %v9160_v1  ;;  %5353 = vmatpush1.bf16.msra.mxu0 %v9054_v18 }
 0x2c3   : > { %5576 = vmatprep.subr.bf16.mxu0 %v9160_v1 }
 0x2c5   : > { %4640 = vmatpush1.bf16.msra.mxu1 %v9037_v37 }
 0x2c6   : > { %5161 = vmatprep.subr.bf16.mxu1 %v9160_v1 }
 0x2c8   : > { %4654 = vmatmul.mubr.bf16.vlgmr.msra.gmra.mrb[8].mxu1 %v7924_v13  ;;  %v4932_v13 = vshll.u32 %v10774_v3, 16 }
 0x2c9   : > { %7943 = vmatprep.mubr.msk.bf16.mxu1 %vm2628_vm4, %v7927_v26  ;;  %5162 = vmatpush1.bf16.msra.mxu1 %v9041_v39  ;;  %v4929_v39 = vshrl.u32 %v10774_v3, 16 }
 0x2ca   : > { %5163 = vmatprep.subr.bf16.mxu1 %v9160_v1  ;;  %v4934_v42 = vrot.slane %v4932_v13, 5 }
 0x2cb   : > { %v4931_v46 = vrot.slane %v4929_v39, 4 }
 0x2cd   : > { %5164 = vmatpush1.bf16.msra.mxu1 %v9043_v17  ;;  %v4844_v17 = vld [vmem:[#allocation3 + $0x10] sm:$0xf]  ;;  %v4935_v9 = vor.u32 %v4934_v42, %v4931_v46 }
 0x2ce   : > { %5165 = vmatprep.subr.bf16.mxu1 %v9160_v1 }
 0x2cf   : > { %v4936_v39 = vrot.slane %v4935_v9, 4 }
 0x2d0   : > { %4662 = vmatmul.mubr.bf16.gmra.mrb[12].mxu1 %v7926_v32 }
 0x2d1   : > { %7944 = vmatprep.mubr.msk.bf16.mxu1 %vm2628_vm4, %v7929_v25  ;;  %5166 = vmatpush1.bf16.msra.mxu1 %v9045_v5 }
 0x2d2   : > { %5167 = vmatprep.subr.bf16.mxu1 %v9160_v1 }
 0x2d5   : > { %5168 = vmatpush1.bf16.msra.mxu1 %v9047_v20 }
 0x2d6   : > { %5169 = vmatprep.subr.bf16.mxu1 %v9160_v1 }
 0x2d8   : > { %4670 = vmatmul.mubr.bf16.gmra.mrb[16].mxu1 %v7928_v35 }
 0x2d9   : > { %7945 = vmatprep.mubr.msk.bf16.mxu1 %vm2628_vm4, %v7931_v4  ;;  %5170 = vmatpush1.bf16.msra.mxu1 %v9049_v59 }
 0x2da   : > { %5171 = vmatprep.subr.bf16.mxu1 %v9160_v1 }
 0x2dd   : > { %5172 = vmatpush1.bf16.msra.mxu1 %v9051_v33 }
 0x2de   : > { %5173 = vmatprep.subr.bf16.mxu1 %v9160_v1 }
 0x2e0   : > { %4678 = vmatmul.mubr.bf16.gmra.mrb[20].mxu1 %v7930_v47  ;;  %v10782_v47 = vld [vmem:[#allocation3 + $0x8] sm:$0x11] }
 0x2e1   : > { %5174 = vmatpush1.bf16.msra.mxu1 %v9053_v52  ;;  %v4938_v20 = vshll.u32 %v10782_v47, 16  ;;  %v4853_v52 = vld [vmem:[#allocation3 + $0x28] sm:$0x1] }
 0x2e2   : > { %5175 = vmatprep.subr.bf16.mxu1 %v9160_v1 }
 0x2e3   : > { %v4940_v13 = vrot.slane %v4938_v20, 5 }
 0x2e5   : > { %5176 = vmatpush1.bf16.msra.mxu1 %v9055_v53 }
 0x2e6   : > { %5177 = vmatprep.subr.bf16.mxu1 %v9160_v1 }
 0x2e9   : > { %5178 = vmatpush1.bf16.msra.mxu1 %v9059_v24 }
 0x2ea   : > { %5179 = vmatprep.subr.bf16.mxu1 %v9160_v1 }
 0x2ed   : > { %5180 = vmatpush1.bf16.msra.mxu1 %v9061_v45 }
 0x39b   : > { %v4655_v30 = vpop.f32.mrb[8].mxu1 }
 0x39c   : > { %v4701_v40 = vmul.f32 %v10764_v16, %v4655_v30  ;;  %v4657_v55 = vpop.f32.mrb[9].mxu1 }
 0x39d   : > { %v4658_v28 = vpop.f32.mrb[10].mxu1 }
 0x39e   : > { %v4716_v15 = vadd.f32 %v10769_v12, %v4701_v40  ;;  %v4702_v37 = vmul.f32 %v10764_v16, %v4658_v28  ;;  %v4660_v22 = vpop.f32.mrb[11].mxu1 }
 0x3a0   : > { %v4724_v36 = vmax.f32 %v4716_v15, 0.0  ;;  %v4717_v27 = vadd.f32 %v10769_v12, %v4702_v37 }
 0x3a2   : > { %v8351_v50 = vpack.c.bf16 %v4724_v36, %v4724_v36  ;;  %v4725_v26 = vmax.f32 %v4717_v27, 0.0 }
 0x3a3   : > { %v4663_v21 = vpop.f32.mrb[12].mxu1 }
 0x3a4   : > { %v4765_v14 = vshrl.u32 %v8351_v50, 16  ;;  %v8352_v38 = vpack.c.bf16 %v4725_v26, %v4725_v26  ;;  %v4703_v51 = vmul.f32 %v10764_v16, %v4663_v21  ;;  %v4665_v34 = vpop.f32.mrb[13].mxu1  ;;  %v4768_v57 = vshll.u32 %v8351_v50, 16 }
 0x3a5   : > { %v4666_v61 = vpop.f32.mrb[14].mxu1 }
 0x3a6   : > { %v4767_v32 = vrot.slane %v4765_v14, 7  ;;  %v4773_v25 = vshrl.u32 %v8352_v38, 16  ;;  %v4718_v11 = vadd.f32 %v10769_v12, %v4703_v51  ;;  %v4668_v10 = vpop.f32.mrb[15].mxu1  ;;  %v4776_v8 = vshll.u32 %v8352_v38, 16  ;;  %v4856_v14 = vld [vmem:[#allocation3 + $0x30] sm:$0xf] }
 0x3a7   : > { %v4704_v19 = vmul.f32 %v10764_v16, %v4666_v61 }
 0x3a8   : > { %v4770_v29 = vor.u32 %v4768_v57, %v4767_v32  ;;  %v4771_v56 = vrot.slane %v4767_v32, 4  ;;  %v4775_v35 = vrot.slane %v4773_v25, 7  ;;  %v4726_v4 = vmax.f32 %v4718_v11, 0.0  ;;  %v10798_v32 = vld [vmem:[#allocation3] sm:$0xee] }
 0x3a9   : > { %v4719_v5 = vadd.f32 %v10769_v12, %v4704_v19  ;;  %v4859_v57 = vld [vmem:[#allocation3 + $0x38] sm:$0x1]  ;;  %v5425_v19 = vrot.slane %v10782_v47, 5 }
 0x3aa   : > { %v4845_v41 = vsel %vm9896_vm8, %v4770_v29, %v4844_v17  ;;  %v4848_v59 = vsel %vm9903_vm9, %v4771_v56, %v4847_v44  ;;  %v4778_v58 = vor.u32 %v4776_v8, %v4775_v35  ;;  %v4779_v33 = vrot.slane %v4775_v35, 4  ;;  %v4862_v17 = vld [vmem:[#allocation3 + $0x40] sm:$0xf] }
 0x3ab   : > { %4846 = vst [vmem:[#allocation3 + $0x10] sm:$0xf] %v4845_v41  ;;  %4849 = vst [vmem:[#allocation3 + $0x18] sm:$0x1] %v4848_v59  ;;  %v8353_v18 = vpack.c.bf16 %v4726_v4, %v4726_v4  ;;  %v4727_v53 = vmax.f32 %v4719_v5, 0.0  ;;  %v4671_v24 = vpop.f32.mrb[16].mxu1  ;;  %v10804_v8 = vsel %vm9430_vm15, %v4936_v39, %v4940_v13 }
 0x3ac   : > { %v4851_v45 = vsel %vm9896_vm8, %v4778_v58, %v4850_v23  ;;  %v4854_v30 = vsel %vm9903_vm9, %v4779_v33, %v4853_v52  ;;  %v4705_v40 = vmul.f32 %v10764_v16, %v4671_v24  ;;  %v4673_v55 = vpop.f32.mrb[17].mxu1  ;;  %v4865_v5 = vld [vmem:[#allocation3 + $0x48] sm:$0x1]  ;;  %v8020_v58 = vrot.slane %v10798_v32, 9  ;;  %v9058_v39 = vld [vmem:[%s11641_s7 + $0xa0] sm:$0xff]  }
 0x3ad   : > { %4855 = vst [vmem:[#allocation3 + $0x28] sm:$0x1] %v4854_v30  ;;  %4852 = vst [vmem:[#allocation3 + $0x20] sm:$0xf] %v4851_v45  ;;  %v4781_v28 = vshrl.u32 %v8353_v18, 16  ;;  %v8354_v15 = vpack.c.bf16 %v4727_v53, %v4727_v53  ;;  %v4674_v37 = vpop.f32.mrb[18].mxu1 }
 0x3ae   : > { %v4720_v22 = vadd.f32 %v10769_v12, %v4705_v40  ;;  %v4706_v36 = vmul.f32 %v10764_v16, %v4674_v37  ;;  %v4676_v27 = vpop.f32.mrb[19].mxu1  ;;  %v4784_v26 = vshll.u32 %v8353_v18, 16 }
 0x3af   : > { %v4783_v50 = vrot.slane %v4781_v28, 7  ;;  %v4789_v21 = vshrl.u32 %v8354_v15, 16  ;;  %v4792_v42 = vshll.u32 %v8354_v15, 16  ;;  %v4868_v15 = vld [vmem:[#allocation3 + $0x50] sm:$0xf] }
 0x3b0   : > { %v4728_v38 = vmax.f32 %v4720_v22, 0.0  ;;  %v4721_v51 = vadd.f32 %v10769_v12, %v4706_v36 }
 0x3b1   : > { %v4786_v34 = vor.u32 %v4784_v26, %v4783_v50  ;;  %v4787_v61 = vrot.slane %v4783_v50, 4  ;;  %v4791_v46 = vrot.slane %v4789_v21, 7 }
 0x3b2   : > { %v8355_v25 = vpack.c.bf16 %v4728_v38, %v4728_v38  ;;  %v4729_v11 = vmax.f32 %v4721_v51, 0.0  ;;  %v10800_v10 = vld [vmem:[#allocation3 + $0x10] sm:$0xff]  ;;  %v4871_v38 = vld [vmem:[#allocation3 + $0x58] sm:$0x1] }
 0x3b3   : > { %v4857_v29 = vsel %vm9896_vm8, %v4786_v34, %v4856_v14  ;;  %v4860_v56 = vsel %vm9903_vm9, %v4787_v61, %v4859_v57  ;;  %v4794_v35 = vor.u32 %v4792_v42, %v4791_v46  ;;  %v4795_v4 = vrot.slane %v4791_v46, 4  ;;  %v4679_v44 = vpop.f32.mrb[20].mxu1  ;;  %v10830_v14 = vld [vmem:[#allocation3 + $0x18] sm:$0x11] }
 0x3b4   : > { %4861 = vst [vmem:[#allocation3 + $0x38] sm:$0x1] %v4860_v56  ;;  %4858 = vst [vmem:[#allocation3 + $0x30] sm:$0xf] %v4857_v29  ;;  %v4797_v9 = vshrl.u32 %v8355_v25, 16  ;;  %v8356_v20 = vpack.c.bf16 %v4729_v11, %v4729_v11  ;;  %v4707_v41 = vmul.f32 %v10764_v16, %v4679_v44  ;;  %v4681_v59 = vpop.f32.mrb[21].mxu1  ;;  %v7999_v36 = vcombine.high %v10774_v3, %v10800_v10 }
 0x3b5   : > { %v4863_v33 = vsel %vm9896_vm8, %v4794_v35, %v4862_v17  ;;  %v4866_v23 = vsel %vm9903_vm9, %v4795_v4, %v4865_v5  ;;  %v4682_v52 = vpop.f32.mrb[22].mxu1  ;;  %v4943_v18 = vshrl.u32 %v10800_v10, 16  ;;  %v4946_v53 = vshll.u32 %v10800_v10, 16  ;;  %v10820_v28 = vld [vmem:[#allocation3 + $0x20] sm:$0xff]  ;;  %v4877_v11 = vld [vmem:[#allocation3 + $0x68] sm:$0x1] }
 0x3b6   : > { %4867 = vst [vmem:[#allocation3 + $0x48] sm:$0x1] %v4866_v23  ;;  %4864 = vst [vmem:[#allocation3 + $0x40] sm:$0xf] %v4863_v33  ;;  %v4799_v24 = vrot.slane %v4797_v9, 7  ;;  %v4800_v45 = vshll.u32 %v8355_v25, 16  ;;  %v4722_v40 = vadd.f32 %v10769_v12, %v4707_v41  ;;  %v4708_v22 = vmul.f32 %v10764_v16, %v4682_v52  ;;  %8016 = vmatprep.mubr.msk.bf16.mxu0 %vm2628_vm4, %v7999_v36 }
 0x3b7   : > { %v4805_v30 = vshrl.u32 %v8356_v20, 16  ;;  %v4684_v55 = vpop.f32.mrb[23].mxu1  ;;  %v4808_v37 = vshll.u32 %v8356_v20, 16  ;;  %v7998_v27 = vcombine.low %v10774_v3, %v10800_v10  ;;  %v4957_v16 = vshrl.u32 %v10820_v28, 16  ;;  %v4874_v25 = vld [vmem:[#allocation3 + $0x60] sm:$0xf] }
 0x3b8   : > { %v4802_v13 = vor.u32 %v4800_v45, %v4799_v24  ;;  %v4803_v50 = vrot.slane %v4799_v24, 4  ;;  %v4730_v21 = vmax.f32 %v4722_v40, 0.0  ;;  %v4723_v51 = vadd.f32 %v10769_v12, %v4708_v22  ;;  %v9060_v56 = vld [vmem:[%s11641_s7 + $0xa8] sm:$0xff]  }
 0x3b9   : > { %v4807_v26 = vrot.slane %v4805_v30, 7  ;;  %v4945_v34 = vrot.slane %v4943_v18, 4  ;;  %v4948_v61 = vrot.slane %v4946_v53, 5  ;;  %5367 = vmatmul.mubr.bf16.vlgmr.msra.gmra.mrb[8].mxu0 %v7998_v27  ;;  %v4952_v17 = vshll.u32 %v10830_v14, 16  ;;  %v10857_v18 = vld [vmem:[#allocation3 + $0x28] sm:$0x11] }
 0x3ba   : > { %v4869_v3 = vsel %vm9896_vm8, %v4802_v13, %v4868_v15  ;;  %v4872_v46 = vsel %vm9903_vm9, %v4803_v50, %v4871_v38  ;;  %v8357_v12 = vpack.c.bf16 %v4730_v21, %v4730_v21  ;;  %v4731_v29 = vmax.f32 %v4723_v51, 0.0  ;;  %5577 = vmatpush1.bf16.msra.mxu0 %v9058_v39  ;;  %v4880_v21 = vld [vmem:[#allocation3 + $0x70] sm:$0xf]  ;;  %v4883_v38 = vld [vmem:[#allocation3 + $0x78] sm:$0x1] }
 0x3bb   : > { %v4810_v42 = vor.u32 %v4808_v37, %v4807_v26  ;;  %v4811_v57 = vrot.slane %v4807_v26, 4  ;;  %4873 = vst [vmem:[#allocation3 + $0x58] sm:$0x1] %v4872_v46  ;;  %4870 = vst [vmem:[#allocation3 + $0x50] sm:$0xf] %v4869_v3  ;;  %v10842_v35 = vld [vmem:[#allocation3 + $0x30] sm:$0xff]  ;;  %v4949_v4 = vor.u32 %v4948_v61, %v4945_v34  ;;  %5578 = vmatprep.subr.bf16.mxu0 %v9160_v1 }
 0x3bc   : > { %v4960_v9 = vshll.u32 %v10820_v28, 16  ;;  %v4971_v20 = vshrl.u32 %v10842_v35, 16  ;;  %v4813_v41 = vshrl.u32 %v8357_v12, 16  ;;  %v8358_v59 = vpack.c.bf16 %v4731_v29, %v4731_v29  ;;  %v9064_v37 = vld [vmem:[%s11641_s7 + $0xb0] sm:$0xff]  }
 0x3bd   : > { %v4875_v44 = vsel %vm9896_vm8, %v4810_v42, %v4874_v25  ;;  %v4878_v5 = vsel %vm9903_vm9, %v4811_v57, %v4877_v11  ;;  %v4974_v33 = vshll.u32 %v10842_v35, 16  ;;  %v8001_v23 = vcombine.high %v10820_v28, %v10842_v35  ;;  %v10855_v52 = vld [vmem:[#allocation3 + $0x40] sm:$0xff]  ;;  %v10878_v42 = vld [vmem:[#allocation3 + $0x38] sm:$0x11] }
 0x3be   : > { %4879 = vst [vmem:[#allocation3 + $0x68] sm:$0x1] %v4878_v5  ;;  %4876 = vst [vmem:[#allocation3 + $0x60] sm:$0xf] %v4875_v44  ;;  %v4816_v53 = vshll.u32 %v8357_v12, 16  ;;  %v10859_v24 = vrot.slane %v4949_v4, 4  ;;  %v8000_v30 = vcombine.low %v10820_v28, %v10842_v35  ;;  %5579 = vmatpush1.bf16.msra.mxu0 %v9060_v56 }
 0x3bf   : > { %v4954_v45 = vrot.slane %v4952_v17, 5  ;;  %v4815_v40 = vrot.slane %v4813_v41, 7  ;;  %v4821_v55 = vshrl.u32 %v8358_v59, 16  ;;  %v4824_v15 = vshll.u32 %v8358_v59, 16  ;;  %8017 = vmatprep.mubr.msk.bf16.mxu0 %vm2628_vm4, %v8001_v23  ;;  %5580 = vmatprep.subr.bf16.mxu0 %v9160_v1  ;;  %v4886_v56 = vld [vmem:[#allocation3 + $0x80] sm:$0xf] }
 0x3c0   : > { %v4985_v22 = vshrl.u32 %v10855_v52, 16  ;;  %v4959_v27 = vrot.slane %v4957_v16, 4  ;;  %v4962_v39 = vrot.slane %v4960_v9, 5  ;;  %v4966_v13 = vshll.u32 %v10857_v18, 16  ;;  %v4889_v4 = vld [vmem:[#allocation3 + $0x88] sm:$0x1] }
 0x3c1   : > { %v4955_v36 = vsel %vm9430_vm15, %v10859_v24, %v4954_v45  ;;  %v4818_v50 = vor.u32 %v4816_v53, %v4815_v40  ;;  %v4819_v26 = vrot.slane %v4815_v40, 4  ;;  %v4823_v51 = vrot.slane %v4821_v55, 7  ;;  %5375 = vmatmul.mubr.bf16.gmra.mrb[12].mxu0 %v8000_v30  ;;  %v10900_v45 = vld [vmem:[#allocation3 + $0x48] sm:$0x11] }
 0x3c2   : > { %v7976_v34 = vcombine.low %v10804_v8, %v4955_v36  ;;  %v7977_v61 = vcombine.high %v10804_v8, %v4955_v36  ;;  %v10875_v3 = vld [vmem:[#allocation3 + $0x50] sm:$0xff]  ;;  %v4988_v46 = vshll.u32 %v10855_v52, 16  ;;  %v4963_v16 = vor.u32 %v4962_v39, %v4959_v27  ;;  %5581 = vmatpush1.bf16.msra.mxu0 %v9064_v37  ;;  %v9065_v8 = vld [vmem:[%s11641_s7 + $0xb8] sm:$0xff]   ;;  %v10902_v30 = vld [vmem:[#allocation3 + $0x58] sm:$0x11] }
 0x3c3   : > { %v4973_v57 = vrot.slane %v4971_v20, 4  ;;  %v4881_v25 = vsel %vm9896_vm8, %v4818_v50, %v4880_v21  ;;  %v4884_v11 = vsel %vm9903_vm9, %v4819_v26, %v4883_v38  ;;  %v4826_v12 = vor.u32 %v4824_v15, %v4823_v51  ;;  %5582 = vmatprep.subr.bf16.mxu0 %v9160_v1  ;;  %v9068_v36 = vld [vmem:[%s11641_s7 + $0xc0] sm:$0xff]  }
 0x3c4   : > { %v4827_v29 = vrot.slane %v4823_v51, 4  ;;  %4885 = vst [vmem:[#allocation3 + $0x78] sm:$0x1] %v4884_v11  ;;  %4882 = vst [vmem:[#allocation3 + $0x70] sm:$0xf] %v4881_v25  ;;  %7994 = vmatprep.mubr.msk.bf16.mxu1 %vm2628_vm4, %v7977_v61  ;;  %v4999_v17 = vshrl.u32 %v10875_v3, 16  ;;  %v8003_v5 = vcombine.high %v10855_v52, %v10875_v3  ;;  %v8002_v31 = vcombine.low %v10855_v52, %v10875_v3 }
 0x3c5   : > { %v5002_v44 = vshll.u32 %v10875_v3, 16  ;;  %v4968_v9 = vrot.slane %v4966_v13, 5  ;;  %v10893_v20 = vld [vmem:[#allocation3 + $0x60] sm:$0xff]  ;;  %v4887_v41 = vsel %vm9896_vm8, %v4826_v12, %v4886_v56  ;;  %5194 = vmatmul.mubr.bf16.vlgmr.msra.gmra.mrb[24].mxu1 %v7976_v34  ;;  %v4976_v23 = vrot.slane %v4974_v33, 5  ;;  %v5400_v33 = vld [vmem:[#allocation3 + $0x10] sm:$0xee] }
 0x3c6   : > { %v4890_v59 = vsel %vm9903_vm9, %v4827_v29, %v4889_v4  ;;  %v4980_v53 = vshll.u32 %v10878_v42, 16  ;;  %4888 = vst [vmem:[#allocation3 + $0x80] sm:$0xf] %v4887_v41  ;;  %8018 = vmatprep.mubr.msk.bf16.mxu0 %vm2628_vm4, %v8003_v5  ;;  %v10905_v40 = vrot.slane %v4963_v16, 4  ;;  %v5013_v2 = vshrl.u32 %v10893_v20, 16  ;;  %5583 = vmatpush1.bf16.msra.mxu0 %v9065_v8 }
 0x3c7   : > { %4891 = vst [vmem:[#allocation3 + $0x88] sm:$0x1] %v4890_v59  ;;  %v5016_v55 = vshll.u32 %v10893_v20, 16  ;;  %v4977_v15 = vor.u32 %v4976_v23, %v4973_v57  ;;  %v4987_v27 = vrot.slane %v4985_v22, 4  ;;  %v4990_v39 = vrot.slane %v4988_v46, 5  ;;  %5584 = vmatprep.subr.bf16.mxu0 %v9160_v1  ;;  %v9069_v22 = vld [vmem:[%s11641_s7 + $0xc8] sm:$0xff]  }
 0x3c8   : > { %v4982_v37 = vrot.slane %v4980_v53, 5  ;;  %v4994_v13 = vshll.u32 %v10900_v45, 16  ;;  %v5001_v50 = vrot.slane %v4999_v17, 4  ;;  %v5004_v26 = vrot.slane %v5002_v44, 5  ;;  %v10941_v56 = vld [vmem:[#allocation3 + $0x68] sm:$0x11] }
 0x3c9   : > { %v5008_v21 = vshll.u32 %v10902_v30, 16  ;;  %v10917_v38 = vrot.slane %v4977_v15, 4  ;;  %v4991_v51 = vor.u32 %v4990_v39, %v4987_v27  ;;  %v8021_v34 = vrot.slane %v5400_v33, 9  ;;  %5383 = vmatmul.mubr.bf16.gmra.mrb[16].mxu0 %v8002_v31 }
 0x3ca   : > { %v5429_v61 = vrot.slane %v10830_v14, 5  ;;  %v4969_v16 = vsel %vm9430_vm15, %v10905_v40, %v4968_v9  ;;  %v5005_v46 = vor.u32 %v5004_v26, %v5001_v50  ;;  %v10932_v57 = vsel %vm9337_vm12, %v8020_v58, %v5425_v19  ;;  %5585 = vmatpush1.bf16.msra.mxu0 %v9068_v36  ;;  %v9073_v50 = vld [vmem:[%s11641_s7 + $0xd8] sm:$0xff]  }
 0x3cb   : > { %v5015_v25 = vrot.slane %v5013_v2, 4  ;;  %v4983_v14 = vsel %vm9430_vm15, %v10917_v38, %v4982_v37  ;;  %v10937_v11 = vld [vmem:[#allocation3 + $0x70] sm:$0xff]  ;;  %v10939_v12 = vrot.slane %v4991_v51, 4  ;;  %v4996_v29 = vrot.slane %v4994_v13, 5  ;;  %5586 = vmatprep.subr.bf16.mxu0 %v9160_v1  ;;  %v10946_v4 = vld [vmem:[#allocation3 + $0x78] sm:$0x11] }
 0x3cc   : > { %v5018_v47 = vrot.slane %v5016_v55, 5  ;;  %v7979_v8 = vcombine.high %v4969_v16, %v4983_v14  ;;  %v7978_v32 = vcombine.low %v4969_v16, %v4983_v14  ;;  %v5027_v19 = vshrl.u32 %v10937_v11, 16  ;;  %v9072_v2 = vld [vmem:[%s11641_s7 + $0xd0] sm:$0xff]   ;;  %v10990_v16 = vld [vmem:[#allocation3 + $0x18] sm:$0x11] }
 0x3cd   : > { %v5030_v58 = vshll.u32 %v10937_v11, 16  ;;  %v8005_v17 = vcombine.high %v10893_v20, %v10937_v11  ;;  %v10950_v44 = vrot.slane %v5005_v46, 4  ;;  %v5010_v5 = vrot.slane %v5008_v21, 5  ;;  %v9074_v46 = vld [vmem:[%s11641_s7 + $0xe0] sm:$0xff]  }
 0x3ce   : > { %v10954_v9 = vsel %vm9337_vm12, %v8021_v34, %v5429_v61  ;;  %7995 = vmatprep.mubr.msk.bf16.mxu1 %vm2628_vm4, %v7979_v8  ;;  %v4997_v41 = vsel %vm9430_vm15, %v10939_v12, %v4996_v29  ;;  %v8004_v59 = vcombine.low %v10893_v20, %v10937_v11  ;;  %v5019_v23 = vor.u32 %v5018_v47, %v5015_v25  ;;  %v5401_v25 = vld [vmem:[#allocation3 + $0x20] sm:$0xee]  ;;  %v5402_v14 = vld [vmem:[#allocation3 + $0x30] sm:$0xee]  ;;  %v10995_v29 = vld [vmem:[#allocation3 + $0x28] sm:$0x11] }
 0x3cf   : > { %v5022_v53 = vshll.u32 %v10941_v56, 16  ;;  %5202 = vmatmul.mubr.bf16.gmra.mrb[28].mxu1 %v7978_v32  ;;  %5587 = vmatpush1.bf16.msra.mxu0 %v9069_v22  ;;  %v5011_v31 = vsel %vm9430_vm15, %v10950_v44, %v5010_v5  ;;  %v5029_v55 = vrot.slane %v5027_v19, 4  ;;  %v5032_v33 = vrot.slane %v5030_v58, 5  ;;  %v11004_v19 = vld [vmem:[#allocation3 + $0x38] sm:$0x11] }
 0x3d0   : > { %v5036_v15 = vshll.u32 %v10946_v4, 16  ;;  %8019 = vmatprep.mubr.msk.bf16.mxu0 %vm2628_vm4, %v8005_v17  ;;  %5588 = vmatprep.subr.bf16.mxu0 %v9160_v1  ;;  %v7981_v37 = vcombine.high %v4997_v41, %v5011_v31  ;;  %v8049_v36 = vcombine.high %v10932_v57, %v10954_v9  ;;  %v10974_v27 = vrot.slane %v5019_v23, 4  ;;  %v11006_v58 = vld [vmem:[#allocation3 + $0x48] sm:$0x11] }
 0x3d1   : > { %v5033_v39 = vor.u32 %v5032_v33, %v5029_v55  ;;  %5391 = vmatmul.mubr.bf16.gmra.mrb[20].mxu0 %v8004_v59  ;;  %v7980_v13 = vcombine.low %v4997_v41, %v5011_v31  ;;  %v5024_v26 = vrot.slane %v5022_v53, 5  ;;  %v8090_v47 = vcombine.low %v10800_v10, %v10820_v28  ;;  %v11014_v59 = vld [vmem:[#allocation3 + $0x58] sm:$0x11]  ;;  %v11016_v23 = vld [vmem:[#allocation3 + $0x68] sm:$0x11] }
 0x3d2   : > { %7996 = vmatprep.mubr.msk.bf16.mxu1 %vm2628_vm4, %v7981_v37  ;;  %8066 = vmatprep.mubr.msk.bf16.mxu0 %vm2628_vm4, %v8049_v36  ;;  %v5038_v51 = vrot.slane %v5036_v15, 5  ;;  %v8093_v8 = vcombine.high %v10842_v35, %v10855_v52  ;;  %v5885_v32 = vshll.u32 %v10990_v16, 16  ;;  %v8092_v17 = vcombine.low %v10842_v35, %v10855_v52  ;;  %v9075_v15 = vld [vmem:[%s11641_s7 + $0xe8] sm:$0xff]   ;;  %v9097_v35 = vld [vmem:[%s11641_s7 + $0x160] sm:$0xff]  }
 0x3d3   : > { %5589 = vmatpush1.bf16.msra.mxu0 %v9072_v2  ;;  %v10981_v21 = vrot.slane %v5033_v39, 4  ;;  %v5025_v34 = vsel %vm9430_vm15, %v10974_v27, %v5024_v26  ;;  %v8095_v5 = vcombine.high %v10875_v3, %v10893_v20  ;;  %v8094_v41 = vcombine.low %v10875_v3, %v10893_v20  ;;  %v9101_v3 = vld [vmem:[%s11641_s7 + $0x178] sm:$0xff]   ;;  %v9102_v20 = vld [vmem:[%s11641_s7 + $0x180] sm:$0xff]  }
 0x3d4   : > { %5590 = vmatprep.subr.bf16.mxu0 %v9160_v1  ;;  %v8022_v53 = vrot.slane %v5401_v25, 9  ;;  %v5433_v31 = vrot.slane %v10857_v18, 5  ;;  %v8023_v2 = vrot.slane %v5402_v14, 9  ;;  %v5437_v55 = vrot.slane %v10878_v42, 5 }
 0x3d5   : > { %v5039_v61 = vsel %vm9430_vm15, %v10981_v21, %v5038_v51  ;;  %v5899_v37 = vshll.u32 %v10995_v29, 16  ;;  %v5913_v36 = vshll.u32 %v11004_v19, 16  ;;  %v5927_v39 = vshll.u32 %v11006_v58, 16 }
 0x3d6   : > { %v7983_v22 = vcombine.high %v5025_v34, %v5039_v61  ;;  %v7982_v33 = vcombine.low %v5025_v34, %v5039_v61  ;;  %v5941_v18 = vshll.u32 %v11014_v59, 16  ;;  %v8048_v42 = vcombine.low %v10932_v57, %v10954_v9  ;;  %v9076_v57 = vld [vmem:[%s11641_s7 + $0xf0] sm:$0xff]   ;;  %v5404_v9 = vld [vmem:[#allocation3 + $0x50] sm:$0xee] }
 0x3d7   : > { %5210 = vmatmul.mubr.bf16.gmra.mrb[32].mxu1 %v7980_v13  ;;  %5591 = vmatpush1.bf16.msra.mxu0 %v9073_v50  ;;  %v5887_v13 = vrot.slane %v5885_v32, 5  ;;  %v5955_v50 = vshll.u32 %v11016_v23, 16  ;;  %v5901_v26 = vrot.slane %v5899_v37, 5  ;;  %v5915_v51 = vrot.slane %v5913_v36, 5 }
 0x3d8   : > { %5592 = vmatprep.subr.bf16.mxu0 %v9160_v1  ;;  %7997 = vmatprep.mubr.msk.bf16.mxu1 %vm2628_vm4, %v7983_v22  ;;  %v5929_v34 = vrot.slane %v5927_v39, 5  ;;  %v5434_v61 = vsel %vm9337_vm12, %v8022_v53, %v5433_v31  ;;  %v5438_v22 = vsel %vm9337_vm12, %v8023_v2, %v5437_v55  ;;  %v5943_v25 = vrot.slane %v5941_v18, 5 }
 0x3d9   : > { %v11046_v14 = vsel %vm9430_vm15, %v10905_v40, %v5901_v26  ;;  %v11051_v32 = vsel %vm9430_vm15, %v10917_v38, %v5915_v51  ;;  %v5957_v53 = vrot.slane %v5955_v50, 5  ;;  %v8051_v55 = vcombine.high %v5434_v61, %v5438_v22  ;;  %v9078_v50 = vld [vmem:[%s11641_s7 + $0x100] sm:$0xff]  }
 0x3da   : > { %v8025_v37 = vrot.slane %v5404_v9, 9  ;;  %v5445_v36 = vrot.slane %v10902_v30, 5  ;;  %v5441_v18 = vrot.slane %v10900_v45, 5  ;;  %v8050_v26 = vcombine.low %v5434_v61, %v5438_v22  ;;  %v9079_v9 = vld [vmem:[%s11641_s7 + $0x108] sm:$0xff]  }
 0x3db   : > { %5593 = vmatpush1.bf16.msra.mxu0 %v9074_v46  ;;  %v11038_v46 = vsel %vm9430_vm15, %v10859_v24, %v5887_v13  ;;  %v11056_v24 = vsel %vm9430_vm15, %v10939_v12, %v5929_v34  ;;  %v11070_v12 = vsel %vm9430_vm15, %v10950_v44, %v5943_v25  ;;  %v9077_v44 = vld [vmem:[%s11641_s7 + $0xf8] sm:$0xff]   ;;  %v5405_v25 = vld [vmem:[#allocation3 + $0x60] sm:$0xee]  ;;  %v5453_v45 = vrot.slane %v10946_v4, 5 }
 0x3dc   : > { %5594 = vmatprep.subr.bf16.mxu0 %v9160_v1  ;;  %v8132_v31 = vcombine.low %v11038_v46, %v11046_v14  ;;  %v8133_v40 = vcombine.high %v11038_v46, %v11046_v14  ;;  %v8135_v2 = vcombine.high %v11051_v32, %v11056_v24  ;;  %v8134_v38 = vcombine.low %v11051_v32, %v11056_v24  ;;  %v9080_v4 = vld [vmem:[%s11641_s7 + $0x110] sm:$0xff]   ;;  %v9106_v46 = vld [vmem:[%s11641_s7 + $0x1a0] sm:$0xff]   ;;  %v11225_v14 = vld [vmem:[#allocation3 + $0x78] sm:$0x11] }
 0x3dd   : > { %v5446_v30 = vsel %vm9337_vm12, %v8025_v37, %v5445_v36  ;;  %v8026_v61 = vrot.slane %v5405_v25, 9  ;;  %v5449_v22 = vrot.slane %v10941_v56, 5  ;;  %v9081_v56 = vld [vmem:[%s11641_s7 + $0x118] sm:$0xff]   ;;  %v9082_v36 = vld [vmem:[%s11641_s7 + $0x120] sm:$0xff]   ;;  %v9108_v24 = vld [vmem:[%s11641_s7 + $0x1b0] sm:$0xff]  }
 0x3df   : > { %5218 = vmatmul.mubr.bf16.gmra.mrb[36].mxu1 %v7982_v33  ;;  %5595 = vmatpush1.bf16.msra.mxu0 %v9075_v15  ;;  %v5403_v33 = vld [vmem:[#allocation3 + $0x40] sm:$0xee]  ;;  %v11075_v15 = vsel %vm9430_vm15, %v10974_v27, %v5957_v53 }
 0x3e0   : > { %5786 = vmatprep.subr.bf16.mxu0 %v9160_v1  ;;  %v8137_v39 = vcombine.high %v11070_v12, %v11075_v15  ;;  %v8136_v13 = vcombine.low %v11070_v12, %v11075_v15  ;;  %v8024_v27 = vrot.slane %v5403_v33, 9  ;;  %v5450_v33 = vsel %vm9337_vm12, %v8026_v61, %v5449_v22  ;;  %v9107_v22 = vld [vmem:[%s11641_s7 + $0x1a8] sm:$0xff]  }
 0x3e2   : > { %5609 = vmatmul.mubr.bf16.vlgmr.msra.gmra.mrb[8].mxu0 %v8048_v42  ;;  %v5406_v42 = vld [vmem:[#allocation3 + $0x70] sm:$0xee]  ;;  %v5442_v51 = vsel %vm9337_vm12, %v8024_v27, %v5441_v18  ;;  %v8091_v27 = vcombine.high %v10800_v10, %v10820_v28  ;;  %v9085_v18 = vld [vmem:[%s11641_s7 + $0x128] sm:$0xff]   ;;  %v9094_v10 = vld [vmem:[%s11641_s7 + $0x158] sm:$0xff]  }
 0x3e3   : > { %8067 = vmatprep.mubr.msk.bf16.mxu0 %vm2628_vm4, %v8051_v55  ;;  %5787 = vmatpush1.bf16.msra.mxu0 %v9076_v57  ;;  %v8053_v34 = vcombine.high %v5442_v51, %v5446_v30  ;;  %v8027_v57 = vrot.slane %v5406_v42, 9  ;;  %v8052_v55 = vcombine.low %v5442_v51, %v5446_v30  ;;  %v9086_v30 = vld [vmem:[%s11641_s7 + $0x130] sm:$0xff]   ;;  %v9089_v42 = vld [vmem:[%s11641_s7 + $0x140] sm:$0xff]  }
 0x3e4   : > { %5788 = vmatprep.subr.bf16.mxu0 %v9160_v1  ;;  %v9093_v51 = vld [vmem:[%s11641_s7 + $0x150] sm:$0xff]  }
 0x3e5   : > { %v5454_v53 = vsel %vm9337_vm12, %v8027_v57, %v5453_v45  ;;  %v11165_v28 = vld [vmem:[#allocation3 + $0x80] sm:$0xff]  ;;  %v9105_v57 = vld [vmem:[%s11641_s7 + $0x198] sm:$0xff]  }
 0x3e6   : > { %v8055_v37 = vcombine.high %v5450_v33, %v5454_v53  ;;  %v8097_v52 = vcombine.high %v10937_v11, %v11165_v28  ;;  %v11220_v45 = vld [vmem:[#allocation3 + $0x88] sm:$0x11] }
 0x3e7   : > { %5789 = vmatpush1.bf16.msra.mxu0 %v9077_v44  ;;  %v8054_v44 = vcombine.low %v5450_v33, %v5454_v53  ;;  %v6181_v33 = vld [vmem:[#allocation3 + $0x10] sm:$0xee] }
 0x3e8   : > { %5790 = vmatprep.subr.bf16.mxu0 %v9160_v1 }
 0x3ea   : > { %5617 = vmatmul.mubr.bf16.gmra.mrb[12].mxu0 %v8050_v26  ;;  %v9090_v26 = vld [vmem:[%s11641_s7 + $0x148] sm:$0xff]  }
 0x3eb   : > { %8068 = vmatprep.mubr.msk.bf16.mxu0 %vm2628_vm4, %v8053_v34  ;;  %5791 = vmatpush1.bf16.msra.mxu0 %v9078_v50  ;;  %v9087_v50 = vld [vmem:[%s11641_s7 + $0x138] sm:$0xff]  }
 0x3ec   : > { %5792 = vmatprep.subr.bf16.mxu0 %v9160_v1 }
 0x3ef   : > { %5793 = vmatpush1.bf16.msra.mxu0 %v9079_v9 }
 0x3f0   : > { %5794 = vmatprep.subr.bf16.mxu0 %v9160_v1 }
 0x3f2   : > { %5625 = vmatmul.mubr.bf16.gmra.mrb[16].mxu0 %v8052_v55 }
 0x3f3   : > { %8069 = vmatprep.mubr.msk.bf16.mxu0 %vm2628_vm4, %v8055_v37  ;;  %5795 = vmatpush1.bf16.msra.mxu0 %v9080_v4 }
 0x3f4   : > { %5796 = vmatprep.subr.bf16.mxu0 %v9160_v1 }
 0x3f7   : > { %5797 = vmatpush1.bf16.msra.mxu0 %v9081_v56  ;;  %v6211_v56 = vrot.slane %v10995_v29, 5  ;;  %v9110_v29 = vld [vmem:[%s11641_s7 + $0x1c0] sm:$0xff]  }
 0x3f8   : > { %5798 = vmatprep.subr.bf16.mxu0 %v9160_v1 }
 0x3fa   : > { %5633 = vmatmul.mubr.bf16.gmra.mrb[20].mxu0 %v8054_v44  ;;  %v8154_v44 = vrot.slane %v6181_v33, 9  ;;  %v9120_v33 = vld [vmem:[%s11641_s7 + $0x210] sm:$0xff]  }
 0x3fb   : > { %5799 = vmatpush1.bf16.msra.mxu0 %v9082_v36  ;;  %8108 = vmatprep.mubr.msk.bf16.mxu0 %vm2628_vm4, %v8091_v27  ;;  %v9109_v36 = vld [vmem:[%s11641_s7 + $0x1b8] sm:$0xff]  }
 0x3fc   : > { %5800 = vmatprep.subr.bf16.mxu0 %v9160_v1 }
 0x3ff   : > { %5801 = vmatpush1.bf16.msra.mxu0 %v9085_v18  ;;  %v9112_v18 = vld [vmem:[%s11641_s7 + $0x1d0] sm:$0xff]  }
 0x400   : > { %5802 = vmatprep.subr.bf16.mxu0 %v9160_v1 }
 0x403   : > { %5803 = vmatpush1.bf16.msra.mxu0 %v9086_v30  ;;  %v6184_v30 = vld [vmem:[#allocation3 + $0x40] sm:$0xee] }
 0x404   : > { %5804 = vmatprep.subr.bf16.mxu0 %v9160_v1 }
 0x407   : > { %5805 = vmatpush1.bf16.msra.mxu0 %v9087_v50  ;;  %v6183_v50 = vld [vmem:[#allocation3 + $0x30] sm:$0xee] }
 0x408   : > { %6108 = vmatprep.subr.bf16.mxu0 %v9160_v1 }
 0x40a   : > { %5819 = vmatmul.mubr.bf16.vlgmr.msra.gmra.mrb[8].mxu0 %v8090_v47  ;;  %v9098_v47 = vld [vmem:[%s11641_s7 + $0x168] sm:$0xff]  }
 0x40b   : > { %8109 = vmatprep.mubr.msk.bf16.mxu0 %vm2628_vm4, %v8093_v8  ;;  %6109 = vmatpush1.bf16.msra.mxu0 %v9089_v42  ;;  %v9100_v8 = vld [vmem:[%s11641_s7 + $0x170] sm:$0xff]   ;;  %v8157_v42 = vrot.slane %v6184_v30, 9  ;;  %v11361_v30 = vld [vmem:[#allocation3 + $0x70] sm:$0xff] }
 0x40c   : > { %6110 = vmatprep.subr.bf16.mxu0 %v9160_v1 }
 0x40f   : > { %6111 = vmatpush1.bf16.msra.mxu0 %v9090_v26  ;;  %v6219_v26 = vrot.slane %v11006_v58, 5 }
 0x410   : > { %6112 = vmatprep.subr.bf16.mxu0 %v9160_v1 }
 0x412   : > { %5827 = vmatmul.mubr.bf16.gmra.mrb[12].mxu0 %v8092_v17  ;;  %v8096_v17 = vcombine.low %v10937_v11, %v11165_v28  ;;  %v9103_v11 = vld [vmem:[%s11641_s7 + $0x188] sm:$0xff]  }
 0x413   : > { %8110 = vmatprep.mubr.msk.bf16.mxu0 %vm2628_vm4, %v8095_v5  ;;  %6113 = vmatpush1.bf16.msra.mxu0 %v9093_v51  ;;  %v5974_v5 = vshrl.u32 %v11165_v28, 16  ;;  %v9113_v51 = vld [vmem:[%s11641_s7 + $0x1d8] sm:$0xff]  }
 0x414   : > { %6114 = vmatprep.subr.bf16.mxu0 %v9160_v1 }
 0x415   : > { %v5976_v34 = vrot.slane %v5974_v5, 4  ;;  %v9115_v5 = vld [vmem:[%s11641_s7 + $0x1e8] sm:$0xff]  }
 0x417   : > { %6115 = vmatpush1.bf16.msra.mxu0 %v9094_v10  ;;  %v8156_v10 = vrot.slane %v6183_v50, 9 }
 0x418   : > { %6116 = vmatprep.subr.bf16.mxu0 %v9160_v1 }
 0x41a   : > { %5835 = vmatmul.mubr.bf16.gmra.mrb[16].mxu0 %v8094_v41  ;;  %v5977_v41 = vshll.u32 %v11165_v28, 16 }
 0x41b   : > { %8111 = vmatprep.mubr.msk.bf16.mxu0 %vm2628_vm4, %v8097_v52  ;;  %6117 = vmatpush1.bf16.msra.mxu0 %v9097_v35  ;;  %v6215_v35 = vrot.slane %v11004_v19, 5  ;;  %v6220_v52 = vsel %vm9337_vm12, %v8157_v42, %v6219_v26  ;;  %v6227_v19 = vrot.slane %v11016_v23, 5  ;;  %v9116_v23 = vld [vmem:[%s11641_s7 + $0x1f0] sm:$0xff]   ;;  %v9131_v26 = vld [vmem:[%s11641_s7 + $0x240] sm:$0xff]  }
 0x41c   : > { %6118 = vmatprep.subr.bf16.mxu0 %v9160_v1  ;;  %v5979_v25 = vrot.slane %v5977_v41, 5 }
 0x41e   : > { %v5980_v9 = vor.u32 %v5979_v25, %v5976_v34  ;;  %v6188_v25 = vld [vmem:[#allocation3 + $0x80] sm:$0xee] }
 0x41f   : > { %6119 = vmatpush1.bf16.msra.mxu0 %v9098_v47  ;;  %v9114_v47 = vld [vmem:[%s11641_s7 + $0x1e0] sm:$0xff]  }
 0x420   : > { %6120 = vmatprep.subr.bf16.mxu0 %v9160_v1  ;;  %v11233_v61 = vrot.slane %v5980_v9, 4 }
 0x422   : > { %5843 = vmatmul.mubr.bf16.gmra.mrb[20].mxu0 %v8096_v17  ;;  %v6216_v17 = vsel %vm9337_vm12, %v8156_v10, %v6215_v35  ;;  %v11369_v10 = vld [vmem:[#allocation3 + $0x60] sm:$0xff] }
 0x423   : > { %6121 = vmatpush1.bf16.msra.mxu0 %v9100_v8  ;;  %8150 = vmatprep.mubr.msk.bf16.mxu0 %vm2628_vm4, %v8133_v40  ;;  %v9104_v40 = vld [vmem:[%s11641_s7 + $0x190] sm:$0xff]  }
 0x424   : > { %6122 = vmatprep.subr.bf16.mxu0 %v9160_v1  ;;  %v6186_v8 = vld [vmem:[#allocation3 + $0x60] sm:$0xee] }
 0x427   : > { %6123 = vmatpush1.bf16.msra.mxu0 %v9101_v3  ;;  %v8185_v3 = vcombine.high %v6216_v17, %v6220_v52 }
 0x428   : > { %6124 = vmatprep.subr.bf16.mxu0 %v9160_v1 }
 0x42b   : > { %6125 = vmatpush1.bf16.msra.mxu0 %v9102_v20  ;;  %v6185_v20 = vld [vmem:[#allocation3 + $0x50] sm:$0xee] }
 0x42c   : > { %6126 = vmatprep.subr.bf16.mxu0 %v9160_v1  ;;  %v8158_v41 = vrot.slane %v6185_v20, 9 }
 0x42f   : > { %6127 = vmatpush1.bf16.msra.mxu0 %v9103_v11  ;;  %v8159_v11 = vrot.slane %v6186_v8, 9 }
 0x430   : > { %6358 = vmatprep.subr.bf16.mxu0 %v9160_v1 }
 0x431   : > { %v6228_v34 = vsel %vm9337_vm12, %v8159_v11, %v6227_v19  ;;  %v11378_v11 = vld [vmem:[#allocation3 + $0x38] sm:$0x11]  ;;  %v11380_v19 = vld [vmem:[#allocation3 + $0x90] sm:$0xff] }
 0x432   : > { %6141 = vmatmul.mubr.bf16.vlgmr.msra.gmra.mrb[8].mxu0 %v8132_v31  ;;  %v5983_v31 = vshll.u32 %v11220_v45, 16 }
 0x433   : > { %8151 = vmatprep.mubr.msk.bf16.mxu0 %vm2628_vm4, %v8135_v2  ;;  %6359 = vmatpush1.bf16.msra.mxu0 %v9104_v40  ;;  %v5969_v2 = vshll.u32 %v11225_v14, 16  ;;  %v6223_v40 = vrot.slane %v11014_v59, 5  ;;  %v6235_v59 = vrot.slane %v11220_v45, 5  ;;  %v9118_v45 = vld [vmem:[%s11641_s7 + $0x200] sm:$0xff]  }
 0x434   : > { %6360 = vmatprep.subr.bf16.mxu0 %v9160_v1  ;;  %v5985_v53 = vrot.slane %v5983_v31, 5  ;;  %v6187_v31 = vld [vmem:[#allocation3 + $0x70] sm:$0xee] }
 0x435   : > { %v5971_v4 = vrot.slane %v5969_v2, 5  ;;  %v6224_v9 = vsel %vm9337_vm12, %v8158_v41, %v6223_v40  ;;  %v8161_v2 = vrot.slane %v6188_v25, 9  ;;  %v9135_v41 = vld [vmem:[%s11641_s7 + $0x250] sm:$0xff]   ;;  %v11385_v40 = vld [vmem:[#allocation3 + $0x28] sm:$0x11]  ;;  %v6681_v25 = vshll.u32 %v11378_v11, 16 }
 0x436   : > { %v5986_v32 = vsel %vm9430_vm15, %v11233_v61, %v5985_v53  ;;  %v8160_v53 = vrot.slane %v6187_v31, 9  ;;  %v9136_v31 = vld [vmem:[%s11641_s7 + $0x258] sm:$0xff]  }
 0x437   : > { %6361 = vmatpush1.bf16.msra.mxu0 %v9105_v57  ;;  %v8184_v57 = vcombine.low %v6216_v17, %v6220_v52  ;;  %v9132_v17 = vld [vmem:[%s11641_s7 + $0x248] sm:$0xff]  }
 0x438   : > { %6362 = vmatprep.subr.bf16.mxu0 %v9160_v1 }
 0x43a   : > { %6149 = vmatmul.mubr.bf16.gmra.mrb[12].mxu0 %v8134_v38  ;;  %v6182_v38 = vld [vmem:[#allocation3 + $0x20] sm:$0xee] }
 0x43b   : > { %8152 = vmatprep.mubr.msk.bf16.mxu0 %vm2628_vm4, %v8137_v39  ;;  %6363 = vmatpush1.bf16.msra.mxu0 %v9106_v46  ;;  %v5972_v39 = vsel %vm9430_vm15, %v10981_v21, %v5971_v4  ;;  %v8155_v37 = vrot.slane %v6182_v38, 9  ;;  %v6207_v21 = vrot.slane %v10990_v16, 5  ;;  %v9111_v16 = vld [vmem:[%s11641_s7 + $0x1c8] sm:$0xff]   ;;  %v8187_v46 = vcombine.high %v6224_v9, %v6228_v34 }
 0x43c   : > { %6364 = vmatprep.subr.bf16.mxu0 %v9160_v1  ;;  %v8139_v55 = vcombine.high %v5972_v39, %v5986_v32  ;;  %v8138_v12 = vcombine.low %v5972_v39, %v5986_v32  ;;  %v6231_v4 = vrot.slane %v11225_v14, 5  ;;  %v6236_v32 = vsel %vm9337_vm12, %v8161_v2, %v6235_v59  ;;  %v9119_v14 = vld [vmem:[%s11641_s7 + $0x208] sm:$0xff]  }
 0x43d   : > { %v6212_v27 = vsel %vm9337_vm12, %v8155_v37, %v6211_v56  ;;  %v6208_v15 = vsel %vm9337_vm12, %v8154_v44, %v6207_v21  ;;  %v6431_v56 = vld [vmem:[#allocation3 + $0x20] sm:$0xff]  ;;  %v9123_v44 = vld [vmem:[%s11641_s7 + $0x218] sm:$0xff]   ;;  %v9124_v21 = vld [vmem:[%s11641_s7 + $0x220] sm:$0xff]   ;;  %v6683_v59 = vrot.slane %v6681_v25, 5 }
 0x43e   : > { %v8182_v58 = vcombine.low %v6208_v15, %v6212_v27  ;;  %v6232_v38 = vsel %vm9337_vm12, %v8160_v53, %v6231_v4  ;;  %v6658_v35 = vshrl.u32 %v6431_v56, 16  ;;  %v6661_v52 = vshll.u32 %v6431_v56, 16  ;;  %v11447_v25 = vld [vmem:[#allocation3 + $0x78] sm:$0x11] }
 0x43f   : > { %6365 = vmatpush1.bf16.msra.mxu0 %v9107_v22  ;;  %v9117_v22 = vld [vmem:[%s11641_s7 + $0x1f8] sm:$0xff]   ;;  %v8189_v39 = vcombine.high %v6232_v38, %v6236_v32  ;;  %v8188_v37 = vcombine.low %v6232_v38, %v6236_v32  ;;  %v8230_v38 = vcombine.low %v11165_v28, %v11380_v19 }
 0x440   : > { %6366 = vmatprep.subr.bf16.mxu0 %v9160_v1  ;;  %v6663_v20 = vrot.slane %v6661_v52, 5 }
 0x442   : > { %6157 = vmatmul.mubr.bf16.gmra.mrb[16].mxu0 %v8136_v13  ;;  %v8183_v13 = vcombine.high %v6208_v15, %v6212_v27  ;;  %v9125_v27 = vld [vmem:[%s11641_s7 + $0x228] sm:$0xff]  }
 0x443   : > { %8153 = vmatprep.mubr.msk.bf16.mxu0 %vm2628_vm4, %v8139_v55  ;;  %6367 = vmatpush1.bf16.msra.mxu0 %v9108_v24  ;;  %v8186_v24 = vcombine.low %v6224_v9, %v6228_v34  ;;  %v6432_v55 = vld [vmem:[#allocation3 + $0x30] sm:$0xff]  ;;  %v8228_v34 = vcombine.low %v11369_v10, %v11361_v30  ;;  %v6667_v9 = vshll.u32 %v11385_v40, 16 }
 0x444   : > { %6368 = vmatprep.subr.bf16.mxu0 %v9160_v1  ;;  %v8224_v15 = vcombine.low %v6431_v56, %v6432_v55  ;;  %v6672_v50 = vshrl.u32 %v6432_v55, 16  ;;  %v6675_v42 = vshll.u32 %v6432_v55, 16 }
 0x446   : > { %v6674_v8 = vrot.slane %v6672_v50, 4  ;;  %v11432_v50 = vld [vmem:[#allocation3 + $0x48] sm:$0x11] }
 0x447   : > { %6369 = vmatpush1.bf16.msra.mxu0 %v9109_v36  ;;  %v8225_v36 = vcombine.high %v6431_v56, %v6432_v55 }
 0x448   : > { %6370 = vmatprep.subr.bf16.mxu0 %v9160_v1 }
 0x44a   : > { %6165 = vmatmul.mubr.bf16.gmra.mrb[20].mxu0 %v8138_v12  ;;  %v9127_v12 = vld [vmem:[%s11641_s7 + $0x230] sm:$0xff]  }
 0x44b   : > { %6371 = vmatpush1.bf16.msra.mxu0 %v9110_v29  ;;  %8200 = vmatprep.mubr.msk.bf16.mxu0 %vm2628_vm4, %v8183_v13  ;;  %v11346_v29 = vld [vmem:[#allocation3 + $0x50] sm:$0xff]  ;;  %v11352_v13 = vld [vmem:[#allocation3 + $0x40] sm:$0xff] }
 0x44c   : > { %6372 = vmatprep.subr.bf16.mxu0 %v9160_v1  ;;  %v6700_v4 = vshrl.u32 %v11346_v29, 16  ;;  %v6703_v32 = vshll.u32 %v11346_v29, 16  ;;  %v6689_v55 = vshll.u32 %v11352_v13, 16 }
 0x44f   : > { %6373 = vmatpush1.bf16.msra.mxu0 %v9111_v16  ;;  %v8227_v16 = vcombine.high %v11352_v13, %v11346_v29 }
 0x450   : > { %6374 = vmatprep.subr.bf16.mxu0 %v9160_v1 }
 0x453   : > { %6375 = vmatpush1.bf16.msra.mxu0 %v9112_v18  ;;  %v9128_v18 = vld [vmem:[%s11641_s7 + $0x238] sm:$0xff]  }
 0x454   : > { %6376 = vmatprep.subr.bf16.mxu0 %v9160_v1 }
 0x457   : > { %6377 = vmatpush1.bf16.msra.mxu0 %v9113_v51  ;;  %v8226_v51 = vcombine.low %v11352_v13, %v11346_v29  ;;  %v6691_v29 = vrot.slane %v6689_v55, 5 }
 0x458   : > { %6568 = vmatprep.subr.bf16.mxu0 %v9160_v1 }
 0x45a   : > { %6391 = vmatmul.mubr.bf16.vlgmr.msra.gmra.mrb[8].mxu0 %v8182_v58  ;;  %v6677_v58 = vrot.slane %v6675_v42, 5 }
 0x45b   : > { %8201 = vmatprep.mubr.msk.bf16.mxu0 %vm2628_vm4, %v8185_v3  ;;  %6569 = vmatpush1.bf16.msra.mxu0 %v9114_v47  ;;  %v8229_v47 = vcombine.high %v11369_v10, %v11361_v30  ;;  %v6660_v3 = vrot.slane %v6658_v35, 4  ;;  %v6717_v35 = vshll.u32 %v11369_v10, 16 }
 0x45c   : > { %6570 = vmatprep.subr.bf16.mxu0 %v9160_v1 }
 0x45f   : > { %6571 = vmatpush1.bf16.msra.mxu0 %v9115_v5  ;;  %v6678_v5 = vor.u32 %v6677_v58, %v6674_v8 }
 0x460   : > { %6572 = vmatprep.subr.bf16.mxu0 %v9160_v1 }
 0x462   : > { %6399 = vmatmul.mubr.bf16.gmra.mrb[12].mxu0 %v8184_v57  ;;  %v8231_v57 = vcombine.high %v11165_v28, %v11380_v19  ;;  %v9139_v28 = vld [vmem:[%s11641_s7 + $0x268] sm:$0xff]  }
 0x463   : > { %8202 = vmatprep.mubr.msk.bf16.mxu0 %vm2628_vm4, %v8187_v46  ;;  %6573 = vmatpush1.bf16.msra.mxu0 %v9116_v23  ;;  %v6664_v23 = vor.u32 %v6663_v20, %v6660_v3  ;;  %v6679_v46 = vrot.slane %v6678_v5, 4  ;;  %v9141_v3 = vld [vmem:[%s11641_s7 + $0x278] sm:$0xff]  }
 0x464   : > { %6574 = vmatprep.subr.bf16.mxu0 %v9160_v1 }
 0x465   : > { %v6665_v2 = vrot.slane %v6664_v23, 4  ;;  %v11401_v53 = vsel %vm9430_vm15, %v6679_v46, %v6683_v59  ;;  %v9142_v59 = vld [vmem:[%s11641_s7 + $0x280] sm:$0xff]  }
 0x467   : > { %6575 = vmatpush1.bf16.msra.mxu0 %v9117_v22  ;;  %v6669_v22 = vrot.slane %v6667_v9, 5 }
 0x468   : > { %6576 = vmatprep.subr.bf16.mxu0 %v9160_v1 }
 0x46a   : > { %6407 = vmatmul.mubr.bf16.gmra.mrb[16].mxu0 %v8186_v24 }
 0x46b   : > { %8203 = vmatprep.mubr.msk.bf16.mxu0 %vm2628_vm4, %v8189_v39  ;;  %6577 = vmatpush1.bf16.msra.mxu0 %v9118_v45  ;;  %v9138_v45 = vld [vmem:[%s11641_s7 + $0x260] sm:$0xff]   ;;  %v6670_v39 = vsel %vm9430_vm15, %v6665_v2, %v6669_v22  ;;  %v6759_v2 = vshll.u32 %v11380_v19, 16  ;;  %v11456_v22 = vld [vmem:[#allocation3 + $0x68] sm:$0x11] }
 0x46c   : > { %6578 = vmatprep.subr.bf16.mxu0 %v9160_v1 }
 0x46f   : > { %6579 = vmatpush1.bf16.msra.mxu0 %v9119_v14  ;;  %v6686_v14 = vshrl.u32 %v11352_v13, 16  ;;  %v6728_v13 = vshrl.u32 %v11361_v30, 16 }
 0x470   : > { %6580 = vmatprep.subr.bf16.mxu0 %v9160_v1 }
 0x471   : > { %v6730_v8 = vrot.slane %v6728_v13, 4 }
 0x472   : > { %6415 = vmatmul.mubr.bf16.gmra.mrb[20].mxu0 %v8188_v37  ;;  %v8267_v37 = vcombine.high %v6670_v39, %v11401_v53 }
 0x473   : > { %6581 = vmatpush1.bf16.msra.mxu0 %v9120_v33  ;;  %8242 = vmatprep.mubr.msk.bf16.mxu0 %vm2628_vm4, %v8225_v36  ;;  %v6702_v36 = vrot.slane %v6700_v4, 4  ;;  %v8266_v4 = vcombine.low %v6670_v39, %v11401_v53  ;;  %v9143_v53 = vld [vmem:[%s11641_s7 + $0x288] sm:$0xff]  }
 0x474   : > { %6582 = vmatprep.subr.bf16.mxu0 %v9160_v1 }
 0x477   : > { %6583 = vmatpush1.bf16.msra.mxu0 %v9123_v44  ;;  %v6705_v44 = vrot.slane %v6703_v32, 5 }
 0x478   : > { %6584 = vmatprep.subr.bf16.mxu0 %v9160_v1 }
 0x47b   : > { %6585 = vmatpush1.bf16.msra.mxu0 %v9124_v21 }
 0x47c   : > { %6586 = vmatprep.subr.bf16.mxu0 %v9160_v1 }
 0x47f   : > { %6587 = vmatpush1.bf16.msra.mxu0 %v9125_v27  ;;  %v6688_v27 = vrot.slane %v6686_v14, 4 }
 0x480   : > { %6890 = vmatprep.subr.bf16.mxu0 %v9160_v1 }
 0x481   : > { %v6692_v42 = vor.u32 %v6691_v29, %v6688_v27  ;;  %v11473_v29 = vld [vmem:[#allocation3 + $0x88] sm:$0x11] }
 0x482   : > { %6601 = vmatmul.mubr.bf16.vlgmr.msra.gmra.mrb[8].mxu0 %v8224_v15  ;;  %v6706_v15 = vor.u32 %v6705_v44, %v6702_v36  ;;  %v6761_v36 = vrot.slane %v6759_v2, 5 }
 0x483   : > { %8243 = vmatprep.mubr.msk.bf16.mxu0 %vm2628_vm4, %v8227_v16  ;;  %6891 = vmatpush1.bf16.msra.mxu0 %v9127_v12  ;;  %v11425_v12 = vld [vmem:[#allocation3 + $0x58] sm:$0x11]  ;;  %v6731_v16 = vshll.u32 %v11361_v30, 16  ;;  %v6695_v30 = vshll.u32 %v11432_v50, 16  ;;  %v6693_v5 = vrot.slane %v6692_v42, 4 }
 0x484   : > { %6892 = vmatprep.subr.bf16.mxu0 %v9160_v1 }
 0x485   : > { %v6733_v58 = vrot.slane %v6731_v16, 5  ;;  %v6697_v9 = vrot.slane %v6695_v30, 5  ;;  %v6751_v30 = vshll.u32 %v11473_v29, 16 }
 0x487   : > { %6893 = vmatpush1.bf16.msra.mxu0 %v9128_v18  ;;  %v9140_v18 = vld [vmem:[%s11641_s7 + $0x270] sm:$0xff]   ;;  %v6698_v32 = vsel %vm9430_vm15, %v6693_v5, %v6697_v9  ;;  %v9145_v5 = vld [vmem:[%s11641_s7 + $0x298] sm:$0xff]   ;;  %v9146_v9 = vld [vmem:[%s11641_s7 + $0x2a0] sm:$0xff]  }
 0x488   : > { %6894 = vmatprep.subr.bf16.mxu0 %v9160_v1 }
 0x48a   : > { %6609 = vmatmul.mubr.bf16.gmra.mrb[12].mxu0 %v8226_v51  ;;  %v6714_v51 = vshrl.u32 %v11369_v10, 16 }
 0x48b   : > { %8244 = vmatprep.mubr.msk.bf16.mxu0 %vm2628_vm4, %v8229_v47  ;;  %6895 = vmatpush1.bf16.msra.mxu0 %v9131_v26  ;;  %v6709_v26 = vshll.u32 %v11425_v12, 16  ;;  %v6707_v47 = vrot.slane %v6706_v15, 4  ;;  %v11475_v15 = vld [vmem:[#allocation3 + $0x98] sm:$0x11] }
 0x48c   : > { %6896 = vmatprep.subr.bf16.mxu0 %v9160_v1  ;;  %v6716_v10 = vrot.slane %v6714_v51, 4  ;;  %v6765_v42 = vshll.u32 %v11475_v15, 16 }
 0x48f   : > { %6897 = vmatpush1.bf16.msra.mxu0 %v9132_v17 }
 0x490   : > { %6898 = vmatprep.subr.bf16.mxu0 %v9160_v1 }
 0x492   : > { %6617 = vmatmul.mubr.bf16.gmra.mrb[16].mxu0 %v8228_v34  ;;  %v6719_v34 = vrot.slane %v6717_v35, 5 }
 0x493   : > { %8245 = vmatprep.mubr.msk.bf16.mxu0 %vm2628_vm4, %v8231_v57  ;;  %6899 = vmatpush1.bf16.msra.mxu0 %v9135_v41  ;;  %v6711_v41 = vrot.slane %v6709_v26, 5  ;;  %v6756_v57 = vshrl.u32 %v11380_v19, 16  ;;  %v6723_v19 = vshll.u32 %v11456_v22, 16  ;;  %v9144_v26 = vld [vmem:[%s11641_s7 + $0x290] sm:$0xff]  }
 0x494   : > { %6900 = vmatprep.subr.bf16.mxu0 %v9160_v1 }
 0x495   : > { %v6712_v46 = vsel %vm9430_vm15, %v6707_v47, %v6711_v41  ;;  %v6725_v13 = vrot.slane %v6723_v19, 5 }
 0x496   : > { %v8269_v14 = vcombine.high %v6698_v32, %v6712_v46  ;;  %v8268_v51 = vcombine.low %v6698_v32, %v6712_v46  ;;  %v6964_v46 = vld [vmem:[#allocation3 + $0x30] sm:$0xee]  ;;  %v6993_v32 = vrot.slane %v11378_v11, 5  ;;  %v9148_v11 = vld [vmem:[%s11641_s7 + $0x2b0] sm:$0xff]  }
 0x497   : > { %6901 = vmatpush1.bf16.msra.mxu0 %v9136_v31  ;;  %v6734_v31 = vor.u32 %v6733_v58, %v6730_v8 }
 0x498   : > { %v11408_v24 = vpop.f32.mrb[24].mxu1  ;;  %6902 = vmatprep.subr.bf16.mxu0 %v9160_v1 }
 0x499   : > { %v5197_v33 = vpop.f32.mrb[25].mxu1 }
 0x49a   : > { %v11418_v56 = vpop.f32.mrb[26].mxu1  ;;  %6625 = vmatmul.mubr.bf16.gmra.mrb[20].mxu0 %v8230_v38  ;;  %v6737_v38 = vshll.u32 %v11447_v25, 16  ;;  %v6735_v33 = vrot.slane %v6734_v31, 4 }
 0x49b   : > { %v5200_v21 = vpop.f32.mrb[27].mxu1  ;;  %6903 = vmatpush1.bf16.msra.mxu0 %v9138_v45  ;;  %8284 = vmatprep.mubr.msk.bf16.mxu0 %vm2628_vm4, %v8267_v37  ;;  %v6720_v45 = vor.u32 %v6719_v34, %v6716_v10  ;;  %v6758_v37 = vrot.slane %v6756_v57, 4  ;;  %v6753_v10 = vrot.slane %v6751_v30, 5  ;;  %v7009_v30 = vrot.slane %v11447_v25, 5 }
 0x49c   : > { %6904 = vmatprep.subr.bf16.mxu0 %v9160_v1 }
 0x49d   : > { %v6721_v21 = vrot.slane %v6720_v45, 4  ;;  %v6989_v45 = vrot.slane %v11385_v40, 5  ;;  %v9149_v40 = vld [vmem:[%s11641_s7 + $0x2b8] sm:$0xff]  }
 0x49f   : > { %6905 = vmatpush1.bf16.msra.mxu0 %v9139_v28  ;;  %v6739_v28 = vrot.slane %v6737_v38, 5  ;;  %v6726_v35 = vsel %vm9430_vm15, %v6721_v21, %v6725_v13  ;;  %v7001_v21 = vrot.slane %v11425_v12, 5  ;;  %v6997_v13 = vrot.slane %v11432_v50, 5 }
 0x4a0   : > { %6906 = vmatprep.subr.bf16.mxu0 %v9160_v1  ;;  %v7005_v50 = vrot.slane %v11456_v22, 5 }
 0x4a1   : > { %v6740_v16 = vsel %vm9430_vm15, %v6735_v33, %v6739_v28  ;;  %v9151_v28 = vld [vmem:[%s11641_s7 + $0x2c8] sm:$0xff]  }
 0x4a2   : > { %v11438_v52 = vpop.f32.mrb[28].mxu1  ;;  %v8271_v47 = vcombine.high %v6726_v35, %v6740_v16  ;;  %v8270_v31 = vcombine.low %v6726_v35, %v6740_v16 }
 0x4a3   : > { %v5205_v17 = vpop.f32.mrb[29].mxu1  ;;  %6907 = vmatpush1.bf16.msra.mxu0 %v9140_v18  ;;  %v6762_v18 = vor.u32 %v6761_v36, %v6758_v37  ;;  %v9150_v37 = vld [vmem:[%s11641_s7 + $0x2c0] sm:$0xff]  }
 0x4a4   : > { %v11444_v20 = vpop.f32.mrb[30].mxu1  ;;  %6908 = vmatprep.subr.bf16.mxu0 %v9160_v1  ;;  %v6767_v17 = vrot.slane %v6765_v42, 5  ;;  %v6966_v36 = vld [vmem:[#allocation3 + $0x50] sm:$0xee] }
 0x4a5   : > { %v5208_v23 = vpop.f32.mrb[31].mxu1  ;;  %v6763_v58 = vrot.slane %v6762_v18, 4  ;;  %v6968_v18 = vld [vmem:[#allocation3 + $0x70] sm:$0xee] }
 0x4a6   : > { %v6754_v23 = vsel %vm9430_vm15, %v11233_v61, %v6753_v10  ;;  %v8293_v35 = vrot.slane %v6968_v18, 9  ;;  %v7295_v18 = vld [vmem:[%s11644_s10 + $0x78] sm:$0xff] }
 0x4a7   : > { %6909 = vmatpush1.bf16.msra.mxu0 %v9141_v3  ;;  %v6768_v57 = vsel %vm9430_vm15, %v6763_v58, %v6767_v17  ;;  %v6969_v58 = vld [vmem:[#allocation3 + $0x80] sm:$0xee]  ;;  %v6970_v17 = vld [vmem:[#allocation3 + $0x90] sm:$0xee] }
 0x4a8   : > { %7140 = vmatprep.subr.bf16.mxu0 %v9160_v1  ;;  %v8273_v2 = vcombine.high %v6754_v23, %v6768_v57  ;;  %v8295_v25 = vrot.slane %v6970_v17, 9 }
 0x4aa   : > { %v11463_v55 = vpop.f32.mrb[32].mxu1  ;;  %6923 = vmatmul.mubr.bf16.vlgmr.msra.gmra.mrb[8].mxu0 %v8266_v4  ;;  %v8289_v4 = vrot.slane %v6964_v46, 9 }
 0x4ab   : > { %v5213_v44 = vpop.f32.mrb[33].mxu1  ;;  %8285 = vmatprep.mubr.msk.bf16.mxu0 %vm2628_vm4, %v8269_v14  ;;  %7141 = vmatpush1.bf16.msra.mxu0 %v9142_v59  ;;  %v6963_v59 = vld [vmem:[#allocation3 + $0x20] sm:$0xee]  ;;  %v8272_v14 = vcombine.low %v6754_v23, %v6768_v57  ;;  %v7013_v23 = vrot.slane %v11473_v29, 5  ;;  %v7017_v57 = vrot.slane %v11475_v15, 5  ;;  %v7280_v29 = vld [vmem:[%s11644_s10] sm:$0xff] }
 0x4ac   : > { %v11470_v39 = vpop.f32.mrb[34].mxu1  ;;  %7142 = vmatprep.subr.bf16.mxu0 %v9160_v1  ;;  %v8288_v61 = vrot.slane %v6963_v59, 9  ;;  %v6994_v38 = vsel %vm9337_vm12, %v8289_v4, %v6993_v32  ;;  %v6965_v44 = vld [vmem:[#allocation3 + $0x40] sm:$0xee]  ;;  %v7281_v15 = vld [vmem:[%s11644_s10 + $0x8] sm:$0xff]  ;;  %v9161_v59 = vmov 0.0|0.0  }
 0x4ad   : > { %v5216_v27 = vpop.f32.mrb[35].mxu1  ;;  %8546 = vmatprep.subr.bf16.mxu1 %v9161_v59  ;;  %v8547_v4 = vpack.c.bf16 %v7281_v15, %v7280_v29  ;;  %v7283_v32 = vld [vmem:[%s11644_s10 + $0x18] sm:$0xff] }
 0x4ae   : > { %v6990_v19 = vsel %vm9337_vm12, %v8288_v61, %v6989_v45  ;;  %v8290_v27 = vrot.slane %v6965_v44, 9  ;;  %v7284_v61 = vld [vmem:[%s11644_s10 + $0x20] sm:$0xff]  ;;  %v7285_v45 = vld [vmem:[%s11644_s10 + $0x28] sm:$0xff]  ;;  %v7290_v44 = vld [vmem:[%s11644_s10 + $0x50] sm:$0xff] }
 0x4af   : > { %7143 = vmatpush1.bf16.msra.mxu0 %v9143_v53  ;;  %v8317_v33 = vcombine.high %v6990_v19, %v6994_v38  ;;  %v8291_v53 = vrot.slane %v6966_v36, 9  ;;  %v8316_v42 = vcombine.low %v6990_v19, %v6994_v38  ;;  %8548 = vmatpush3.bf16.msra.mxu1 %v8547_v4  ;;  %v7286_v38 = vld [vmem:[%s11644_s10 + $0x30] sm:$0xff]  ;;  %v9163_v19 = vmov 0.0  }
 0x4b0   : > { %7144 = vmatprep.subr.bf16.mxu0 %v9160_v1  ;;  %8549 = vmatprep.subr.bf16.mxu1 %v9161_v59 }
 0x4b1   : > { %v7002_v16 = vsel %vm9337_vm12, %v8291_v53, %v7001_v21  ;;  %8543 = vmatprep.mubr.msk.f32.mxu1 %vm9162_vm5, %v9163_v19  ;;  %v7291_v53 = vld [vmem:[%s11644_s10 + $0x58] sm:$0xff] }
 0x4b2   : > { %v11487_v8 = vpop.f32.mrb[36].mxu1  ;;  %6931 = vmatmul.mubr.bf16.gmra.mrb[12].mxu0 %v8268_v51  ;;  %v6967_v51 = vld [vmem:[#allocation3 + $0x60] sm:$0xee]  ;;  %v8562_v21 = vpack.c.bf16 %v7291_v53, %v7290_v44 }
 0x4b3   : > { %v5221_v3 = vpop.f32.mrb[37].mxu1  ;;  %8286 = vmatprep.mubr.msk.bf16.mxu0 %vm2628_vm4, %v8271_v47  ;;  %7145 = vmatpush1.bf16.msra.mxu0 %v9144_v26  ;;  %v6998_v26 = vsel %vm9337_vm12, %v8290_v27, %v6997_v13  ;;  %v7010_v47 = vsel %vm9337_vm12, %v8293_v35, %v7009_v30  ;;  %v7293_v27 = vld [vmem:[%s11644_s10 + $0x68] sm:$0xff]  ;;  %v8339_v30 = vld [vmem:[%s11643_s9] ss:$0 sm:$0xff] }
 0x4b4   : > { %v11493_v41 = vpop.f32.mrb[38].mxu1  ;;  %7146 = vmatprep.subr.bf16.mxu0 %v9160_v1  ;;  %v8319_v12 = vcombine.high %v6998_v26, %v7002_v16  ;;  %v8318_v3 = vcombine.low %v6998_v26, %v7002_v16  ;;  %v7294_v16 = vld [vmem:[%s11644_s10 + $0x70] sm:$0xff] }
 0x4b5   : > { %v5224_v34 = vpop.f32.mrb[39].mxu1 }
 0x4b6   : > { %v8294_v34 = vrot.slane %v6969_v58, 9 }
 0x4b7   : > { %7147 = vmatpush1.bf16.msra.mxu0 %v9145_v5 }
 0x4b8   : > { %7148 = vmatprep.subr.bf16.mxu0 %v9160_v1  ;;  %v7014_v22 = vsel %vm9337_vm12, %v8294_v34, %v7013_v23 }
 0x4ba   : > { %6939 = vmatmul.mubr.bf16.gmra.mrb[16].mxu0 %v8270_v31 }
 0x4bb   : > { %8287 = vmatprep.mubr.msk.bf16.mxu0 %vm2628_vm4, %v8273_v2  ;;  %7149 = vmatpush1.bf16.msra.mxu0 %v9146_v9  ;;  %v7018_v9 = vsel %vm9337_vm12, %v8295_v25, %v7017_v57 }
 0x4bc   : > { %7150 = vmatprep.subr.bf16.mxu0 %v9160_v1  ;;  %v8323_v31 = vcombine.high %v7014_v22, %v7018_v9  ;;  %v8322_v2 = vcombine.low %v7014_v22, %v7018_v9 }
 0x4bf   : > { %7151 = vmatpush1.bf16.msra.mxu0 %v9147_v48  ;;  %v8550_v48 = vpack.c.bf16 %v7283_v32, %v7282_v62 }
 0x4c0   : > { %7152 = vmatprep.subr.bf16.mxu0 %v9160_v1 }
 0x4c1   : > { %8551 = vmatpush3.bf16.msra.mxu1 %v8550_v48 }
 0x4c2   : > { %6947 = vmatmul.mubr.bf16.gmra.mrb[20].mxu0 %v8272_v14  ;;  %8552 = vmatprep.subr.bf16.mxu1 %v9161_v59  ;;  %v7287_v14 = vld [vmem:[%s11644_s10 + $0x38] sm:$0xff] }
 0x4c3   : > { %7153 = vmatpush1.bf16.msra.mxu0 %v9148_v11  ;;  %8334 = vmatprep.mubr.msk.bf16.mxu0 %vm2628_vm4, %v8317_v33  ;;  %v8553_v11 = vpack.c.bf16 %v7285_v45, %v7284_v61  ;;  %v8556_v33 = vpack.c.bf16 %v7287_v14, %v7286_v38 }
 0x4c4   : > { %7154 = vmatprep.subr.bf16.mxu0 %v9160_v1 }
 0x4c5   : > { %8554 = vmatpush3.bf16.msra.mxu1 %v8553_v11 }
 0x4c6   : > { %8555 = vmatprep.subr.bf16.mxu1 %v9161_v59 }
 0x4c7   : > { %7155 = vmatpush1.bf16.msra.mxu0 %v9149_v40  ;;  %v7288_v40 = vld [vmem:[%s11644_s10 + $0x40] sm:$0xff] }
 0x4c8   : > { %7156 = vmatprep.subr.bf16.mxu0 %v9160_v1 }
 0x4c9   : > { %8557 = vmatpush3.bf16.msra.mxu1 %v8556_v33 }
 0x4ca   : > { %8558 = vmatprep.subr.bf16.mxu1 %v9161_v59 }
 0x4cb   : > { %7157 = vmatpush1.bf16.msra.mxu0 %v9150_v37  ;;  %v7289_v37 = vld [vmem:[%s11644_s10 + $0x48] sm:$0xff] }
 0x4cc   : > { %7158 = vmatprep.subr.bf16.mxu0 %v9160_v1  ;;  %v8292_v1 = vrot.slane %v6967_v51, 9  ;;  %v8559_v36 = vpack.c.bf16 %v7289_v37, %v7288_v40 }
 0x4ce   : > { %v7006_v5 = vsel %vm9337_vm12, %v8292_v1, %v7005_v50  ;;  %8560 = vmatpush3.bf16.msra.mxu1 %v8559_v36 }
 0x4cf   : > { %7159 = vmatpush1.bf16.msra.mxu0 %v9151_v28  ;;  %v8321_v10 = vcombine.high %v7006_v5, %v7010_v47  ;;  %v8320_v46 = vcombine.low %v7006_v5, %v7010_v47  ;;  %8561 = vmatprep.subr.bf16.mxu1 %v9161_v59  ;;  %v7292_v28 = vld [vmem:[%s11644_s10 + $0x60] sm:$0xff] }
 0x4d0   : > { %v8565_v13 = vpack.c.bf16 %v7293_v27, %v7292_v28 }
 0x4d2   : > { %7173 = vmatmul.mubr.bf16.vlgmr.msra.gmra.mrb[8].mxu0 %v8316_v42  ;;  %8563 = vmatpush3.bf16.msra.mxu1 %v8562_v21  ;;  %v8568_v42 = vpack.c.bf16 %v7295_v18, %v7294_v16 }
 0x4d3   : > { %8335 = vmatprep.mubr.msk.bf16.mxu0 %vm2628_vm4, %v8319_v12  ;;  %8564 = vmatprep.subr.bf16.mxu1 %v9161_v59  ;;  %v8338_v12 = vld [vmem:[%s11642_s8] ss:$0 sm:$0xff] }
 0x4d6   : > { %8566 = vmatpush3.bf16.msra.mxu1 %v8565_v13 }
 0x4d7   : > { %8567 = vmatprep.subr.bf16.mxu1 %v9161_v59 }
 0x4da   : > { %7181 = vmatmul.mubr.bf16.gmra.mrb[12].mxu0 %v8318_v3  ;;  %8569 = vmatpush3.bf16.msra.mxu1 %v8568_v42 }
 0x4db   : > { %8336 = vmatprep.mubr.msk.bf16.mxu0 %vm2628_vm4, %v8321_v10 }
 0x4e2   : > { %7189 = vmatmul.mubr.bf16.gmra.mrb[16].mxu0 %v8320_v46 }
 0x4e3   : > { %8337 = vmatprep.mubr.msk.bf16.mxu0 %vm2628_vm4, %v8323_v31 }
 0x4ea   : > { %7197 = vmatmul.mubr.bf16.gmra.mrb[20].mxu0 %v8322_v2 }
 0x5a5   : > { %v7174_v26 = vpop.f32.mrb[8].mxu0 }
 0x5a6   : > { %v8578_v51 = vadd.f32 %v7174_v26, %v11408_v24  ;;  %v7176_v35 = vpop.f32.mrb[9].mxu0 }
 0x5a7   : > { %v7177_v1 = vpop.f32.mrb[10].mxu0 }
 0x5a8   : > { %v7220_v50 = vmul.f32 %v8578_v51, %v8338_v12  ;;  %v8579_v47 = vadd.f32 %v7177_v1, %v11418_v56  ;;  %v7179_v58 = vpop.f32.mrb[11].mxu0 }
 0x5aa   : > { %v7235_v17 = vadd.f32 %v8339_v30, %v7220_v50  ;;  %v7221_v3 = vmul.f32 %v8579_v47, %v8338_v12 }
 0x5ac   : > { %v7251_v5 = vadd.f32 %v7235_v17, %v9872_v0  ;;  %v7236_v10 = vadd.f32 %v8339_v30, %v7221_v3 }
 0x5ad   : > { %v7182_v34 = vpop.f32.mrb[12].mxu0 }
 0x5ae   : > { %v7252_v23 = vadd.f32 %v7236_v10, %v9884_v54  ;;  %v8580_v24 = vadd.f32 %v7182_v34, %v11438_v52  ;;  %v7184_v25 = vpop.f32.mrb[13].mxu0  ;;  %v7259_v22 = vmax.f32 %v7251_v5, 0.0  ;;  %v7367_v5 = vlaneseq }
 0x5af   : > { %v7185_v57 = vpop.f32.mrb[14].mxu0 }
 0x5b0   : > { %v7260_v9 = vmax.f32 %v7252_v23, 0.0  ;;  %v7222_v46 = vmul.f32 %v8580_v24, %v8338_v12  ;;  %v8581_v31 = vadd.f32 %v7185_v57, %v11444_v20  ;;  %v7187_v2 = vpop.f32.mrb[15].mxu0  ;;  %v7368_v10 = vshrl.u32 %v7367_v5, 7 }
 0x5b2   : > { %v7267_v56 = vadd.f32 %v7260_v9, %v7259_v22  ;;  %v7237_v29 = vadd.f32 %v8339_v30, %v7222_v46  ;;  %v7223_v15 = vmul.f32 %v8581_v31, %v8338_v12 }
 0x5b4   : > { %v7253_v62 = vadd.f32 %v7237_v29, %v9869_v43  ;;  %v7238_v0 = vadd.f32 %v8339_v30, %v7223_v15 }
 0x5b5   : > { %v7190_v59 = vpop.f32.mrb[16].mxu0 }
 0x5b6   : > { %v7261_v4 = vmax.f32 %v7253_v62, 0.0  ;;  %v7254_v54 = vadd.f32 %v7238_v0, %v9879_v49  ;;  %v8582_v52 = vadd.f32 %v7190_v59, %v11463_v55  ;;  %v7192_v32 = vpop.f32.mrb[17].mxu0 }
 0x5b7   : > { %v7193_v48 = vpop.f32.mrb[18].mxu0 }
 0x5b8   : > { %v7268_v61 = vadd.f32 %v7267_v56, %v7261_v4  ;;  %v7262_v45 = vmax.f32 %v7254_v54, 0.0  ;;  %v7224_v38 = vmul.f32 %v8582_v52, %v8338_v12  ;;  %v8583_v20 = vadd.f32 %v7193_v48, %v11470_v39  ;;  %v7195_v11 = vpop.f32.mrb[19].mxu0 }
 0x5ba   : > { %v7269_v14 = vadd.f32 %v7268_v61, %v7262_v45  ;;  %v7239_v19 = vadd.f32 %v8339_v30, %v7224_v38  ;;  %v7225_v33 = vmul.f32 %v8583_v20, %v8338_v12 }
 0x5bc   : > { %v7255_v43 = vadd.f32 %v7239_v19, %v9910_v7  ;;  %v7240_v40 = vadd.f32 %v8339_v30, %v7225_v33 }
 0x5bd   : > { %v7198_v37 = vpop.f32.mrb[20].mxu0 }
 0x5be   : > { %v7263_v36 = vmax.f32 %v7255_v43, 0.0  ;;  %v7256_v49 = vadd.f32 %v7240_v40, %v9945_v60  ;;  %v8584_v55 = vadd.f32 %v7198_v37, %v11487_v8  ;;  %v7200_v44 = vpop.f32.mrb[21].mxu0 }
 0x5bf   : > { %v7201_v53 = vpop.f32.mrb[22].mxu0 }
 0x5c0   : > { %v7270_v21 = vadd.f32 %v7269_v14, %v7263_v36  ;;  %v7264_v28 = vmax.f32 %v7256_v49, 0.0  ;;  %v7226_v27 = vmul.f32 %v8584_v55, %v8338_v12  ;;  %v8585_v39 = vadd.f32 %v7201_v53, %v11493_v41  ;;  %v7203_v13 = vpop.f32.mrb[23].mxu0 }
 0x5c2   : > { %v7271_v16 = vadd.f32 %v7270_v21, %v7264_v28  ;;  %v7241_v18 = vadd.f32 %v8339_v30, %v7226_v27  ;;  %v7227_v42 = vmul.f32 %v8585_v39, %v8338_v12  ;;  %v7369_v12 = vsub.s32 0, %v7368_v10 }
 0x5c4   : > { %v7257_v7 = vadd.f32 %v7241_v18, %v9908_v6  ;;  %v7242_v26 = vadd.f32 %v8339_v30, %v7227_v42  ;;  %v7296_v6 = vld [vmem:[%s11645_s11] sm:$0x1] }
 0x5c6   : > { %v7265_v51 = vmax.f32 %v7257_v7, 0.0  ;;  %v7258_v60 = vadd.f32 %v7242_v26, %v9943_v63 }
 0x5c8   : > { %v7272_v35 = vadd.f32 %v7271_v16, %v7265_v51  ;;  %v7266_v8 = vmax.f32 %v7258_v60, 0.0 }
 0x5ca   : > { %v7273_v1 = vadd.f32 %v7272_v35, %v7266_v8 }
 0x5cc   : > { %v7274_v50 = vrot.slane %v7273_v1, 4 }
 0x5ce   : > { %v7275_v47 = vadd.f32 %v7274_v50, %v7273_v1 }
 0x5d0   : > { %v7276_v58 = vrot.slane %v7275_v47, 2 }
 0x5d2   : > { %v7277_v17 = vadd.f32 %v7276_v58, %v7275_v47 }
 0x5d4   : > { %v7278_v3 = vrot.slane %v7277_v17, 1 }
 0x5d6   : > { %v7279_v41 = vadd.f32 %v7278_v3, %v7277_v17 }
 0x5d8   : > { %8544 = vmatmul.mubr.f32.vlgmr.msra.gmra.mrb[40].mxu1 %v7279_v41 }
 0x6ab   : > { %v7363_v30 = vpop.f32.mrb[40].mxu1 }
 0x6ac   : > { %v7364_v63 = vadd.f32 %v7363_v30, %v7296_v6  ;;  %v8545_v34 = vpop.f32.mrb[41].mxu1 }
 0x6ae   : > { %v7370_v23 = vrot.slane %v7364_v63, %v7369_v12 }
 0x6b0   : > { %7371 = vst [vmem:[%s411_s20] sm:$0xff] %v7370_v23 }
 0x6b1 PF: > { %s22_s21 = sadd.s32 1, %s9158_s21  }
 0x6b2   : > { %p19_p4 = scmp.ge.s32.totalorder %s22_s21, 4  }
 0x6b4   :  { %21 = sbr.rel (!%p19_p4) target bundleno = 1 (0x1), region = 126 }

</bundles_post_ra>
